<compile_context>
chip_gen: v7x
topology: tpu7x:2x2x1
jax: 0.10.0
libtpu: 0.0.40
codegen_flags: <defaults>
</compile_context>

<pallas_src>
import jax
import jax.numpy as jnp
from jax.experimental import pallas as pl
from jax.experimental.pallas import tpu as pltpu

IN_FEATURES = 30 * 30 * 3   # 2700
HIDDEN = 128
OUT_FEATURES = 5
OUT_PAD = 128               # lane-dense padded output width
DEFAULT_BLOCK_B = 256       # batch tile (multiple of 8 for f32 sublanes)


def mlp_kernel(x_ref, w1_ref, b1_ref, w2_ref, b2_ref, o_ref):
    # x_ref: (TB, 2700)   w1_ref: (2700, 128)  b1_ref: (1, 128)
    # w2_ref: (128, 128)  b2_ref: (1, 128)     o_ref: (TB, 128)
    h = jnp.dot(x_ref[...], w1_ref[...], preferred_element_type=jnp.float32)
    h = jnp.maximum(h + b1_ref[...], 0.0)                     # bias + ReLU (f32)
    o_ref[...] = (
        jnp.dot(h, w2_ref[...], preferred_element_type=jnp.float32) + b2_ref[...]
    )


def nn_forward(x_nchw, w1, b1, w2, b2, *, block_b=DEFAULT_BLOCK_B, use_bf16=False):
    """Pallas implementation of NN.forward. x_nchw: (B, 3, 30, 30) float32."""
    batch = x_nchw.shape[0]
    x2d = x_nchw.reshape(batch, -1).astype(jnp.float32)       # glue: torch .view

    # Pad batch up to a multiple of the tile so the grid covers it exactly.
    num_tiles = pl.cdiv(batch, block_b)
    padded_b = num_tiles * block_b
    if padded_b != batch:
        x2d = jnp.pad(x2d, ((0, padded_b - batch), (0, 0)))

    # Lane-dense padding of the tiny second GEMM / output (removes masked vst).
    w2_p = jnp.zeros((HIDDEN, OUT_PAD), jnp.float32).at[:, :OUT_FEATURES].set(
        w2.astype(jnp.float32))
    b2_p = jnp.zeros((1, OUT_PAD), jnp.float32).at[:, :OUT_FEATURES].set(
        b2.reshape(1, OUT_FEATURES).astype(jnp.float32))
    b1_2d = b1.reshape(1, HIDDEN).astype(jnp.float32)
    w1_in = w1.astype(jnp.float32)

    if use_bf16:
        # Halves HBM traffic for the dominant operands; f32 accumulation kept.
        x2d = x2d.astype(jnp.bfloat16)
        w1_in = w1_in.astype(jnp.bfloat16)

    itemsize_x = jnp.dtype(x2d.dtype).itemsize
    bytes_accessed = (
        padded_b * IN_FEATURES * itemsize_x            # x
        + IN_FEATURES * HIDDEN * itemsize_x            # W1
        + HIDDEN * 4 + HIDDEN * OUT_PAD * 4 + OUT_PAD * 4   # b1, W2, b2
        + padded_b * OUT_PAD * 4                       # out
    )
    cost = pl.CostEstimate(
        flops=2 * padded_b * IN_FEATURES * HIDDEN + 2 * padded_b * HIDDEN * OUT_PAD,
        transcendentals=0,
        bytes_accessed=bytes_accessed,
    )

    out_padded = pl.pallas_call(
        mlp_kernel,
        out_shape=jax.ShapeDtypeStruct((padded_b, OUT_PAD), jnp.float32),
        grid=(num_tiles,),
        in_specs=[
            pl.BlockSpec((block_b, IN_FEATURES), lambda i: (i, 0)),   # x tile
            pl.BlockSpec((IN_FEATURES, HIDDEN), lambda i: (0, 0)),    # W1 (resident)
            pl.BlockSpec((1, HIDDEN), lambda i: (0, 0)),              # b1 (resident)
            pl.BlockSpec((HIDDEN, OUT_PAD), lambda i: (0, 0)),        # W2 (resident)
            pl.BlockSpec((1, OUT_PAD), lambda i: (0, 0)),             # b2 (resident)
        ],
        out_specs=pl.BlockSpec((block_b, OUT_PAD), lambda i: (i, 0)),
        compiler_params=pltpu.CompilerParams(
            dimension_semantics=("parallel",),   # v7x: shard batch tiles over 2 TCs
        ),
        cost_estimate=cost,
    )(x2d, w1_in, b1_2d, w2_p, b2_p)

    return out_padded[:batch, :OUT_FEATURES]


def init_params(key):
    """Deterministic init matching the nn.Linear shapes (Kaiming-uniform-ish)."""
    k1, k2, k3, k4 = jax.random.split(key, 4)
    bound1 = 1.0 / jnp.sqrt(IN_FEATURES)
    bound2 = 1.0 / jnp.sqrt(HIDDEN)
    w1 = jax.random.uniform(k1, (IN_FEATURES, HIDDEN), jnp.float32, -bound1, bound1)
    b1 = jax.random.uniform(k2, (HIDDEN,), jnp.float32, -bound1, bound1)
    w2 = jax.random.uniform(k3, (HIDDEN, OUT_FEATURES), jnp.float32, -bound2, bound2)
    b2 = jax.random.uniform(k4, (OUT_FEATURES,), jnp.float32, -bound2, bound2)
    return w1, b1, w2, b2


if __name__ == "__main__":
    key = jax.random.PRNGKey(0)
    k_x, k_p = jax.random.split(key)
    batch = 2
    x = jax.random.normal(k_x, (batch, 3, 30, 30), dtype=jnp.float32)
    w1, b1, w2, b2 = init_params(k_p)

    out = nn_forward(x, w1, b1, w2, b2)
    out = jax.block_until_ready(out)

    # Reference check in plain JAX (same math) to validate the kernel.
    x2d = x.reshape(batch, -1)
    ref = jnp.maximum(x2d @ w1 + b1, 0.0) @ w2 + b2
    assert out.shape == (batch, OUT_FEATURES)
    assert jnp.allclose(out, ref, atol=1e-4, rtol=1e-4)

    print("KERNEL_OK")
</pallas_src>

<mosaic_0001>
module attributes {stable_mosaic.version = 11 : i64} {
  func.func @mlp_kernel(%arg0: i32, %arg1: memref<256x2700xf32, #tpu.memory_space<vmem>>, %arg2: memref<2700x128xf32, #tpu.memory_space<vmem>>, %arg3: memref<1x128xf32, #tpu.memory_space<vmem>>, %arg4: memref<128x128xf32, #tpu.memory_space<vmem>>, %arg5: memref<1x128xf32, #tpu.memory_space<vmem>>, %arg6: memref<256x128xf32, #tpu.memory_space<vmem>>) attributes {dimension_semantics = [#tpu.dimension_semantics<parallel>], iteration_bounds = array<i64: 1>, scalar_prefetch = 0 : i64, scratch_operands = 0 : i64, tpu.core_type = #tpu.core_type<tc>, window_params = [{transform_indices = @transform_0, window_bounds = array<i64: 256, 2700>}, {pipeline_mode = #tpu.pipeline_mode<synchronous>, transform_indices = @transform_1, window_bounds = array<i64: 2700, 128>}, {pipeline_mode = #tpu.pipeline_mode<synchronous>, transform_indices = @transform_2, window_bounds = array<i64: 1, 128>}, {pipeline_mode = #tpu.pipeline_mode<synchronous>, transform_indices = @transform_3, window_bounds = array<i64: 128, 128>}, {pipeline_mode = #tpu.pipeline_mode<synchronous>, transform_indices = @transform_4, window_bounds = array<i64: 1, 128>}, {transform_indices = @transform_5, window_bounds = array<i64: 256, 128>}]} {
    %c0 = arith.constant 0 : index
    %c0_0 = arith.constant 0 : index
    %0 = vector.load %arg1[%c0, %c0_0] : memref<256x2700xf32, #tpu.memory_space<vmem>>, vector<256x2700xf32>
    %c0_1 = arith.constant 0 : index
    %c0_2 = arith.constant 0 : index
    %1 = vector.load %arg2[%c0_1, %c0_2] : memref<2700x128xf32, #tpu.memory_space<vmem>>, vector<2700x128xf32>
    %cst = arith.constant dense<0.000000e+00> : vector<256x128xf32>
    %2 = tpu.matmul %0, %1, %cst {dimension_numbers = #tpu.dot_dimension_numbers<[1], [0], [0], [1], [0, 0, 1, 1], [], []>} : vector<256x2700xf32>, vector<2700x128xf32>, vector<256x128xf32> -> vector<256x128xf32>
    %c0_3 = arith.constant 0 : index
    %c0_4 = arith.constant 0 : index
    %3 = vector.load %arg3[%c0_3, %c0_4] : memref<1x128xf32, #tpu.memory_space<vmem>>, vector<1x128xf32>
    %4 = vector.broadcast %3 : vector<1x128xf32> to vector<256x128xf32>
    %5 = arith.addf %2, %4 : vector<256x128xf32>
    %cst_5 = arith.constant 0.000000e+00 : f32
    %6 = vector.broadcast %cst_5 : f32 to vector<256x128xf32>
    %7 = arith.maximumf %5, %6 : vector<256x128xf32>
    %c0_6 = arith.constant 0 : index
    %c0_7 = arith.constant 0 : index
    %8 = vector.load %arg4[%c0_6, %c0_7] : memref<128x128xf32, #tpu.memory_space<vmem>>, vector<128x128xf32>
    %cst_8 = arith.constant dense<0.000000e+00> : vector<256x128xf32>
    %9 = tpu.matmul %7, %8, %cst_8 {dimension_numbers = #tpu.dot_dimension_numbers<[1], [0], [0], [1], [0, 0, 1, 1], [], []>} : vector<256x128xf32>, vector<128x128xf32>, vector<256x128xf32> -> vector<256x128xf32>
    %c0_9 = arith.constant 0 : index
    %c0_10 = arith.constant 0 : index
    %10 = vector.load %arg5[%c0_9, %c0_10] : memref<1x128xf32, #tpu.memory_space<vmem>>, vector<1x128xf32>
    %11 = vector.broadcast %10 : vector<1x128xf32> to vector<256x128xf32>
    %12 = arith.addf %9, %11 : vector<256x128xf32>
    %c0_11 = arith.constant 0 : index
    %c0_12 = arith.constant 0 : index
    %13 = vector.load %arg6[%c0_11, %c0_12] : memref<256x128xf32, #tpu.memory_space<vmem>>, vector<256x128xf32>
    tpu.vector_store %arg6[%c0_11, %c0_12], %12 {strides = array<i32>} : memref<256x128xf32, #tpu.memory_space<vmem>>, vector<256x128xf32>,
    return
  }
  func.func @transform_0(%arg0: i32) -> (i32, i32) {
    %c0_i32 = arith.constant 0 : i32
    %c0_i32_0 = arith.constant 0 : i32
    return %arg0, %c0_i32 : i32, i32
  }
  func.func @transform_1(%arg0: i32) -> (i32, i32) {
    %c0_i32 = arith.constant 0 : i32
    %c0_i32_0 = arith.constant 0 : i32
    %c0_i32_1 = arith.constant 0 : i32
    return %c0_i32, %c0_i32_0 : i32, i32
  }
  func.func @transform_2(%arg0: i32) -> (i32, i32) {
    %c0_i32 = arith.constant 0 : i32
    %c0_i32_0 = arith.constant 0 : i32
    %c0_i32_1 = arith.constant 0 : i32
    return %c0_i32, %c0_i32_0 : i32, i32
  }
  func.func @transform_3(%arg0: i32) -> (i32, i32) {
    %c0_i32 = arith.constant 0 : i32
    %c0_i32_0 = arith.constant 0 : i32
    %c0_i32_1 = arith.constant 0 : i32
    return %c0_i32, %c0_i32_0 : i32, i32
  }
  func.func @transform_4(%arg0: i32) -> (i32, i32) {
    %c0_i32 = arith.constant 0 : i32
    %c0_i32_0 = arith.constant 0 : i32
    %c0_i32_1 = arith.constant 0 : i32
    return %c0_i32, %c0_i32_0 : i32, i32
  }
  func.func @transform_5(%arg0: i32) -> (i32, i32) {
    %c0_i32 = arith.constant 0 : i32
    %c0_i32_0 = arith.constant 0 : i32
    return %arg0, %c0_i32 : i32, i32
  }
}

</mosaic_0001>

<bundles_post_ra>
// kernel: tpu_custom_call.1
= control target key start
LH: loop header
LB: loop body
LE: loop exit
PB: predicated region body
PF: predicated region fallthrough
CT: control target
= control target key end

     0   :  { %v5378_v3 = vmov 0.0|0.0   ;;  %s9038_s0 = inlined_call_operand.vmem [shape: f32[256,2700], index: 0, kind: input, shape index: {}]   ;;  %s9039_s1 = inlined_call_operand.vmem [shape: f32[2700,128], index: 1, kind: input, shape index: {}]   ;;  %s9040_s2 = inlined_call_operand.vmem [shape: f32[1,128], index: 2, kind: input, shape index: {}]   ;;  %s9041_s3 = inlined_call_operand.vmem [shape: f32[128,128], index: 3, kind: input, shape index: {}]   ;;  %s9042_s4 = inlined_call_operand.vmem [shape: f32[1,128], index: 4, kind: input, shape index: {}]   ;;  %s9043_s5 = inlined_call_operand.hbm [shape: f32[256,128], index: 5, kind: output, shape index: {}]  }
   0x1   :  { %v725_v0 = vld [vmem:[%s9039_s1] sm:$0xff]  ;;  %v726_v1 = vld [vmem:[%s9039_s1 + $0x8] sm:$0xff]  ;;  %4137 = vmatprep.subr.bf16.mxu1 %v5378_v3  ;;  %4377 = vmatprep.subr.bf16.mxu0 %v5378_v3  ;;  %v727_v6 = vld [vmem:[%s9039_s1 + $0x10] sm:$0xff] }
   0x2   :  { %v885_v2 = vld [vmem:[%s9039_s1 + $0x500] sm:$0xff]  ;;  %v4138_v4 = vpack.c.bf16 %v726_v1, %v725_v0  ;;  %v886_v5 = vld [vmem:[%s9039_s1 + $0x508] sm:$0xff]  ;;  %v728_v7 = vld [vmem:[%s9039_s1 + $0x18] sm:$0xff] }
   0x3   :  { %v5433_v8 = vpack.c.bf16 %v886_v5, %v885_v2  ;;  %v887_v9 = vld [vmem:[%s9039_s1 + $0x510] sm:$0xff]  ;;  %v888_v10 = vld [vmem:[%s9039_s1 + $0x518] sm:$0xff]  ;;  %v4141_v11 = vpack.c.bf16 %v728_v7, %v727_v6  ;;  %v729_v13 = vld [vmem:[%s9039_s1 + $0x20] sm:$0xff] }
   0x4   :  { %4139 = vmatpush1.bf16.msra.mxu1 %v4138_v4  ;;  %v5443_v12 = vpack.c.bf16 %v888_v10, %v887_v9  ;;  %v730_v14 = vld [vmem:[%s9039_s1 + $0x28] sm:$0xff]  ;;  %v889_v15 = vld [vmem:[%s9039_s1 + $0x520] sm:$0xff]  ;;  %v731_v19 = vld [vmem:[%s9039_s1 + $0x30] sm:$0xff] }
   0x5   :  { %4379 = vmatpush1.bf16.msra.mxu0 %v5433_v8  ;;  %4140 = vmatprep.subr.bf16.mxu1 %v5378_v3  ;;  %v890_v16 = vld [vmem:[%s9039_s1 + $0x528] sm:$0xff]  ;;  %v4144_v17 = vpack.c.bf16 %v730_v14, %v729_v13  ;;  %v732_v20 = vld [vmem:[%s9039_s1 + $0x38] sm:$0xff]  ;;  %v891_v21 = vld [vmem:[%s9039_s1 + $0x530] sm:$0xff] }
   0x6   :  { %4380 = vmatprep.subr.bf16.mxu0 %v5378_v3  ;;  %v5460_v18 = vpack.c.bf16 %v890_v16, %v889_v15  ;;  %v892_v22 = vld [vmem:[%s9039_s1 + $0x538] sm:$0xff]  ;;  %v4147_v23 = vpack.c.bf16 %v732_v20, %v731_v19  ;;  %v733_v25 = vld [vmem:[%s9039_s1 + $0x40] sm:$0xff]  ;;  %v734_v26 = vld [vmem:[%s9039_s1 + $0x48] sm:$0xff] }
   0x7   :  { %v5477_v24 = vpack.c.bf16 %v892_v22, %v891_v21  ;;  %v893_v27 = vld [vmem:[%s9039_s1 + $0x540] sm:$0xff]  ;;  %v894_v28 = vld [vmem:[%s9039_s1 + $0x548] sm:$0xff]  ;;  %v4150_v29 = vpack.c.bf16 %v734_v26, %v733_v25  ;;  %v735_v31 = vld [vmem:[%s9039_s1 + $0x50] sm:$0xff] }
   0x8   :  { %4142 = vmatpush1.bf16.msra.mxu1 %v4141_v11  ;;  %v5494_v30 = vpack.c.bf16 %v894_v28, %v893_v27  ;;  %v736_v32 = vld [vmem:[%s9039_s1 + $0x58] sm:$0xff]  ;;  %v895_v33 = vld [vmem:[%s9039_s1 + $0x550] sm:$0xff]  ;;  %v737_v37 = vld [vmem:[%s9039_s1 + $0x60] sm:$0xff] }
   0x9   :  { %4382 = vmatpush1.bf16.msra.mxu0 %v5443_v12  ;;  %4143 = vmatprep.subr.bf16.mxu1 %v5378_v3  ;;  %v896_v34 = vld [vmem:[%s9039_s1 + $0x558] sm:$0xff]  ;;  %v4153_v35 = vpack.c.bf16 %v736_v32, %v735_v31  ;;  %v738_v38 = vld [vmem:[%s9039_s1 + $0x68] sm:$0xff]  ;;  %v897_v39 = vld [vmem:[%s9039_s1 + $0x560] sm:$0xff] }
   0xa   :  { %4383 = vmatprep.subr.bf16.mxu0 %v5378_v3  ;;  %v5511_v36 = vpack.c.bf16 %v896_v34, %v895_v33  ;;  %v898_v40 = vld [vmem:[%s9039_s1 + $0x568] sm:$0xff]  ;;  %v32_v42 = vld [vmem:[%s9038_s0 + $0x58] sm:$0xff]  ;;  %v4156_v43 = vpack.c.bf16 %v738_v38, %v737_v37  ;;  %v739_v45 = vld [vmem:[%s9039_s1 + $0x70] sm:$0xff] }
   0xb   :  { %v22_v41 = vld [vmem:[%s9038_s0 + $0x8] sm:$0xff]  ;;  %2360 = vmatprep.mubr.f32.mxu0 %v32_v42  ;;  %v5534_v44 = vpack.c.bf16 %v898_v40, %v897_v39  ;;  %v740_v46 = vld [vmem:[%s9039_s1 + $0x78] sm:$0xff]  ;;  %v899_v47 = vld [vmem:[%s9039_s1 + $0x570] sm:$0xff] }
   0xc   :  { %4145 = vmatpush1.bf16.msra.mxu1 %v4144_v17  ;;  %1235 = vmatprep.mubr.f32.mxu1 %v22_v41  ;;  %v900_v48 = vld [vmem:[%s9039_s1 + $0x578] sm:$0xff]  ;;  %v4159_v49 = vpack.c.bf16 %v740_v46, %v739_v45  ;;  %v741_v51 = vld [vmem:[%s9039_s1 + $0x80] sm:$0xff]  ;;  %v742_v52 = vld [vmem:[%s9039_s1 + $0x88] sm:$0xff] }
   0xd   :  { %4385 = vmatpush1.bf16.msra.mxu0 %v5460_v18  ;;  %4146 = vmatprep.subr.bf16.mxu1 %v5378_v3  ;;  %v5551_v50 = vpack.c.bf16 %v900_v48, %v899_v47  ;;  %v901_v53 = vld [vmem:[%s9039_s1 + $0x580] sm:$0xff]  ;;  %v902_v54 = vld [vmem:[%s9039_s1 + $0x588] sm:$0xff]  ;;  %v4162_v55 = vpack.c.bf16 %v742_v52, %v741_v51  ;;  %v743_v57 = vld [vmem:[%s9039_s1 + $0x90] sm:$0xff] }
   0xe   :  { %4386 = vmatprep.subr.bf16.mxu0 %v5378_v3  ;;  %v5568_v56 = vpack.c.bf16 %v902_v54, %v901_v53  ;;  %v744_v58 = vld [vmem:[%s9039_s1 + $0x98] sm:$0xff]  ;;  %v903_v59 = vld [vmem:[%s9039_s1 + $0x590] sm:$0xff]  ;;  %v745_v63 = vld [vmem:[%s9039_s1 + $0xa0] sm:$0xff] }
   0xf   :  { %v904_v60 = vld [vmem:[%s9039_s1 + $0x598] sm:$0xff]  ;;  %v4165_v61 = vpack.c.bf16 %v744_v58, %v743_v57  ;;  %v746_v0 = vld [vmem:[%s9039_s1 + $0xa8] sm:$0xff]  ;;  %v905_v1 = vld [vmem:[%s9039_s1 + $0x5a0] sm:$0xff] }
  0x10   :  { %4148 = vmatpush1.bf16.msra.mxu1 %v4147_v23  ;;  %v5585_v62 = vpack.c.bf16 %v904_v60, %v903_v59  ;;  %v906_v2 = vld [vmem:[%s9039_s1 + $0x5a8] sm:$0xff]  ;;  %v4168_v4 = vpack.c.bf16 %v746_v0, %v745_v63  ;;  %v747_v6 = vld [vmem:[%s9039_s1 + $0xb0] sm:$0xff]  ;;  %v748_v7 = vld [vmem:[%s9039_s1 + $0xb8] sm:$0xff] }
  0x11   :  { %4388 = vmatpush1.bf16.msra.mxu0 %v5477_v24  ;;  %4149 = vmatprep.subr.bf16.mxu1 %v5378_v3  ;;  %v5602_v5 = vpack.c.bf16 %v906_v2, %v905_v1  ;;  %v907_v9 = vld [vmem:[%s9039_s1 + $0x5b0] sm:$0xff]  ;;  %v908_v10 = vld [vmem:[%s9039_s1 + $0x5b8] sm:$0xff]  ;;  %v4171_v11 = vpack.c.bf16 %v748_v7, %v747_v6  ;;  %v749_v14 = vld [vmem:[%s9039_s1 + $0xc0] sm:$0xff] }
  0x12   :  { %4389 = vmatprep.subr.bf16.mxu0 %v5378_v3  ;;  %v5619_v13 = vpack.c.bf16 %v908_v10, %v907_v9  ;;  %v750_v15 = vld [vmem:[%s9039_s1 + $0xc8] sm:$0xff]  ;;  %v909_v16 = vld [vmem:[%s9039_s1 + $0x5c0] sm:$0xff]  ;;  %v751_v21 = vld [vmem:[%s9039_s1 + $0xd0] sm:$0xff] }
  0x13   :  { %v910_v17 = vld [vmem:[%s9039_s1 + $0x5c8] sm:$0xff]  ;;  %v4174_v19 = vpack.c.bf16 %v750_v15, %v749_v14  ;;  %v752_v22 = vld [vmem:[%s9039_s1 + $0xd8] sm:$0xff]  ;;  %v911_v23 = vld [vmem:[%s9039_s1 + $0x5d0] sm:$0xff] }
  0x14   :  { %4151 = vmatpush1.bf16.msra.mxu1 %v4150_v29  ;;  %v5636_v20 = vpack.c.bf16 %v910_v17, %v909_v16  ;;  %v912_v25 = vld [vmem:[%s9039_s1 + $0x5d8] sm:$0xff]  ;;  %v4177_v26 = vpack.c.bf16 %v752_v22, %v751_v21  ;;  %v753_v28 = vld [vmem:[%s9039_s1 + $0xe0] sm:$0xff]  ;;  %v754_v29 = vld [vmem:[%s9039_s1 + $0xe8] sm:$0xff] }
  0x15   :  { %4391 = vmatpush1.bf16.msra.mxu0 %v5494_v30  ;;  %4152 = vmatprep.subr.bf16.mxu1 %v5378_v3  ;;  %v5653_v27 = vpack.c.bf16 %v912_v25, %v911_v23  ;;  %v913_v31 = vld [vmem:[%s9039_s1 + $0x5e0] sm:$0xff]  ;;  %v914_v32 = vld [vmem:[%s9039_s1 + $0x5e8] sm:$0xff]  ;;  %v4180_v33 = vpack.c.bf16 %v754_v29, %v753_v28  ;;  %v756_v37 = vld [vmem:[%s9039_s1 + $0xf8] sm:$0xff] }
  0x16   :  { %4392 = vmatprep.subr.bf16.mxu0 %v5378_v3  ;;  %v5670_v34 = vpack.c.bf16 %v914_v32, %v913_v31  ;;  %v915_v38 = vld [vmem:[%s9039_s1 + $0x5f0] sm:$0xff]  ;;  %v916_v39 = vld [vmem:[%s9039_s1 + $0x5f8] sm:$0xff]  ;;  %v917_v42 = vld [vmem:[%s9039_s1 + $0x600] sm:$0xff] }
  0x17   :  { %v5687_v41 = vpack.c.bf16 %v916_v39, %v915_v38  ;;  %v757_v45 = vld [vmem:[%s9039_s1 + $0x100] sm:$0xff]  ;;  %v758_v46 = vld [vmem:[%s9039_s1 + $0x108] sm:$0xff]  ;;  %v31_v48 = vld [vmem:[%s9038_s0 + $0x50] sm:$0xff] }
  0x18   :  { %4154 = vmatpush1.bf16.msra.mxu1 %v4153_v35  ;;  %v755_v35 = vld [vmem:[%s9039_s1 + $0xf0] sm:$0xff]  ;;  %v21_v47 = vld [vmem:[%s9038_s0] sm:$0xff]  ;;  %v44_v51 = vld [vmem:[%s9038_s0 + $0xb8] sm:$0xff] }
  0x19   :  { %4394 = vmatpush1.bf16.msra.mxu0 %v5511_v36  ;;  %4155 = vmatprep.subr.bf16.mxu1 %v5378_v3  ;;  %v4183_v40 = vpack.c.bf16 %v756_v37, %v755_v35  ;;  %v54_v52 = vld [vmem:[%s9038_s0 + $0x108] sm:$0xff]  ;;  %v919_v53 = vld [vmem:[%s9039_s1 + $0x610] sm:$0xff]  ;;  %v920_v54 = vld [vmem:[%s9039_s1 + $0x618] sm:$0xff] }
  0x1a   :  { %4395 = vmatprep.subr.bf16.mxu0 %v5378_v3  ;;  %v759_v57 = vld [vmem:[%s9039_s1 + $0x110] sm:$0xff]  ;;  %v760_v58 = vld [vmem:[%s9039_s1 + $0x118] sm:$0xff]  ;;  %v53_v60 = vld [vmem:[%s9038_s0 + $0x100] sm:$0xff]  ;;  %v4429_v63 = vpack.c.bf16 %v920_v54, %v919_v53 }
  0x1b   :  { %v43_v59 = vld [vmem:[%s9038_s0 + $0xb0] sm:$0xff]  ;;  %v76_v0 = vld [vmem:[%s9038_s0 + $0x1b8] sm:$0xff]  ;;  %v921_v1 = vld [vmem:[%s9039_s1 + $0x620] sm:$0xff] }
  0x1c   :  { %4157 = vmatpush1.bf16.msra.mxu1 %v4156_v43  ;;  %v918_v43 = vld [vmem:[%s9039_s1 + $0x608] sm:$0xff]  ;;  %v761_v6 = vld [vmem:[%s9039_s1 + $0x120] sm:$0xff]  ;;  %v75_v10 = vld [vmem:[%s9038_s0 + $0x1b0] sm:$0xff] }
  0x1d   :  { %4397 = vmatpush1.bf16.msra.mxu0 %v5534_v44  ;;  %4158 = vmatprep.subr.bf16.mxu1 %v5378_v3  ;;  %v922_v2 = vld [vmem:[%s9039_s1 + $0x628] sm:$0xff]  ;;  %v65_v9 = vld [vmem:[%s9038_s0 + $0x160] sm:$0xff]  ;;  %v923_v16 = vld [vmem:[%s9039_s1 + $0x630] sm:$0xff] }
  0x1e   :  { %4398 = vmatprep.subr.bf16.mxu0 %v5378_v3  ;;  %v762_v7 = vld [vmem:[%s9039_s1 + $0x128] sm:$0xff]  ;;  %v4432_v14 = vpack.c.bf16 %v922_v2, %v921_v1  ;;  %v924_v17 = vld [vmem:[%s9039_s1 + $0x638] sm:$0xff]  ;;  %v763_v21 = vld [vmem:[%s9039_s1 + $0x130] sm:$0xff] }
  0x1f   :  { %v98_v15 = vld [vmem:[%s9038_s0 + $0x268] sm:$0xff]  ;;  %v764_v22 = vld [vmem:[%s9039_s1 + $0x138] sm:$0xff]  ;;  %v87_v23 = vld [vmem:[%s9038_s0 + $0x210] sm:$0xff]  ;;  %v4435_v28 = vpack.c.bf16 %v924_v17, %v923_v16 }
  0x20   :  { %4160 = vmatpush1.bf16.msra.mxu1 %v4159_v49  ;;  %v4426_v49 = vpack.c.bf16 %v918_v43, %v917_v42  ;;  %v97_v25 = vld [vmem:[%s9038_s0 + $0x260] sm:$0xff]  ;;  %v120_v29 = vld [vmem:[%s9038_s0 + $0x318] sm:$0xff]  ;;  %v926_v32 = vld [vmem:[%s9039_s1 + $0x648] sm:$0xff] }
  0x21   :  { %4400 = vmatpush1.bf16.msra.mxu0 %v5551_v50  ;;  %4161 = vmatprep.subr.bf16.mxu1 %v5378_v3  ;;  %v925_v31 = vld [vmem:[%s9039_s1 + $0x640] sm:$0xff]  ;;  %v766_v37 = vld [vmem:[%s9039_s1 + $0x148] sm:$0xff]  ;;  %v119_v39 = vld [vmem:[%s9038_s0 + $0x310] sm:$0xff] }
  0x22   :  { %4401 = vmatprep.subr.bf16.mxu0 %v5378_v3  ;;  %v765_v35 = vld [vmem:[%s9039_s1 + $0x140] sm:$0xff]  ;;  %v4438_v42 = vpack.c.bf16 %v926_v32, %v925_v31  ;;  %v142_v43 = vld [vmem:[%s9038_s0 + $0x3c8] sm:$0xff]  ;;  %v176_v1 = vld [vmem:[%s9038_s0 + $0x4d8] sm:$0xff] }
  0x23   :  { %v109_v38 = vld [vmem:[%s9038_s0 + $0x2c0] sm:$0xff]  ;;  %v154_v53 = vld [vmem:[%s9038_s0 + $0x428] sm:$0xff]  ;;  %v220_v31 = vld [vmem:[%s9038_s0 + $0x638] sm:$0xff] }
  0x24   :  { %4163 = vmatpush1.bf16.msra.mxu1 %v4162_v55  ;;  %v4186_v55 = vpack.c.bf16 %v758_v46, %v757_v45  ;;  %v927_v45 = vld [vmem:[%s9039_s1 + $0x650] sm:$0xff]  ;;  %v928_v46 = vld [vmem:[%s9039_s1 + $0x658] sm:$0xff]  ;;  %v198_v16 = vld [vmem:[%s9038_s0 + $0x588] sm:$0xff] }
  0x25   :  { %4403 = vmatpush1.bf16.msra.mxu0 %v5568_v56  ;;  %4164 = vmatprep.subr.bf16.mxu1 %v5378_v3  ;;  %v4441_v54 = vpack.c.bf16 %v928_v46, %v927_v45  ;;  %v242_v45 = vld [vmem:[%s9038_s0 + $0x6e8] sm:$0xff] }
  0x26   :  { %4404 = vmatprep.subr.bf16.mxu0 %v5378_v3 }
  0x28   :  { %4166 = vmatpush1.bf16.msra.mxu1 %v4165_v61  ;;  %v66_v61 = vld [vmem:[%s9038_s0 + $0x168] sm:$0xff] }
  0x29   :  { %4406 = vmatpush1.bf16.msra.mxu0 %v5585_v62  ;;  %4167 = vmatprep.subr.bf16.mxu1 %v5378_v3 }
  0x2a   :  { %4407 = vmatprep.subr.bf16.mxu0 %v5378_v3 }
  0x2c   :  { %4169 = vmatpush1.bf16.msra.mxu1 %v4168_v4  ;;  %v4189_v4 = vpack.c.bf16 %v760_v58, %v759_v57  ;;  %v929_v57 = vld [vmem:[%s9039_s1 + $0x660] sm:$0xff]  ;;  %v930_v58 = vld [vmem:[%s9039_s1 + $0x668] sm:$0xff] }
  0x2d   :  { %4409 = vmatpush1.bf16.msra.mxu0 %v5602_v5  ;;  %4170 = vmatprep.subr.bf16.mxu1 %v5378_v3  ;;  %v4444_v2 = vpack.c.bf16 %v930_v58, %v929_v57  ;;  %v264_v57 = vld [vmem:[%s9038_s0 + $0x798] sm:$0xff]  ;;  %v274_v58 = vld [vmem:[%s9038_s0 + $0x7e8] sm:$0xff] }
  0x2e   :  { %4410 = vmatprep.subr.bf16.mxu0 %v5378_v3 }
  0x30   :  { %4172 = vmatpush1.bf16.msra.mxu1 %v4171_v11  ;;  %v88_v11 = vld [vmem:[%s9038_s0 + $0x218] sm:$0xff] }
  0x31   :  { %4412 = vmatpush1.bf16.msra.mxu0 %v5619_v13  ;;  %4173 = vmatprep.subr.bf16.mxu1 %v5378_v3 }
  0x32   :  { %4413 = vmatprep.subr.bf16.mxu0 %v5378_v3 }
  0x34   :  { %4175 = vmatpush1.bf16.msra.mxu1 %v4174_v19  ;;  %v4192_v19 = vpack.c.bf16 %v762_v7, %v761_v6  ;;  %v931_v6 = vld [vmem:[%s9039_s1 + $0x670] sm:$0xff]  ;;  %v932_v7 = vld [vmem:[%s9039_s1 + $0x678] sm:$0xff] }
  0x35   :  { %4415 = vmatpush1.bf16.msra.mxu0 %v5636_v20  ;;  %4176 = vmatprep.subr.bf16.mxu1 %v5378_v3  ;;  %v4447_v17 = vpack.c.bf16 %v932_v7, %v931_v6 }
  0x36   :  { %4416 = vmatprep.subr.bf16.mxu0 %v5378_v3 }
  0x38   :  { %4178 = vmatpush1.bf16.msra.mxu1 %v4177_v26  ;;  %v110_v26 = vld [vmem:[%s9038_s0 + $0x2c8] sm:$0xff] }
  0x39   :  { %4418 = vmatpush1.bf16.msra.mxu0 %v5653_v27  ;;  %4179 = vmatprep.subr.bf16.mxu1 %v5378_v3 }
  0x3a   :  { %4419 = vmatprep.subr.bf16.mxu0 %v5378_v3 }
  0x3c   :  { %4181 = vmatpush1.bf16.msra.mxu1 %v4180_v33  ;;  %v4195_v33 = vpack.c.bf16 %v764_v22, %v763_v21  ;;  %v933_v21 = vld [vmem:[%s9039_s1 + $0x680] sm:$0xff]  ;;  %v934_v22 = vld [vmem:[%s9039_s1 + $0x688] sm:$0xff] }
  0x3d   :  { %4421 = vmatpush1.bf16.msra.mxu0 %v5670_v34  ;;  %4182 = vmatprep.subr.bf16.mxu1 %v5378_v3  ;;  %v4450_v32 = vpack.c.bf16 %v934_v22, %v933_v21 }
  0x3e   :  { %4422 = vmatprep.subr.bf16.mxu0 %v5378_v3 }
  0x40   :  { %4184 = vmatpush1.bf16.msra.mxu1 %v4183_v40  ;;  %v132_v40 = vld [vmem:[%s9038_s0 + $0x378] sm:$0xff] }
  0x41   :  { %4424 = vmatpush1.bf16.msra.mxu0 %v5687_v41  ;;  %4185 = vmatprep.subr.bf16.mxu1 %v5378_v3 }
  0x42   :  { %4425 = vmatprep.subr.bf16.mxu0 %v5378_v3 }
  0x43   :  { %1236 = vmatmul.mubr.f32.vlgmr.msra.gmra.mrb[0].mxu1 %v21_v47  ;;  %v4198_v47 = vpack.c.bf16 %v766_v37, %v765_v35  ;;  %v935_v35 = vld [vmem:[%s9039_s1 + $0x690] sm:$0xff]  ;;  %v936_v37 = vld [vmem:[%s9039_s1 + $0x698] sm:$0xff] }
  0x44   :  { %2361 = vmatmul.mubr.f32.vlgmr.msra.gmra.mrb[0].mxu0 %v31_v48  ;;  %1240 = vmatprep.mubr.f32.mxu1 %v44_v51  ;;  %v767_v48 = vld [vmem:[%s9039_s1 + $0x150] sm:$0xff]  ;;  %v4453_v46 = vpack.c.bf16 %v936_v37, %v935_v35 }
  0x45   :  { %4427 = vmatpush1.bf16.msra.mxu0 %v4426_v49  ;;  %2365 = vmatprep.mubr.f32.mxu0 %v54_v52  ;;  %v768_v49 = vld [vmem:[%s9039_s1 + $0x158] sm:$0xff]  ;;  %v131_v51 = vld [vmem:[%s9038_s0 + $0x370] sm:$0xff]  ;;  %v141_v52 = vld [vmem:[%s9038_s0 + $0x3c0] sm:$0xff] }
  0x46   :  { %4428 = vmatprep.subr.bf16.mxu0 %v5378_v3  ;;  %4187 = vmatpush1.bf16.msra.mxu1 %v4186_v55  ;;  %v164_v55 = vld [vmem:[%s9038_s0 + $0x478] sm:$0xff] }
  0x47   :  { %1241 = vmatmul.mubr.f32.gmra.mrb[2].mxu1 %v43_v59  ;;  %4188 = vmatprep.subr.bf16.mxu1 %v5378_v3  ;;  %v4201_v59 = vpack.c.bf16 %v768_v49, %v767_v48  ;;  %v937_v48 = vld [vmem:[%s9039_s1 + $0x6a0] sm:$0xff]  ;;  %v938_v49 = vld [vmem:[%s9039_s1 + $0x6a8] sm:$0xff] }
  0x48   :  { %2366 = vmatmul.mubr.f32.gmra.mrb[2].mxu0 %v53_v60  ;;  %1245 = vmatprep.mubr.f32.mxu1 %v66_v61  ;;  %v769_v60 = vld [vmem:[%s9039_s1 + $0x160] sm:$0xff]  ;;  %v770_v61 = vld [vmem:[%s9039_s1 + $0x168] sm:$0xff] }
  0x49   :  { %2370 = vmatprep.mubr.f32.mxu0 %v76_v0  ;;  %4430 = vmatpush1.bf16.msra.mxu0 %v4429_v63  ;;  %v153_v63 = vld [vmem:[%s9038_s0 + $0x420] sm:$0xff]  ;;  %v163_v0 = vld [vmem:[%s9038_s0 + $0x470] sm:$0xff] }
  0x4a   :  { %4431 = vmatprep.subr.bf16.mxu0 %v5378_v3  ;;  %4190 = vmatpush1.bf16.msra.mxu1 %v4189_v4  ;;  %v186_v4 = vld [vmem:[%s9038_s0 + $0x528] sm:$0xff] }
  0x4b   :  { %1246 = vmatmul.mubr.f32.gmra.mrb[4].mxu1 %v65_v9  ;;  %4191 = vmatprep.subr.bf16.mxu1 %v5378_v3  ;;  %v4204_v9 = vpack.c.bf16 %v770_v61, %v769_v60  ;;  %v939_v60 = vld [vmem:[%s9039_s1 + $0x6b0] sm:$0xff]  ;;  %v940_v61 = vld [vmem:[%s9039_s1 + $0x6b8] sm:$0xff] }
  0x4c   :  { %2371 = vmatmul.mubr.f32.gmra.mrb[4].mxu0 %v75_v10  ;;  %1250 = vmatprep.mubr.f32.mxu1 %v88_v11  ;;  %v771_v10 = vld [vmem:[%s9039_s1 + $0x170] sm:$0xff]  ;;  %v772_v11 = vld [vmem:[%s9039_s1 + $0x178] sm:$0xff] }
  0x4d   :  { %2375 = vmatprep.mubr.f32.mxu0 %v98_v15  ;;  %4433 = vmatpush1.bf16.msra.mxu0 %v4432_v14  ;;  %v175_v14 = vld [vmem:[%s9038_s0 + $0x4d0] sm:$0xff]  ;;  %v185_v15 = vld [vmem:[%s9038_s0 + $0x520] sm:$0xff] }
  0x4e   :  { %4434 = vmatprep.subr.bf16.mxu0 %v5378_v3  ;;  %4193 = vmatpush1.bf16.msra.mxu1 %v4192_v19  ;;  %v208_v19 = vld [vmem:[%s9038_s0 + $0x5d8] sm:$0xff] }
  0x4f   :  { %1251 = vmatmul.mubr.f32.gmra.mrb[6].mxu1 %v87_v23  ;;  %4194 = vmatprep.subr.bf16.mxu1 %v5378_v3  ;;  %v4207_v23 = vpack.c.bf16 %v772_v11, %v771_v10 }
  0x50   :  { %2376 = vmatmul.mubr.f32.gmra.mrb[6].mxu0 %v97_v25  ;;  %1255 = vmatprep.mubr.f32.mxu1 %v110_v26  ;;  %v773_v25 = vld [vmem:[%s9039_s1 + $0x180] sm:$0xff]  ;;  %v774_v26 = vld [vmem:[%s9039_s1 + $0x188] sm:$0xff] }
  0x51   :  { %2380 = vmatprep.mubr.f32.mxu0 %v120_v29  ;;  %4436 = vmatpush1.bf16.msra.mxu0 %v4435_v28  ;;  %v197_v28 = vld [vmem:[%s9038_s0 + $0x580] sm:$0xff]  ;;  %v207_v29 = vld [vmem:[%s9038_s0 + $0x5d0] sm:$0xff] }
  0x52   :  { %4437 = vmatprep.subr.bf16.mxu0 %v5378_v3  ;;  %4196 = vmatpush1.bf16.msra.mxu1 %v4195_v33  ;;  %v230_v33 = vld [vmem:[%s9038_s0 + $0x688] sm:$0xff] }
  0x53   :  { %1256 = vmatmul.mubr.f32.gmra.mrb[8].mxu1 %v109_v38  ;;  %4197 = vmatprep.subr.bf16.mxu1 %v5378_v3  ;;  %v4210_v38 = vpack.c.bf16 %v774_v26, %v773_v25 }
  0x54   :  { %2381 = vmatmul.mubr.f32.gmra.mrb[8].mxu0 %v119_v39  ;;  %1260 = vmatprep.mubr.f32.mxu1 %v132_v40  ;;  %v775_v39 = vld [vmem:[%s9039_s1 + $0x190] sm:$0xff]  ;;  %v776_v40 = vld [vmem:[%s9039_s1 + $0x198] sm:$0xff] }
  0x55   :  { %2385 = vmatprep.mubr.f32.mxu0 %v142_v43  ;;  %4439 = vmatpush1.bf16.msra.mxu0 %v4438_v42  ;;  %v219_v42 = vld [vmem:[%s9038_s0 + $0x630] sm:$0xff]  ;;  %v229_v43 = vld [vmem:[%s9038_s0 + $0x680] sm:$0xff] }
  0x56   :  { %4440 = vmatprep.subr.bf16.mxu0 %v5378_v3  ;;  %4199 = vmatpush1.bf16.msra.mxu1 %v4198_v47  ;;  %v252_v47 = vld [vmem:[%s9038_s0 + $0x738] sm:$0xff] }
  0x57   :  { %1261 = vmatmul.mubr.f32.gmra.mrb[10].mxu1 %v131_v51  ;;  %4200 = vmatprep.subr.bf16.mxu1 %v5378_v3  ;;  %v4213_v51 = vpack.c.bf16 %v776_v40, %v775_v39 }
  0x58   :  { %2386 = vmatmul.mubr.f32.gmra.mrb[10].mxu0 %v141_v52  ;;  %1265 = vmatprep.mubr.f32.mxu1 %v154_v53  ;;  %v777_v52 = vld [vmem:[%s9039_s1 + $0x1a0] sm:$0xff]  ;;  %v778_v53 = vld [vmem:[%s9039_s1 + $0x1a8] sm:$0xff] }
  0x59   :  { %2390 = vmatprep.mubr.f32.mxu0 %v164_v55  ;;  %4442 = vmatpush1.bf16.msra.mxu0 %v4441_v54  ;;  %v241_v54 = vld [vmem:[%s9038_s0 + $0x6e0] sm:$0xff]  ;;  %v251_v55 = vld [vmem:[%s9038_s0 + $0x730] sm:$0xff] }
  0x5a   :  { %4443 = vmatprep.subr.bf16.mxu0 %v5378_v3  ;;  %4202 = vmatpush1.bf16.msra.mxu1 %v4201_v59  ;;  %v4456_v59 = vpack.c.bf16 %v938_v49, %v937_v48 }
  0x5b   :  { %1266 = vmatmul.mubr.f32.gmra.mrb[12].mxu1 %v153_v63  ;;  %4203 = vmatprep.subr.bf16.mxu1 %v5378_v3  ;;  %v4216_v63 = vpack.c.bf16 %v778_v53, %v777_v52 }
  0x5c   :  { %2391 = vmatmul.mubr.f32.gmra.mrb[12].mxu0 %v163_v0  ;;  %1270 = vmatprep.mubr.f32.mxu1 %v176_v1 }
  0x5d   :  { %2395 = vmatprep.mubr.f32.mxu0 %v186_v4  ;;  %4445 = vmatpush1.bf16.msra.mxu0 %v4444_v2 }
  0x5e   :  { %4446 = vmatprep.subr.bf16.mxu0 %v5378_v3  ;;  %4205 = vmatpush1.bf16.msra.mxu1 %v4204_v9 }
  0x5f   :  { %1271 = vmatmul.mubr.f32.gmra.mrb[14].mxu1 %v175_v14  ;;  %4206 = vmatprep.subr.bf16.mxu1 %v5378_v3 }
  0x60   :  { %2396 = vmatmul.mubr.f32.gmra.mrb[14].mxu0 %v185_v15  ;;  %1275 = vmatprep.mubr.f32.mxu1 %v198_v16 }
  0x61   :  { %2400 = vmatprep.mubr.f32.mxu0 %v208_v19  ;;  %4448 = vmatpush1.bf16.msra.mxu0 %v4447_v17 }
  0x62   :  { %4449 = vmatprep.subr.bf16.mxu0 %v5378_v3  ;;  %4208 = vmatpush1.bf16.msra.mxu1 %v4207_v23 }
  0x63   :  { %1276 = vmatmul.mubr.f32.gmra.mrb[16].mxu1 %v197_v28  ;;  %4209 = vmatprep.subr.bf16.mxu1 %v5378_v3 }
  0x64   :  { %2401 = vmatmul.mubr.f32.gmra.mrb[16].mxu0 %v207_v29  ;;  %1280 = vmatprep.mubr.f32.mxu1 %v220_v31 }
  0x65   :  { %2405 = vmatprep.mubr.f32.mxu0 %v230_v33  ;;  %4451 = vmatpush1.bf16.msra.mxu0 %v4450_v32 }
  0x66   :  { %4452 = vmatprep.subr.bf16.mxu0 %v5378_v3  ;;  %4211 = vmatpush1.bf16.msra.mxu1 %v4210_v38 }
  0x67   :  { %1281 = vmatmul.mubr.f32.gmra.mrb[18].mxu1 %v219_v42  ;;  %4212 = vmatprep.subr.bf16.mxu1 %v5378_v3 }
  0x68   :  { %2406 = vmatmul.mubr.f32.gmra.mrb[18].mxu0 %v229_v43  ;;  %1285 = vmatprep.mubr.f32.mxu1 %v242_v45 }
  0x69   :  { %2410 = vmatprep.mubr.f32.mxu0 %v252_v47  ;;  %4454 = vmatpush1.bf16.msra.mxu0 %v4453_v46 }
  0x6a   :  { %4455 = vmatprep.subr.bf16.mxu0 %v5378_v3  ;;  %4214 = vmatpush1.bf16.msra.mxu1 %v4213_v51 }
  0x6b   :  { %10 = vsyncpa [#allocation3], 0  ;;  %1286 = vmatmul.mubr.f32.gmra.mrb[20].mxu1 %v241_v54  ;;  %4215 = vmatprep.subr.bf16.mxu1 %v5378_v3  ;;  %v779_v0 = vld [vmem:[%s9039_s1 + $0x1b0] sm:$0xff]  ;;  %v780_v1 = vld [vmem:[%s9039_s1 + $0x1b8] sm:$0xff]  ;;  %v4459_v7 = vpack.c.bf16 %v940_v61, %v939_v60  ;;  %vm1167_vm0 = vcmask 1043456   ;;  %vm5379_vm1 = vmmov 1  }
  0x6c   :  { %2411 = vmatmul.mubr.f32.gmra.mrb[20].mxu0 %v251_v55  ;;  %1290 = vmatprep.mubr.f32.mxu1 %v264_v57  ;;  %v263_v2 = vld [vmem:[%s9038_s0 + $0x790] sm:$0xff]  ;;  %v273_v4 = vld [vmem:[%s9038_s0 + $0x7e0] sm:$0xff]  ;;  %v286_v6 = vld [vmem:[%s9038_s0 + $0x848] sm:$0xff]  ;;  %v4219_v14 = vpack.c.bf16 %v780_v1, %v779_v0  ;;  %vm1070_vm3 = vcmask 97280  }
  0x6d   :  { %2415 = vmatprep.mubr.f32.mxu0 %v274_v58  ;;  %4457 = vmatpush1.bf16.msra.mxu0 %v4456_v59  ;;  %v296_v9 = vld [vmem:[%s9038_s0 + $0x898] sm:$0xff]  ;;  %v941_v10 = vld [vmem:[%s9039_s1 + $0x6c0] sm:$0xff]  ;;  %v942_v11 = vld [vmem:[%s9039_s1 + $0x6c8] sm:$0xff] }
  0x6e   :  { %4458 = vmatprep.subr.bf16.mxu0 %v5378_v3  ;;  %4217 = vmatpush1.bf16.msra.mxu1 %v4216_v63  ;;  %v781_v15 = vld [vmem:[%s9039_s1 + $0x1c0] sm:$0xff]  ;;  %v782_v16 = vld [vmem:[%s9039_s1 + $0x1c8] sm:$0xff]  ;;  %v295_v19 = vld [vmem:[%s9038_s0 + $0x890] sm:$0xff]  ;;  %v4462_v22 = vpack.c.bf16 %v942_v11, %v941_v10 }
  0x6f   :  { %1291 = vmatmul.mubr.f32.gmra.mrb[22].mxu1 %v263_v2  ;;  %4218 = vmatprep.subr.bf16.mxu1 %v5378_v3  ;;  %v285_v17 = vld [vmem:[%s9038_s0 + $0x840] sm:$0xff]  ;;  %v308_v21 = vld [vmem:[%s9038_s0 + $0x8f8] sm:$0xff]  ;;  %v318_v23 = vld [vmem:[%s9038_s0 + $0x948] sm:$0xff]  ;;  %v4222_v28 = vpack.c.bf16 %v782_v16, %v781_v15 }
  0x70   :  { %2416 = vmatmul.mubr.f32.gmra.mrb[22].mxu0 %v273_v4  ;;  %1295 = vmatprep.mubr.f32.mxu1 %v286_v6  ;;  %v943_v25 = vld [vmem:[%s9039_s1 + $0x6d0] sm:$0xff]  ;;  %v944_v26 = vld [vmem:[%s9039_s1 + $0x6d8] sm:$0xff]  ;;  %v317_v33 = vld [vmem:[%s9038_s0 + $0x940] sm:$0xff] }
  0x71   :  { %2420 = vmatprep.mubr.f32.mxu0 %v296_v9  ;;  %4460 = vmatpush1.bf16.msra.mxu0 %v4459_v7  ;;  %v783_v29 = vld [vmem:[%s9039_s1 + $0x1d0] sm:$0xff]  ;;  %v784_v31 = vld [vmem:[%s9039_s1 + $0x1d8] sm:$0xff]  ;;  %v330_v35 = vld [vmem:[%s9038_s0 + $0x9a8] sm:$0xff]  ;;  %v4465_v37 = vpack.c.bf16 %v944_v26, %v943_v25 }
  0x72   :  { %4461 = vmatprep.subr.bf16.mxu0 %v5378_v3  ;;  %4220 = vmatpush1.bf16.msra.mxu1 %v4219_v14  ;;  %v307_v32 = vld [vmem:[%s9038_s0 + $0x8f0] sm:$0xff]  ;;  %v340_v38 = vld [vmem:[%s9038_s0 + $0x9f8] sm:$0xff]  ;;  %v945_v39 = vld [vmem:[%s9039_s1 + $0x6e0] sm:$0xff]  ;;  %v4225_v42 = vpack.c.bf16 %v784_v31, %v783_v29 }
  0x73   :  { %1296 = vmatmul.mubr.f32.gmra.mrb[24].mxu1 %v285_v17  ;;  %4221 = vmatprep.subr.bf16.mxu1 %v5378_v3  ;;  %v946_v40 = vld [vmem:[%s9039_s1 + $0x6e8] sm:$0xff]  ;;  %v785_v43 = vld [vmem:[%s9039_s1 + $0x1e0] sm:$0xff]  ;;  %v339_v47 = vld [vmem:[%s9038_s0 + $0x9f0] sm:$0xff] }
  0x74   :  { %2421 = vmatmul.mubr.f32.gmra.mrb[24].mxu0 %v295_v19  ;;  %1300 = vmatprep.mubr.f32.mxu1 %v308_v21  ;;  %v786_v45 = vld [vmem:[%s9039_s1 + $0x1e8] sm:$0xff]  ;;  %v329_v46 = vld [vmem:[%s9038_s0 + $0x9a0] sm:$0xff]  ;;  %v352_v48 = vld [vmem:[%s9038_s0 + $0xa58] sm:$0xff]  ;;  %v4468_v49 = vpack.c.bf16 %v946_v40, %v945_v39 }
  0x75   :  { %2425 = vmatprep.mubr.f32.mxu0 %v318_v23  ;;  %4463 = vmatpush1.bf16.msra.mxu0 %v4462_v22  ;;  %v362_v51 = vld [vmem:[%s9038_s0 + $0xaa8] sm:$0xff]  ;;  %v947_v52 = vld [vmem:[%s9039_s1 + $0x6f0] sm:$0xff]  ;;  %v948_v53 = vld [vmem:[%s9039_s1 + $0x6f8] sm:$0xff]  ;;  %v4228_v54 = vpack.c.bf16 %v786_v45, %v785_v43 }
  0x76   :  { %4464 = vmatprep.subr.bf16.mxu0 %v5378_v3  ;;  %4223 = vmatpush1.bf16.msra.mxu1 %v4222_v28  ;;  %v787_v55 = vld [vmem:[%s9039_s1 + $0x1f0] sm:$0xff]  ;;  %v788_v57 = vld [vmem:[%s9039_s1 + $0x1f8] sm:$0xff]  ;;  %v361_v59 = vld [vmem:[%s9038_s0 + $0xaa0] sm:$0xff]  ;;  %v4471_v61 = vpack.c.bf16 %v948_v53, %v947_v52 }
  0x77   :  { %1301 = vmatmul.mubr.f32.gmra.mrb[26].mxu1 %v307_v32  ;;  %4224 = vmatprep.subr.bf16.mxu1 %v5378_v3  ;;  %v351_v58 = vld [vmem:[%s9038_s0 + $0xa50] sm:$0xff]  ;;  %v374_v60 = vld [vmem:[%s9038_s0 + $0xb08] sm:$0xff]  ;;  %v384_v63 = vld [vmem:[%s9038_s0 + $0xb58] sm:$0xff]  ;;  %v4231_v0 = vpack.c.bf16 %v788_v57, %v787_v55 }
  0x78   :  { %2426 = vmatmul.mubr.f32.gmra.mrb[26].mxu0 %v317_v33  ;;  %1305 = vmatprep.mubr.f32.mxu1 %v330_v35  ;;  %v373_v1 = vld [vmem:[%s9038_s0 + $0xb00] sm:$0xff]  ;;  %v383_v2 = vld [vmem:[%s9038_s0 + $0xb50] sm:$0xff]  ;;  %v396_v4 = vld [vmem:[%s9038_s0 + $0xbb8] sm:$0xff] }
  0x79   :  { %2430 = vmatprep.mubr.f32.mxu0 %v340_v38  ;;  %4466 = vmatpush1.bf16.msra.mxu0 %v4465_v37  ;;  %v406_v6 = vld [vmem:[%s9038_s0 + $0xc08] sm:$0xff]  ;;  %v395_v7 = vld [vmem:[%s9038_s0 + $0xbb0] sm:$0xff]  ;;  %v405_v9 = vld [vmem:[%s9038_s0 + $0xc00] sm:$0xff] }
  0x7a   :  { %4467 = vmatprep.subr.bf16.mxu0 %v5378_v3  ;;  %4226 = vmatpush1.bf16.msra.mxu1 %v4225_v42  ;;  %v418_v10 = vld [vmem:[%s9038_s0 + $0xc68] sm:$0xff]  ;;  %v428_v11 = vld [vmem:[%s9038_s0 + $0xcb8] sm:$0xff]  ;;  %v417_v14 = vld [vmem:[%s9038_s0 + $0xc60] sm:$0xff] }
  0x7b   :  { %1306 = vmatmul.mubr.f32.gmra.mrb[28].mxu1 %v329_v46  ;;  %4227 = vmatprep.subr.bf16.mxu1 %v5378_v3  ;;  %v427_v15 = vld [vmem:[%s9038_s0 + $0xcb0] sm:$0xff]  ;;  %v440_v16 = vld [vmem:[%s9038_s0 + $0xd18] sm:$0xff]  ;;  %v450_v17 = vld [vmem:[%s9038_s0 + $0xd68] sm:$0xff] }
  0x7c   :  { %2431 = vmatmul.mubr.f32.gmra.mrb[28].mxu0 %v339_v47  ;;  %1310 = vmatprep.mubr.f32.mxu1 %v352_v48  ;;  %v439_v19 = vld [vmem:[%s9038_s0 + $0xd10] sm:$0xff]  ;;  %v449_v21 = vld [vmem:[%s9038_s0 + $0xd60] sm:$0xff]  ;;  %v462_v22 = vld [vmem:[%s9038_s0 + $0xdc8] sm:$0xff] }
  0x7d   :  { %2435 = vmatprep.mubr.f32.mxu0 %v362_v51  ;;  %4469 = vmatpush1.bf16.msra.mxu0 %v4468_v49  ;;  %v472_v23 = vld [vmem:[%s9038_s0 + $0xe18] sm:$0xff]  ;;  %v461_v25 = vld [vmem:[%s9038_s0 + $0xdc0] sm:$0xff]  ;;  %v471_v26 = vld [vmem:[%s9038_s0 + $0xe10] sm:$0xff] }
  0x7e   :  { %4470 = vmatprep.subr.bf16.mxu0 %v5378_v3  ;;  %4229 = vmatpush1.bf16.msra.mxu1 %v4228_v54  ;;  %v484_v28 = vld [vmem:[%s9038_s0 + $0xe78] sm:$0xff]  ;;  %v494_v29 = vld [vmem:[%s9038_s0 + $0xec8] sm:$0xff]  ;;  %v483_v31 = vld [vmem:[%s9038_s0 + $0xe70] sm:$0xff] }
  0x7f   :  { %1311 = vmatmul.mubr.f32.gmra.mrb[30].mxu1 %v351_v58  ;;  %4230 = vmatprep.subr.bf16.mxu1 %v5378_v3  ;;  %v493_v32 = vld [vmem:[%s9038_s0 + $0xec0] sm:$0xff]  ;;  %v506_v33 = vld [vmem:[%s9038_s0 + $0xf28] sm:$0xff]  ;;  %v516_v35 = vld [vmem:[%s9038_s0 + $0xf78] sm:$0xff] }
  0x80   :  { %2436 = vmatmul.mubr.f32.gmra.mrb[30].mxu0 %v361_v59  ;;  %1315 = vmatprep.mubr.f32.mxu1 %v374_v60  ;;  %v505_v37 = vld [vmem:[%s9038_s0 + $0xf20] sm:$0xff]  ;;  %v515_v38 = vld [vmem:[%s9038_s0 + $0xf70] sm:$0xff]  ;;  %v528_v39 = vld [vmem:[%s9038_s0 + $0xfd8] sm:$0xff] }
  0x81   :  { %2440 = vmatprep.mubr.f32.mxu0 %v384_v63  ;;  %4472 = vmatpush1.bf16.msra.mxu0 %v4471_v61  ;;  %v538_v40 = vld [vmem:[%s9038_s0 + $0x1028] sm:$0xff]  ;;  %v527_v42 = vld [vmem:[%s9038_s0 + $0xfd0] sm:$0xff]  ;;  %v537_v43 = vld [vmem:[%s9038_s0 + $0x1020] sm:$0xff] }
  0x82   :  { %4473 = vmatprep.subr.bf16.mxu0 %v5378_v3  ;;  %4232 = vmatpush1.bf16.msra.mxu1 %v4231_v0  ;;  %v550_v45 = vld [vmem:[%s9038_s0 + $0x1088] sm:$0xff]  ;;  %v949_v47 = vld [vmem:[%s9039_s1 + $0x700] sm:$0xff]  ;;  %v572_v53 = vld [vmem:[%s9038_s0 + $0x1138] sm:$0xff] }
  0x83   :  { %1316 = vmatmul.mubr.f32.gmra.mrb[32].mxu1 %v373_v1  ;;  %4233 = vmatprep.subr.bf16.mxu1 %v5378_v3  ;;  %v34_v46 = vld [vmem:[%s9038_s0 + $0x68] sm:$0xff]  ;;  %v549_v49 = vld [vmem:[%s9038_s0 + $0x1080] sm:$0xff]  ;;  %v56_v54 = vld [vmem:[%s9038_s0 + $0x118] sm:$0xff] }
  0x84   :  { %2441 = vmatmul.mubr.f32.gmra.mrb[32].mxu0 %v383_v2  ;;  %1320 = vmatprep.mubr.f32.mxu1 %v396_v4  ;;  %v950_v48 = vld [vmem:[%s9039_s1 + $0x708] sm:$0xff]  ;;  %v33_v51 = vld [vmem:[%s9038_s0 + $0x60] sm:$0xff]  ;;  %v951_v55 = vld [vmem:[%s9039_s1 + $0x710] sm:$0xff] }
  0x85   :  { %2445 = vmatprep.mubr.f32.mxu0 %v406_v6  ;;  %v4474_v52 = vpack.c.bf16 %v950_v48, %v949_v47  ;;  %v952_v57 = vld [vmem:[%s9039_s1 + $0x718] sm:$0xff]  ;;  %v571_v58 = vld [vmem:[%s9038_s0 + $0x1130] sm:$0xff]  ;;  %v594_v60 = vld [vmem:[%s9038_s0 + $0x11e8] sm:$0xff] }
  0x86   :  { %v55_v59 = vld [vmem:[%s9038_s0 + $0x110] sm:$0xff]  ;;  %v4477_v61 = vpack.c.bf16 %v952_v57, %v951_v55  ;;  %v78_v63 = vld [vmem:[%s9038_s0 + $0x1c8] sm:$0xff]  ;;  %v953_v0 = vld [vmem:[%s9039_s1 + $0x720] sm:$0xff] }
  0x87   :  { %1321 = vmatmul.mubr.f32.gmra.mrb[34].mxu1 %v395_v7  ;;  %v954_v1 = vld [vmem:[%s9039_s1 + $0x728] sm:$0xff]  ;;  %v593_v2 = vld [vmem:[%s9038_s0 + $0x11e0] sm:$0xff]  ;;  %v616_v6 = vld [vmem:[%s9038_s0 + $0x1298] sm:$0xff] }
  0x88   :  { %2446 = vmatmul.mubr.f32.gmra.mrb[34].mxu0 %v405_v9  ;;  %1325 = vmatprep.mubr.f32.mxu1 %v418_v10  ;;  %v77_v4 = vld [vmem:[%s9038_s0 + $0x1c0] sm:$0xff]  ;;  %v4480_v7 = vpack.c.bf16 %v954_v1, %v953_v0  ;;  %v100_v9 = vld [vmem:[%s9038_s0 + $0x278] sm:$0xff]  ;;  %v955_v10 = vld [vmem:[%s9039_s1 + $0x730] sm:$0xff] }
  0x89   :  { %2450 = vmatprep.mubr.f32.mxu0 %v428_v11  ;;  %v956_v11 = vld [vmem:[%s9039_s1 + $0x738] sm:$0xff]  ;;  %v210_v57 = vld [vmem:[%s9038_s0 + $0x5e8] sm:$0xff]  ;;  %v209_v0 = vld [vmem:[%s9038_s0 + $0x5e0] sm:$0xff] }
  0x8a   :  { %v188_v48 = vld [vmem:[%s9038_s0 + $0x538] sm:$0xff]  ;;  %v46_v1 = vld [vmem:[%s9038_s0 + $0xc8] sm:$0xff]  ;;  %vm4643_vm2 = vmpackc.low %vm1167_vm0, %vm5379_vm1 }
  0x8b   :  { %1326 = vmatmul.mubr.f32.gmra.mrb[36].mxu1 %v417_v14  ;;  %v615_v14 = vld [vmem:[%s9038_s0 + $0x1290] sm:$0xff] }
  0x8c   :  { %2451 = vmatmul.mubr.f32.gmra.mrb[36].mxu0 %v427_v15  ;;  %1330 = vmatprep.mubr.f32.mxu1 %v440_v16  ;;  %v99_v15 = vld [vmem:[%s9038_s0 + $0x270] sm:$0xff]  ;;  %v638_v16 = vld [vmem:[%s9038_s0 + $0x1348] sm:$0xff] }
  0x8d   :  { %2455 = vmatprep.mubr.f32.mxu0 %v450_v17  ;;  %v4483_v17 = vpack.c.bf16 %v956_v11, %v955_v10  ;;  %v791_v10 = vld [vmem:[%s9039_s1 + $0x210] sm:$0xff]  ;;  %v792_v11 = vld [vmem:[%s9039_s1 + $0x218] sm:$0xff] }
  0x8f   :  { %1331 = vmatmul.mubr.f32.gmra.mrb[38].mxu1 %v439_v19  ;;  %v122_v19 = vld [vmem:[%s9038_s0 + $0x328] sm:$0xff] }
  0x90   :  { %2456 = vmatmul.mubr.f32.gmra.mrb[38].mxu0 %v449_v21  ;;  %1335 = vmatprep.mubr.f32.mxu1 %v462_v22  ;;  %v957_v21 = vld [vmem:[%s9039_s1 + $0x740] sm:$0xff]  ;;  %v958_v22 = vld [vmem:[%s9039_s1 + $0x748] sm:$0xff] }
  0x91   :  { %2460 = vmatprep.mubr.f32.mxu0 %v472_v23  ;;  %v637_v23 = vld [vmem:[%s9038_s0 + $0x1340] sm:$0xff] }
  0x93   :  { %1336 = vmatmul.mubr.f32.gmra.mrb[40].mxu1 %v461_v25  ;;  %v121_v25 = vld [vmem:[%s9038_s0 + $0x320] sm:$0xff] }
  0x94   :  { %2461 = vmatmul.mubr.f32.gmra.mrb[40].mxu0 %v471_v26  ;;  %1340 = vmatprep.mubr.f32.mxu1 %v484_v28  ;;  %v660_v26 = vld [vmem:[%s9038_s0 + $0x13f8] sm:$0xff]  ;;  %v4486_v28 = vpack.c.bf16 %v958_v22, %v957_v21  ;;  %v969_v21 = vld [vmem:[%s9039_s1 + $0x7a0] sm:$0xff]  ;;  %v970_v22 = vld [vmem:[%s9039_s1 + $0x7a8] sm:$0xff] }
  0x95   :  { %2465 = vmatprep.mubr.f32.mxu0 %v494_v29  ;;  %v144_v29 = vld [vmem:[%s9038_s0 + $0x3d8] sm:$0xff] }
  0x97   :  { %1341 = vmatmul.mubr.f32.gmra.mrb[42].mxu1 %v483_v31  ;;  %v959_v31 = vld [vmem:[%s9039_s1 + $0x750] sm:$0xff] }
  0x98   :  { %2466 = vmatmul.mubr.f32.gmra.mrb[42].mxu0 %v493_v32  ;;  %1345 = vmatprep.mubr.f32.mxu1 %v506_v33  ;;  %v960_v32 = vld [vmem:[%s9039_s1 + $0x758] sm:$0xff]  ;;  %v659_v33 = vld [vmem:[%s9038_s0 + $0x13f0] sm:$0xff] }
  0x99   :  { %2470 = vmatprep.mubr.f32.mxu0 %v516_v35  ;;  %v143_v35 = vld [vmem:[%s9038_s0 + $0x3d0] sm:$0xff] }
  0x9b   :  { %1346 = vmatmul.mubr.f32.gmra.mrb[44].mxu1 %v505_v37  ;;  %v682_v37 = vld [vmem:[%s9038_s0 + $0x14a8] sm:$0xff] }
  0x9c   :  { %2471 = vmatmul.mubr.f32.gmra.mrb[44].mxu0 %v515_v38  ;;  %1350 = vmatprep.mubr.f32.mxu1 %v528_v39  ;;  %v4489_v38 = vpack.c.bf16 %v960_v32, %v959_v31  ;;  %v166_v39 = vld [vmem:[%s9038_s0 + $0x488] sm:$0xff]  ;;  %v4504_v32 = vpack.c.bf16 %v970_v22, %v969_v21 }
  0x9d   :  { %2475 = vmatprep.mubr.f32.mxu0 %v538_v40  ;;  %v961_v40 = vld [vmem:[%s9039_s1 + $0x760] sm:$0xff]  ;;  %v90_v31 = vld [vmem:[%s9038_s0 + $0x228] sm:$0xff] }
  0x9e   :  { %v178_v21 = vld [vmem:[%s9038_s0 + $0x4e8] sm:$0xff] }
  0x9f   :  { %1351 = vmatmul.mubr.f32.gmra.mrb[46].mxu1 %v527_v42  ;;  %v962_v42 = vld [vmem:[%s9039_s1 + $0x768] sm:$0xff] }
  0xa0   :  { %2476 = vmatmul.mubr.f32.gmra.mrb[46].mxu0 %v537_v43  ;;  %1355 = vmatprep.mubr.f32.mxu1 %v550_v45  ;;  %v681_v43 = vld [vmem:[%s9038_s0 + $0x14a0] sm:$0xff]  ;;  %v4492_v47 = vpack.c.bf16 %v962_v42, %v961_v40  ;;  %v796_v40 = vld [vmem:[%s9039_s1 + $0x238] sm:$0xff] }
  0xa1   :  { %2585 = vmatprep.mubr.f32.mxu0 %v34_v46  ;;  %v165_v45 = vld [vmem:[%s9038_s0 + $0x480] sm:$0xff]  ;;  %v704_v46 = vld [vmem:[%s9038_s0 + $0x1558] sm:$0xff] }
  0xa2   :  { %v89_v42 = vld [vmem:[%s9038_s0 + $0x220] sm:$0xff] }
  0xa3   :  { %1356 = vmatmul.mubr.f32.gmra.mrb[48].mxu1 %v549_v49  ;;  %v963_v49 = vld [vmem:[%s9039_s1 + $0x770] sm:$0xff] }
  0xa4   :  { %2586 = vmatmul.mubr.f32.vlgmr.msra.gmra.mrb[0].mxu0 %v33_v51  ;;  %1360 = vmatprep.mubr.f32.mxu1 %v572_v53  ;;  %v964_v51 = vld [vmem:[%s9039_s1 + $0x778] sm:$0xff]  ;;  %v187_v53 = vld [vmem:[%s9038_s0 + $0x530] sm:$0xff] }
  0xa5   :  { %4475 = vmatpush1.bf16.msra.mxu0 %v4474_v52  ;;  %2590 = vmatprep.mubr.f32.mxu0 %v56_v54  ;;  %v703_v52 = vld [vmem:[%s9038_s0 + $0x1550] sm:$0xff]  ;;  %v24_v54 = vld [vmem:[%s9038_s0 + $0x18] sm:$0xff]  ;;  %v4495_v55 = vpack.c.bf16 %v964_v51, %v963_v49  ;;  %v974_v49 = vld [vmem:[%s9039_s1 + $0x7c8] sm:$0xff] }
  0xa6   :  { %4476 = vmatprep.subr.bf16.mxu0 %v5378_v3 }
  0xa7   :  { %1361 = vmatmul.mubr.f32.gmra.mrb[50].mxu1 %v571_v58  ;;  %v965_v58 = vld [vmem:[%s9039_s1 + $0x780] sm:$0xff] }
  0xa8   :  { %2591 = vmatmul.mubr.f32.gmra.mrb[2].mxu0 %v55_v59  ;;  %1365 = vmatprep.mubr.f32.mxu1 %v594_v60  ;;  %v966_v59 = vld [vmem:[%s9039_s1 + $0x788] sm:$0xff]  ;;  %v789_v60 = vld [vmem:[%s9039_s1 + $0x200] sm:$0xff] }
  0xa9   :  { %2595 = vmatprep.mubr.f32.mxu0 %v78_v63  ;;  %4478 = vmatpush1.bf16.msra.mxu0 %v4477_v61  ;;  %v790_v61 = vld [vmem:[%s9039_s1 + $0x208] sm:$0xff]  ;;  %v23_v63 = vld [vmem:[%s9038_s0 + $0x10] sm:$0xff] }
  0xaa   :  { %4479 = vmatprep.subr.bf16.mxu0 %v5378_v3 }
  0xab   :  { %1366 = vmatmul.mubr.f32.gmra.mrb[52].mxu1 %v593_v2  ;;  %v4498_v2 = vpack.c.bf16 %v966_v59, %v965_v58  ;;  %v320_v59 = vld [vmem:[%s9038_s0 + $0x958] sm:$0xff] }
  0xac   :  { %2596 = vmatmul.mubr.f32.gmra.mrb[4].mxu0 %v77_v4  ;;  %1370 = vmatprep.mubr.f32.mxu1 %v616_v6  ;;  %v232_v4 = vld [vmem:[%s9038_s0 + $0x698] sm:$0xff]  ;;  %v967_v6 = vld [vmem:[%s9039_s1 + $0x790] sm:$0xff] }
  0xad   :  { %2600 = vmatprep.mubr.f32.mxu0 %v100_v9  ;;  %4481 = vmatpush1.bf16.msra.mxu0 %v4480_v7  ;;  %v968_v7 = vld [vmem:[%s9039_s1 + $0x798] sm:$0xff]  ;;  %v4234_v9 = vpack.c.bf16 %v790_v61, %v789_v60  ;;  %v975_v60 = vld [vmem:[%s9039_s1 + $0x7d0] sm:$0xff] }
  0xae   :  { %4482 = vmatprep.subr.bf16.mxu0 %v5378_v3  ;;  %v976_v61 = vld [vmem:[%s9039_s1 + $0x7d8] sm:$0xff] }
  0xaf   :  { %1371 = vmatmul.mubr.f32.gmra.mrb[54].mxu1 %v615_v14  ;;  %v45_v14 = vld [vmem:[%s9038_s0 + $0xc0] sm:$0xff] }
  0xb0   :  { %2601 = vmatmul.mubr.f32.gmra.mrb[6].mxu0 %v99_v15  ;;  %1375 = vmatprep.mubr.f32.mxu1 %v638_v16  ;;  %v231_v15 = vld [vmem:[%s9038_s0 + $0x690] sm:$0xff]  ;;  %v68_v16 = vld [vmem:[%s9038_s0 + $0x178] sm:$0xff] }
  0xb1   :  { %2605 = vmatprep.mubr.f32.mxu0 %v122_v19  ;;  %4484 = vmatpush1.bf16.msra.mxu0 %v4483_v17  ;;  %v4501_v17 = vpack.c.bf16 %v968_v7, %v967_v6  ;;  %v254_v19 = vld [vmem:[%s9038_s0 + $0x748] sm:$0xff]  ;;  %v156_v6 = vld [vmem:[%s9038_s0 + $0x438] sm:$0xff]  ;;  %v4513_v7 = vpack.c.bf16 %v976_v61, %v975_v60  ;;  %v243_v60 = vld [vmem:[%s9038_s0 + $0x6f0] sm:$0xff] }
  0xb2   :  { %4485 = vmatprep.subr.bf16.mxu0 %v5378_v3  ;;  %v429_v61 = vld [vmem:[%s9038_s0 + $0xcc0] sm:$0xff] }
  0xb3   :  { %1376 = vmatmul.mubr.f32.gmra.mrb[56].mxu1 %v637_v23  ;;  %v4237_v23 = vpack.c.bf16 %v792_v11, %v791_v10  ;;  %v977_v10 = vld [vmem:[%s9039_s1 + $0x7e0] sm:$0xff]  ;;  %v978_v11 = vld [vmem:[%s9039_s1 + $0x7e8] sm:$0xff] }
  0xb4   :  { %2606 = vmatmul.mubr.f32.gmra.mrb[8].mxu0 %v121_v25  ;;  %1380 = vmatprep.mubr.f32.mxu1 %v660_v26  ;;  %v793_v25 = vld [vmem:[%s9039_s1 + $0x220] sm:$0xff]  ;;  %v794_v26 = vld [vmem:[%s9039_s1 + $0x228] sm:$0xff]  ;;  %v4516_v22 = vpack.c.bf16 %v978_v11, %v977_v10 }
  0xb5   :  { %2610 = vmatprep.mubr.f32.mxu0 %v144_v29  ;;  %4487 = vmatpush1.bf16.msra.mxu0 %v4486_v28  ;;  %v67_v28 = vld [vmem:[%s9038_s0 + $0x170] sm:$0xff]  ;;  %v253_v29 = vld [vmem:[%s9038_s0 + $0x740] sm:$0xff]  ;;  %v474_v10 = vld [vmem:[%s9038_s0 + $0xe28] sm:$0xff] }
  0xb6   :  { %4488 = vmatprep.subr.bf16.mxu0 %v5378_v3 }
  0xb7   :  { %1381 = vmatmul.mubr.f32.gmra.mrb[58].mxu1 %v659_v33  ;;  %v276_v33 = vld [vmem:[%s9038_s0 + $0x7f8] sm:$0xff] }
  0xb8   :  { %2611 = vmatmul.mubr.f32.gmra.mrb[10].mxu0 %v143_v35  ;;  %1385 = vmatprep.mubr.f32.mxu1 %v682_v37  ;;  %v971_v35 = vld [vmem:[%s9039_s1 + $0x7b0] sm:$0xff]  ;;  %v972_v37 = vld [vmem:[%s9039_s1 + $0x7b8] sm:$0xff] }
  0xb9   :  { %2615 = vmatprep.mubr.f32.mxu0 %v166_v39  ;;  %4490 = vmatpush1.bf16.msra.mxu0 %v4489_v38  ;;  %v4240_v38 = vpack.c.bf16 %v794_v26, %v793_v25  ;;  %v795_v39 = vld [vmem:[%s9039_s1 + $0x230] sm:$0xff] }
  0xba   :  { %4491 = vmatprep.subr.bf16.mxu0 %v5378_v3  ;;  %v4243_v51 = vpack.c.bf16 %v796_v40, %v795_v39  ;;  %v979_v26 = vld [vmem:[%s9039_s1 + $0x7f0] sm:$0xff]  ;;  %v805_v40 = vld [vmem:[%s9039_s1 + $0x280] sm:$0xff] }
  0xbb   :  { %1386 = vmatmul.mubr.f32.gmra.mrb[60].mxu1 %v681_v43  ;;  %v275_v43 = vld [vmem:[%s9038_s0 + $0x7f0] sm:$0xff] }
  0xbc   :  { %2616 = vmatmul.mubr.f32.gmra.mrb[12].mxu0 %v165_v45  ;;  %1390 = vmatprep.mubr.f32.mxu1 %v704_v46  ;;  %v112_v45 = vld [vmem:[%s9038_s0 + $0x2d8] sm:$0xff]  ;;  %v4507_v46 = vpack.c.bf16 %v972_v37, %v971_v35 }
  0xbd   :  { %2620 = vmatprep.mubr.f32.mxu0 %v188_v48  ;;  %4493 = vmatpush1.bf16.msra.mxu0 %v4492_v47  ;;  %v298_v47 = vld [vmem:[%s9038_s0 + $0x8a8] sm:$0xff]  ;;  %v973_v48 = vld [vmem:[%s9039_s1 + $0x7c0] sm:$0xff]  ;;  %v200_v35 = vld [vmem:[%s9038_s0 + $0x598] sm:$0xff] }
  0xbe   :  { %4494 = vmatprep.subr.bf16.mxu0 %v5378_v3  ;;  %v4510_v58 = vpack.c.bf16 %v974_v49, %v973_v48  ;;  %v807_v49 = vld [vmem:[%s9039_s1 + $0x290] sm:$0xff] }
  0xbf   :  { %1391 = vmatmul.mubr.f32.gmra.mrb[62].mxu1 %v703_v52  ;;  %v797_v52 = vld [vmem:[%s9039_s1 + $0x240] sm:$0xff] }
  0xc0   :  { %2621 = vmatmul.mubr.f32.gmra.mrb[14].mxu0 %v187_v53  ;;  %1460 = vmatprep.mubr.f32.mxu1 %v24_v54  ;;  %v798_v53 = vld [vmem:[%s9039_s1 + $0x248] sm:$0xff]  ;;  %v111_v54 = vld [vmem:[%s9038_s0 + $0x2d0] sm:$0xff] }
  0xc1   :  { %2625 = vmatprep.mubr.f32.mxu0 %v210_v57  ;;  %4496 = vmatpush1.bf16.msra.mxu0 %v4495_v55  ;;  %v297_v55 = vld [vmem:[%s9038_s0 + $0x8a0] sm:$0xff]  ;;  %v134_v57 = vld [vmem:[%s9038_s0 + $0x388] sm:$0xff] }
  0xc2   :  { %4497 = vmatprep.subr.bf16.mxu0 %v5378_v3 }
  0xc3   :  { %1461 = vmatmul.mubr.f32.vlgmr.msra.gmra.mrb[0].mxu1 %v23_v63  ;;  %v4246_v63 = vpack.c.bf16 %v798_v53, %v797_v52  ;;  %v221_v52 = vld [vmem:[%s9038_s0 + $0x640] sm:$0xff]  ;;  %v407_v53 = vld [vmem:[%s9038_s0 + $0xc10] sm:$0xff] }
  0xc4   :  { %2626 = vmatmul.mubr.f32.gmra.mrb[16].mxu0 %v209_v0  ;;  %1465 = vmatprep.mubr.f32.mxu1 %v46_v1  ;;  %v799_v0 = vld [vmem:[%s9039_s1 + $0x250] sm:$0xff]  ;;  %v800_v1 = vld [vmem:[%s9039_s1 + $0x258] sm:$0xff] }
  0xc5   :  { %2630 = vmatprep.mubr.f32.mxu0 %v232_v4  ;;  %4499 = vmatpush1.bf16.msra.mxu0 %v4498_v2  ;;  %v133_v2 = vld [vmem:[%s9038_s0 + $0x380] sm:$0xff]  ;;  %v319_v4 = vld [vmem:[%s9038_s0 + $0x950] sm:$0xff] }
  0xc6   :  { %4500 = vmatprep.subr.bf16.mxu0 %v5378_v3  ;;  %4235 = vmatpush1.bf16.msra.mxu1 %v4234_v9  ;;  %v342_v9 = vld [vmem:[%s9038_s0 + $0xa08] sm:$0xff] }
  0xc7   :  { %1466 = vmatmul.mubr.f32.gmra.mrb[2].mxu1 %v45_v14  ;;  %4236 = vmatprep.subr.bf16.mxu1 %v5378_v3  ;;  %v4249_v14 = vpack.c.bf16 %v800_v1, %v799_v0  ;;  %v452_v0 = vld [vmem:[%s9038_s0 + $0xd78] sm:$0xff] }
  0xc8   :  { %2631 = vmatmul.mubr.f32.gmra.mrb[18].mxu0 %v231_v15  ;;  %1470 = vmatprep.mubr.f32.mxu1 %v68_v16  ;;  %v801_v15 = vld [vmem:[%s9039_s1 + $0x260] sm:$0xff]  ;;  %v802_v16 = vld [vmem:[%s9039_s1 + $0x268] sm:$0xff] }
  0xc9   :  { %2635 = vmatprep.mubr.f32.mxu0 %v254_v19  ;;  %4502 = vmatpush1.bf16.msra.mxu0 %v4501_v17  ;;  %v155_v17 = vld [vmem:[%s9038_s0 + $0x430] sm:$0xff]  ;;  %v341_v19 = vld [vmem:[%s9038_s0 + $0xa00] sm:$0xff]  ;;  %v4252_v25 = vpack.c.bf16 %v802_v16, %v801_v15  ;;  %v814_v15 = vld [vmem:[%s9039_s1 + $0x2c8] sm:$0xff] }
  0xca   :  { %4503 = vmatprep.subr.bf16.mxu0 %v5378_v3  ;;  %4238 = vmatpush1.bf16.msra.mxu1 %v4237_v23  ;;  %v364_v23 = vld [vmem:[%s9038_s0 + $0xab8] sm:$0xff]  ;;  %v287_v16 = vld [vmem:[%s9038_s0 + $0x850] sm:$0xff] }
  0xcb   :  { %1471 = vmatmul.mubr.f32.gmra.mrb[4].mxu1 %v67_v28  ;;  %4239 = vmatprep.subr.bf16.mxu1 %v5378_v3  ;;  %v980_v28 = vld [vmem:[%s9039_s1 + $0x7f8] sm:$0xff] }
  0xcc   :  { %2636 = vmatmul.mubr.f32.gmra.mrb[20].mxu0 %v253_v29  ;;  %1475 = vmatprep.mubr.f32.mxu1 %v90_v31  ;;  %v803_v29 = vld [vmem:[%s9039_s1 + $0x270] sm:$0xff]  ;;  %v804_v31 = vld [vmem:[%s9039_s1 + $0x278] sm:$0xff]  ;;  %v4519_v37 = vpack.c.bf16 %v980_v28, %v979_v26  ;;  %v309_v26 = vld [vmem:[%s9038_s0 + $0x900] sm:$0xff] }
  0xcd   :  { %2640 = vmatprep.mubr.f32.mxu0 %v276_v33  ;;  %4505 = vmatpush1.bf16.msra.mxu0 %v4504_v32  ;;  %v177_v32 = vld [vmem:[%s9038_s0 + $0x4e0] sm:$0xff]  ;;  %v363_v33 = vld [vmem:[%s9038_s0 + $0xab0] sm:$0xff]  ;;  %v4255_v39 = vpack.c.bf16 %v804_v31, %v803_v29  ;;  %v332_v29 = vld [vmem:[%s9038_s0 + $0x9b8] sm:$0xff] }
  0xce   :  { %4506 = vmatprep.subr.bf16.mxu0 %v5378_v3  ;;  %4241 = vmatpush1.bf16.msra.mxu1 %v4240_v38  ;;  %v386_v38 = vld [vmem:[%s9038_s0 + $0xb68] sm:$0xff]  ;;  %v495_v28 = vld [vmem:[%s9038_s0 + $0xed0] sm:$0xff] }
  0xcf   :  { %1476 = vmatmul.mubr.f32.gmra.mrb[6].mxu1 %v89_v42  ;;  %4242 = vmatprep.subr.bf16.mxu1 %v5378_v3  ;;  %v806_v42 = vld [vmem:[%s9039_s1 + $0x288] sm:$0xff] }
  0xd0   :  { %2641 = vmatmul.mubr.f32.gmra.mrb[22].mxu0 %v275_v43  ;;  %1480 = vmatprep.mubr.f32.mxu1 %v112_v45  ;;  %v199_v43 = vld [vmem:[%s9038_s0 + $0x590] sm:$0xff]  ;;  %v385_v45 = vld [vmem:[%s9038_s0 + $0xb60] sm:$0xff]  ;;  %v4258_v48 = vpack.c.bf16 %v806_v42, %v805_v40  ;;  %v518_v31 = vld [vmem:[%s9038_s0 + $0xf88] sm:$0xff] }
  0xd1   :  { %2645 = vmatprep.mubr.f32.mxu0 %v298_v47  ;;  %4508 = vmatpush1.bf16.msra.mxu0 %v4507_v46  ;;  %v222_v46 = vld [vmem:[%s9038_s0 + $0x648] sm:$0xff]  ;;  %v408_v47 = vld [vmem:[%s9038_s0 + $0xc18] sm:$0xff] }
  0xd2   :  { %4509 = vmatprep.subr.bf16.mxu0 %v5378_v3  ;;  %4244 = vmatpush1.bf16.msra.mxu1 %v4243_v51  ;;  %v808_v51 = vld [vmem:[%s9039_s1 + $0x298] sm:$0xff] }
  0xd3   :  { %1481 = vmatmul.mubr.f32.gmra.mrb[8].mxu1 %v111_v54  ;;  %4245 = vmatprep.subr.bf16.mxu1 %v5378_v3  ;;  %v244_v54 = vld [vmem:[%s9038_s0 + $0x6f8] sm:$0xff] }
  0xd4   :  { %2646 = vmatmul.mubr.f32.gmra.mrb[24].mxu0 %v297_v55  ;;  %1485 = vmatprep.mubr.f32.mxu1 %v134_v57  ;;  %v430_v55 = vld [vmem:[%s9038_s0 + $0xcc8] sm:$0xff]  ;;  %v4261_v57 = vpack.c.bf16 %v808_v51, %v807_v49  ;;  %v540_v40 = vld [vmem:[%s9038_s0 + $0x1038] sm:$0xff] }
  0xd5   :  { %2650 = vmatprep.mubr.f32.mxu0 %v320_v59  ;;  %4511 = vmatpush1.bf16.msra.mxu0 %v4510_v58  ;;  %v809_v58 = vld [vmem:[%s9039_s1 + $0x2a0] sm:$0xff]  ;;  %v810_v59 = vld [vmem:[%s9039_s1 + $0x2a8] sm:$0xff] }
  0xd6   :  { %4512 = vmatprep.subr.bf16.mxu0 %v5378_v3  ;;  %4247 = vmatpush1.bf16.msra.mxu1 %v4246_v63  ;;  %v266_v63 = vld [vmem:[%s9038_s0 + $0x7a8] sm:$0xff]  ;;  %v4264_v1 = vpack.c.bf16 %v810_v59, %v809_v58  ;;  %v583_v58 = vld [vmem:[%s9038_s0 + $0x1190] sm:$0xff]  ;;  %v420_v59 = vld [vmem:[%s9038_s0 + $0xc78] sm:$0xff] }
  0xd7   :  { %1486 = vmatmul.mubr.f32.gmra.mrb[10].mxu1 %v133_v2  ;;  %4248 = vmatprep.subr.bf16.mxu1 %v5378_v3  ;;  %v811_v2 = vld [vmem:[%s9039_s1 + $0x2b0] sm:$0xff]  ;;  %v562_v49 = vld [vmem:[%s9038_s0 + $0x10e8] sm:$0xff] }
  0xd8   :  { %2651 = vmatmul.mubr.f32.gmra.mrb[26].mxu0 %v319_v4  ;;  %1490 = vmatprep.mubr.f32.mxu1 %v156_v6  ;;  %v812_v4 = vld [vmem:[%s9039_s1 + $0x2b8] sm:$0xff]  ;;  %v265_v6 = vld [vmem:[%s9038_s0 + $0x7a0] sm:$0xff] }
  0xd9   :  { %2655 = vmatprep.mubr.f32.mxu0 %v342_v9  ;;  %4514 = vmatpush1.bf16.msra.mxu0 %v4513_v7  ;;  %v451_v7 = vld [vmem:[%s9038_s0 + $0xd70] sm:$0xff]  ;;  %v288_v9 = vld [vmem:[%s9038_s0 + $0x858] sm:$0xff]  ;;  %v4267_v11 = vpack.c.bf16 %v812_v4, %v811_v2  ;;  %v441_v2 = vld [vmem:[%s9038_s0 + $0xd20] sm:$0xff] }
  0xda   :  { %4515 = vmatprep.subr.bf16.mxu0 %v5378_v3  ;;  %4250 = vmatpush1.bf16.msra.mxu1 %v4249_v14  ;;  %v813_v14 = vld [vmem:[%s9039_s1 + $0x2c0] sm:$0xff]  ;;  %v627_v4 = vld [vmem:[%s9038_s0 + $0x12f0] sm:$0xff] }
  0xdb   :  { %1491 = vmatmul.mubr.f32.gmra.mrb[12].mxu1 %v155_v17  ;;  %4251 = vmatprep.subr.bf16.mxu1 %v5378_v3  ;;  %v473_v17 = vld [vmem:[%s9038_s0 + $0xe20] sm:$0xff] }
  0xdc   :  { %2656 = vmatmul.mubr.f32.gmra.mrb[28].mxu0 %v341_v19  ;;  %1495 = vmatprep.mubr.f32.mxu1 %v178_v21  ;;  %v310_v19 = vld [vmem:[%s9038_s0 + $0x908] sm:$0xff]  ;;  %v496_v21 = vld [vmem:[%s9038_s0 + $0xed8] sm:$0xff] }
  0xdd   :  { %2660 = vmatprep.mubr.f32.mxu0 %v364_v23  ;;  %4517 = vmatpush1.bf16.msra.mxu0 %v4516_v22  ;;  %v4270_v22 = vpack.c.bf16 %v814_v15, %v813_v14  ;;  %v815_v23 = vld [vmem:[%s9039_s1 + $0x2d0] sm:$0xff]  ;;  %v672_v14 = vld [vmem:[%s9038_s0 + $0x1458] sm:$0xff]  ;;  %v485_v15 = vld [vmem:[%s9038_s0 + $0xe80] sm:$0xff] }
  0xde   :  { %4518 = vmatprep.subr.bf16.mxu0 %v5378_v3  ;;  %4253 = vmatpush1.bf16.msra.mxu1 %v4252_v25  ;;  %v816_v25 = vld [vmem:[%s9039_s1 + $0x2d8] sm:$0xff] }
  0xdf   :  { %1496 = vmatmul.mubr.f32.gmra.mrb[14].mxu1 %v177_v32  ;;  %4254 = vmatprep.subr.bf16.mxu1 %v5378_v3  ;;  %v4273_v32 = vpack.c.bf16 %v816_v25, %v815_v23  ;;  %v530_v23 = vld [vmem:[%s9038_s0 + $0xfe8] sm:$0xff]  ;;  %v716_v25 = vld [vmem:[%s9038_s0 + $0x15b8] sm:$0xff] }
  0xe0   :  { %2661 = vmatmul.mubr.f32.gmra.mrb[30].mxu0 %v363_v33  ;;  %1500 = vmatprep.mubr.f32.mxu1 %v200_v35  ;;  %v817_v33 = vld [vmem:[%s9039_s1 + $0x2e0] sm:$0xff]  ;;  %v818_v35 = vld [vmem:[%s9039_s1 + $0x2e8] sm:$0xff] }
  0xe1   :  { %2665 = vmatprep.mubr.f32.mxu0 %v386_v38  ;;  %4520 = vmatpush1.bf16.msra.mxu0 %v4519_v37  ;;  %v331_v37 = vld [vmem:[%s9038_s0 + $0x9b0] sm:$0xff]  ;;  %v517_v38 = vld [vmem:[%s9038_s0 + $0xf80] sm:$0xff]  ;;  %v4276_v42 = vpack.c.bf16 %v818_v35, %v817_v33  ;;  %v982_v33 = vld [vmem:[%s9039_s1 + $0x808] sm:$0xff] }
  0xe2   :  { %4256 = vmatpush1.bf16.msra.mxu1 %v4255_v39  ;;  %4521 = vmatprep.subr.bf16.mxu0 %v5378_v3  ;;  %v354_v39 = vld [vmem:[%s9038_s0 + $0xa68] sm:$0xff]  ;;  %v551_v35 = vld [vmem:[%s9038_s0 + $0x1090] sm:$0xff] }
  0xe3   :  { %1501 = vmatmul.mubr.f32.gmra.mrb[16].mxu1 %v199_v43  ;;  %4257 = vmatprep.subr.bf16.mxu1 %v5378_v3  ;;  %v819_v43 = vld [vmem:[%s9039_s1 + $0x2f0] sm:$0xff] }
  0xe4   :  { %2666 = vmatmul.mubr.f32.gmra.mrb[32].mxu0 %v385_v45  ;;  %1505 = vmatprep.mubr.f32.mxu1 %v222_v46  ;;  %v820_v45 = vld [vmem:[%s9039_s1 + $0x2f8] sm:$0xff]  ;;  %v353_v46 = vld [vmem:[%s9038_s0 + $0xa60] sm:$0xff] }
  0xe5   :  { %2670 = vmatprep.mubr.f32.mxu0 %v408_v47  ;;  %v539_v47 = vld [vmem:[%s9038_s0 + $0x1030] sm:$0xff]  ;;  %v4279_v51 = vpack.c.bf16 %v820_v45, %v819_v43  ;;  %v984_v43 = vld [vmem:[%s9039_s1 + $0x818] sm:$0xff]  ;;  %v573_v45 = vld [vmem:[%s9038_s0 + $0x1140] sm:$0xff] }
  0xe6   :  { %4259 = vmatpush1.bf16.msra.mxu1 %v4258_v48  ;;  %v376_v48 = vld [vmem:[%s9038_s0 + $0xb18] sm:$0xff] }
  0xe7   :  { %1506 = vmatmul.mubr.f32.gmra.mrb[18].mxu1 %v221_v52  ;;  %4260 = vmatprep.subr.bf16.mxu1 %v5378_v3  ;;  %v375_v52 = vld [vmem:[%s9038_s0 + $0xb10] sm:$0xff] }
  0xe8   :  { %2671 = vmatmul.mubr.f32.gmra.mrb[34].mxu0 %v407_v53  ;;  %1510 = vmatprep.mubr.f32.mxu1 %v244_v54  ;;  %v561_v53 = vld [vmem:[%s9038_s0 + $0x10e0] sm:$0xff]  ;;  %v398_v54 = vld [vmem:[%s9038_s0 + $0xbc8] sm:$0xff] }
  0xe9   :  { %2675 = vmatprep.mubr.f32.mxu0 %v430_v55  ;;  %v584_v55 = vld [vmem:[%s9038_s0 + $0x1198] sm:$0xff] }
  0xea   :  { %4262 = vmatpush1.bf16.msra.mxu1 %v4261_v57  ;;  %v397_v57 = vld [vmem:[%s9038_s0 + $0xbc0] sm:$0xff] }
  0xeb   :  { %1511 = vmatmul.mubr.f32.gmra.mrb[20].mxu1 %v243_v60  ;;  %4263 = vmatprep.subr.bf16.mxu1 %v5378_v3  ;;  %v606_v60 = vld [vmem:[%s9038_s0 + $0x1248] sm:$0xff] }
  0xec   :  { %2676 = vmatmul.mubr.f32.gmra.mrb[36].mxu0 %v429_v61  ;;  %1515 = vmatprep.mubr.f32.mxu1 %v266_v63  ;;  %v419_v61 = vld [vmem:[%s9038_s0 + $0xc70] sm:$0xff]  ;;  %v605_v63 = vld [vmem:[%s9038_s0 + $0x1240] sm:$0xff] }
  0xed   :  { %2680 = vmatprep.mubr.f32.mxu0 %v452_v0  ;;  %v442_v0 = vld [vmem:[%s9038_s0 + $0xd28] sm:$0xff] }
  0xee   :  { %4265 = vmatpush1.bf16.msra.mxu1 %v4264_v1  ;;  %v628_v1 = vld [vmem:[%s9038_s0 + $0x12f8] sm:$0xff] }
  0xef   :  { %1516 = vmatmul.mubr.f32.gmra.mrb[22].mxu1 %v265_v6  ;;  %4266 = vmatprep.subr.bf16.mxu1 %v5378_v3  ;;  %v464_v6 = vld [vmem:[%s9038_s0 + $0xdd8] sm:$0xff] }
  0xf0   :  { %2681 = vmatmul.mubr.f32.gmra.mrb[38].mxu0 %v451_v7  ;;  %1520 = vmatprep.mubr.f32.mxu1 %v288_v9  ;;  %v650_v7 = vld [vmem:[%s9038_s0 + $0x13a8] sm:$0xff]  ;;  %v463_v9 = vld [vmem:[%s9038_s0 + $0xdd0] sm:$0xff] }
  0xf1   :  { %2685 = vmatprep.mubr.f32.mxu0 %v474_v10  ;;  %v649_v10 = vld [vmem:[%s9038_s0 + $0x13a0] sm:$0xff] }
  0xf2   :  { %4268 = vmatpush1.bf16.msra.mxu1 %v4267_v11  ;;  %v486_v11 = vld [vmem:[%s9038_s0 + $0xe88] sm:$0xff] }
  0xf3   :  { %1521 = vmatmul.mubr.f32.gmra.mrb[24].mxu1 %v287_v16  ;;  %4269 = vmatprep.subr.bf16.mxu1 %v5378_v3  ;;  %v671_v16 = vld [vmem:[%s9038_s0 + $0x1450] sm:$0xff] }
  0xf4   :  { %2686 = vmatmul.mubr.f32.gmra.mrb[40].mxu0 %v473_v17  ;;  %1525 = vmatprep.mubr.f32.mxu1 %v310_v19  ;;  %v508_v17 = vld [vmem:[%s9038_s0 + $0xf38] sm:$0xff]  ;;  %v694_v19 = vld [vmem:[%s9038_s0 + $0x1508] sm:$0xff] }
  0xf5   :  { %2690 = vmatprep.mubr.f32.mxu0 %v496_v21  ;;  %v507_v21 = vld [vmem:[%s9038_s0 + $0xf30] sm:$0xff] }
  0xf6   :  { %4271 = vmatpush1.bf16.msra.mxu1 %v4270_v22  ;;  %v693_v22 = vld [vmem:[%s9038_s0 + $0x1500] sm:$0xff] }
  0xf7   :  { %1526 = vmatmul.mubr.f32.gmra.mrb[26].mxu1 %v309_v26  ;;  %4272 = vmatprep.subr.bf16.mxu1 %v5378_v3  ;;  %v529_v26 = vld [vmem:[%s9038_s0 + $0xfe0] sm:$0xff] }
  0xf8   :  { %2691 = vmatmul.mubr.f32.gmra.mrb[42].mxu0 %v495_v28  ;;  %1530 = vmatprep.mubr.f32.mxu1 %v332_v29  ;;  %v715_v28 = vld [vmem:[%s9038_s0 + $0x15b0] sm:$0xff]  ;;  %v552_v29 = vld [vmem:[%s9038_s0 + $0x1098] sm:$0xff] }
  0xf9   :  { %2695 = vmatprep.mubr.f32.mxu0 %v518_v31  ;;  %v36_v31 = vld [vmem:[%s9038_s0 + $0x78] sm:$0xff] }
  0xfa   :  { %4274 = vmatpush1.bf16.msra.mxu1 %v4273_v32  ;;  %v981_v32 = vld [vmem:[%s9039_s1 + $0x800] sm:$0xff] }
  0xfb   :  { %1531 = vmatmul.mubr.f32.gmra.mrb[28].mxu1 %v331_v37  ;;  %4275 = vmatprep.subr.bf16.mxu1 %v5378_v3  ;;  %v35_v37 = vld [vmem:[%s9038_s0 + $0x70] sm:$0xff] }
  0xfc   :  { %2696 = vmatmul.mubr.f32.gmra.mrb[44].mxu0 %v517_v38  ;;  %1535 = vmatprep.mubr.f32.mxu1 %v354_v39  ;;  %v4522_v38 = vpack.c.bf16 %v982_v33, %v981_v32  ;;  %v574_v39 = vld [vmem:[%s9038_s0 + $0x1148] sm:$0xff] }
  0xfd   :  { %2700 = vmatprep.mubr.f32.mxu0 %v540_v40  ;;  %v58_v40 = vld [vmem:[%s9038_s0 + $0x128] sm:$0xff] }
  0xfe   :  { %4277 = vmatpush1.bf16.msra.mxu1 %v4276_v42  ;;  %v983_v42 = vld [vmem:[%s9039_s1 + $0x810] sm:$0xff]  ;;  %v190_v33 = vld [vmem:[%s9038_s0 + $0x548] sm:$0xff] }
  0xff   :  { %1536 = vmatmul.mubr.f32.gmra.mrb[30].mxu1 %v353_v46  ;;  %4278 = vmatprep.subr.bf16.mxu1 %v5378_v3  ;;  %v57_v46 = vld [vmem:[%s9038_s0 + $0x120] sm:$0xff] }
 0x100   :  { %2701 = vmatmul.mubr.f32.gmra.mrb[46].mxu0 %v539_v47  ;;  %1540 = vmatprep.mubr.f32.mxu1 %v376_v48  ;;  %v596_v47 = vld [vmem:[%s9038_s0 + $0x11f8] sm:$0xff]  ;;  %v4525_v48 = vpack.c.bf16 %v984_v43, %v983_v42 }
 0x101   :  { %2705 = vmatprep.mubr.f32.mxu0 %v562_v49  ;;  %v80_v49 = vld [vmem:[%s9038_s0 + $0x1d8] sm:$0xff] }
 0x102   :  { %4280 = vmatpush1.bf16.msra.mxu1 %v4279_v51  ;;  %v985_v51 = vld [vmem:[%s9039_s1 + $0x820] sm:$0xff]  ;;  %v212_v43 = vld [vmem:[%s9038_s0 + $0x5f8] sm:$0xff] }
 0x103   :  { %1541 = vmatmul.mubr.f32.gmra.mrb[32].mxu1 %v375_v52  ;;  %4281 = vmatprep.subr.bf16.mxu1 %v5378_v3  ;;  %v986_v52 = vld [vmem:[%s9039_s1 + $0x828] sm:$0xff] }
 0x104   :  { %2706 = vmatmul.mubr.f32.gmra.mrb[48].mxu0 %v561_v53  ;;  %1545 = vmatprep.mubr.f32.mxu1 %v398_v54  ;;  %v595_v53 = vld [vmem:[%s9038_s0 + $0x11f0] sm:$0xff] }
 0x105   :  { %2710 = vmatprep.mubr.f32.mxu0 %v584_v55  ;;  %v79_v54 = vld [vmem:[%s9038_s0 + $0x1d0] sm:$0xff]  ;;  %v618_v55 = vld [vmem:[%s9038_s0 + $0x12a8] sm:$0xff] }
 0x107   :  { %1546 = vmatmul.mubr.f32.gmra.mrb[34].mxu1 %v397_v57  ;;  %v4528_v57 = vpack.c.bf16 %v986_v52, %v985_v51  ;;  %v211_v51 = vld [vmem:[%s9038_s0 + $0x5f0] sm:$0xff]  ;;  %v48_v52 = vld [vmem:[%s9038_s0 + $0xd8] sm:$0xff] }
 0x108   :  { %2711 = vmatmul.mubr.f32.gmra.mrb[50].mxu0 %v583_v58  ;;  %1550 = vmatprep.mubr.f32.mxu1 %v420_v59  ;;  %v102_v58 = vld [vmem:[%s9038_s0 + $0x288] sm:$0xff]  ;;  %v987_v59 = vld [vmem:[%s9039_s1 + $0x830] sm:$0xff] }
 0x109   :  { %2715 = vmatprep.mubr.f32.mxu0 %v606_v60  ;;  %v988_v60 = vld [vmem:[%s9039_s1 + $0x838] sm:$0xff] }
 0x10b   :  { %1551 = vmatmul.mubr.f32.gmra.mrb[36].mxu1 %v419_v61  ;;  %v617_v61 = vld [vmem:[%s9038_s0 + $0x12a0] sm:$0xff] }
 0x10c   :  { %2716 = vmatmul.mubr.f32.gmra.mrb[52].mxu0 %v605_v63  ;;  %1555 = vmatprep.mubr.f32.mxu1 %v442_v0  ;;  %v101_v63 = vld [vmem:[%s9038_s0 + $0x280] sm:$0xff]  ;;  %v640_v0 = vld [vmem:[%s9038_s0 + $0x1358] sm:$0xff] }
 0x10d   :  { %2720 = vmatprep.mubr.f32.mxu0 %v628_v1  ;;  %v4531_v1 = vpack.c.bf16 %v988_v60, %v987_v59  ;;  %v823_v59 = vld [vmem:[%s9039_s1 + $0x310] sm:$0xff]  ;;  %v824_v60 = vld [vmem:[%s9039_s1 + $0x318] sm:$0xff] }
 0x10f   :  { %1556 = vmatmul.mubr.f32.gmra.mrb[38].mxu1 %v441_v2  ;;  %v124_v2 = vld [vmem:[%s9038_s0 + $0x338] sm:$0xff] }
 0x110   :  { %2721 = vmatmul.mubr.f32.gmra.mrb[54].mxu0 %v627_v4  ;;  %1560 = vmatprep.mubr.f32.mxu1 %v464_v6  ;;  %v989_v4 = vld [vmem:[%s9039_s1 + $0x840] sm:$0xff]  ;;  %v990_v6 = vld [vmem:[%s9039_s1 + $0x848] sm:$0xff] }
 0x111   :  { %2725 = vmatprep.mubr.f32.mxu0 %v650_v7  ;;  %v639_v7 = vld [vmem:[%s9038_s0 + $0x1350] sm:$0xff] }
 0x113   :  { %1561 = vmatmul.mubr.f32.gmra.mrb[40].mxu1 %v463_v9  ;;  %v123_v9 = vld [vmem:[%s9038_s0 + $0x330] sm:$0xff] }
 0x114   :  { %2726 = vmatmul.mubr.f32.gmra.mrb[56].mxu0 %v649_v10  ;;  %1565 = vmatprep.mubr.f32.mxu1 %v486_v11  ;;  %v662_v10 = vld [vmem:[%s9038_s0 + $0x1408] sm:$0xff]  ;;  %v4534_v11 = vpack.c.bf16 %v990_v6, %v989_v4  ;;  %v1001_v4 = vld [vmem:[%s9039_s1 + $0x8a0] sm:$0xff] }
 0x115   :  { %2730 = vmatprep.mubr.f32.mxu0 %v672_v14  ;;  %v146_v14 = vld [vmem:[%s9038_s0 + $0x3e8] sm:$0xff] }
 0x116   :  { %v1002_v6 = vld [vmem:[%s9039_s1 + $0x8a8] sm:$0xff] }
 0x117   :  { %1566 = vmatmul.mubr.f32.gmra.mrb[42].mxu1 %v485_v15  ;;  %v991_v15 = vld [vmem:[%s9039_s1 + $0x850] sm:$0xff] }
 0x118   :  { %2731 = vmatmul.mubr.f32.gmra.mrb[58].mxu0 %v671_v16  ;;  %1570 = vmatprep.mubr.f32.mxu1 %v508_v17  ;;  %v992_v16 = vld [vmem:[%s9039_s1 + $0x858] sm:$0xff]  ;;  %v661_v17 = vld [vmem:[%s9038_s0 + $0x1400] sm:$0xff] }
 0x119   :  { %2735 = vmatprep.mubr.f32.mxu0 %v694_v19  ;;  %v145_v19 = vld [vmem:[%s9038_s0 + $0x3e0] sm:$0xff] }
 0x11b   :  { %1571 = vmatmul.mubr.f32.gmra.mrb[44].mxu1 %v507_v21  ;;  %v684_v21 = vld [vmem:[%s9038_s0 + $0x14b8] sm:$0xff] }
 0x11c   :  { %2736 = vmatmul.mubr.f32.gmra.mrb[60].mxu0 %v693_v22  ;;  %1575 = vmatprep.mubr.f32.mxu1 %v530_v23  ;;  %v4537_v22 = vpack.c.bf16 %v992_v16, %v991_v15  ;;  %v168_v23 = vld [vmem:[%s9038_s0 + $0x498] sm:$0xff]  ;;  %v4552_v16 = vpack.c.bf16 %v1002_v6, %v1001_v4 }
 0x11d   :  { %2740 = vmatprep.mubr.f32.mxu0 %v716_v25  ;;  %v993_v25 = vld [vmem:[%s9039_s1 + $0x860] sm:$0xff]  ;;  %v92_v15 = vld [vmem:[%s9038_s0 + $0x238] sm:$0xff] }
 0x11e   :  { %v180_v4 = vld [vmem:[%s9038_s0 + $0x4f8] sm:$0xff] }
 0x11f   :  { %1576 = vmatmul.mubr.f32.gmra.mrb[46].mxu1 %v529_v26  ;;  %v994_v26 = vld [vmem:[%s9039_s1 + $0x868] sm:$0xff] }
 0x120   :  { %2741 = vmatmul.mubr.f32.gmra.mrb[62].mxu0 %v715_v28  ;;  %1580 = vmatprep.mubr.f32.mxu1 %v552_v29  ;;  %v683_v28 = vld [vmem:[%s9038_s0 + $0x14b0] sm:$0xff]  ;;  %v4540_v32 = vpack.c.bf16 %v994_v26, %v993_v25  ;;  %v828_v25 = vld [vmem:[%s9039_s1 + $0x338] sm:$0xff] }
 0x121   :  { %2810 = vmatprep.mubr.f32.mxu0 %v36_v31  ;;  %v167_v29 = vld [vmem:[%s9038_s0 + $0x490] sm:$0xff]  ;;  %v706_v31 = vld [vmem:[%s9038_s0 + $0x1568] sm:$0xff] }
 0x122   :  { %v91_v26 = vld [vmem:[%s9038_s0 + $0x230] sm:$0xff] }
 0x123   :  { %1581 = vmatmul.mubr.f32.gmra.mrb[48].mxu1 %v551_v35  ;;  %v995_v35 = vld [vmem:[%s9039_s1 + $0x870] sm:$0xff] }
 0x124   :  { %2811 = vmatmul.mubr.f32.vlgmr.msra.gmra.mrb[0].mxu0 %v35_v37  ;;  %1585 = vmatprep.mubr.f32.mxu1 %v574_v39  ;;  %v996_v37 = vld [vmem:[%s9039_s1 + $0x878] sm:$0xff]  ;;  %v189_v39 = vld [vmem:[%s9038_s0 + $0x540] sm:$0xff] }
 0x125   :  { %4523 = vmatpush1.bf16.msra.mxu0 %v4522_v38  ;;  %2815 = vmatprep.mubr.f32.mxu0 %v58_v40  ;;  %v705_v38 = vld [vmem:[%s9038_s0 + $0x1560] sm:$0xff]  ;;  %v26_v40 = vld [vmem:[%s9038_s0 + $0x28] sm:$0xff]  ;;  %v4543_v42 = vpack.c.bf16 %v996_v37, %v995_v35 }
 0x126   :  { %4524 = vmatprep.subr.bf16.mxu0 %v5378_v3  ;;  %v1006_v35 = vld [vmem:[%s9039_s1 + $0x8c8] sm:$0xff] }
 0x127   :  { %1586 = vmatmul.mubr.f32.gmra.mrb[50].mxu1 %v573_v45  ;;  %v997_v45 = vld [vmem:[%s9039_s1 + $0x880] sm:$0xff] }
 0x128   :  { %2816 = vmatmul.mubr.f32.gmra.mrb[2].mxu0 %v57_v46  ;;  %1590 = vmatprep.mubr.f32.mxu1 %v596_v47  ;;  %v998_v46 = vld [vmem:[%s9039_s1 + $0x888] sm:$0xff]  ;;  %v821_v47 = vld [vmem:[%s9039_s1 + $0x300] sm:$0xff] }
 0x129   :  { %2820 = vmatprep.mubr.f32.mxu0 %v80_v49  ;;  %4526 = vmatpush1.bf16.msra.mxu0 %v4525_v48  ;;  %v822_v48 = vld [vmem:[%s9039_s1 + $0x308] sm:$0xff]  ;;  %v25_v49 = vld [vmem:[%s9038_s0 + $0x20] sm:$0xff] }
 0x12a   :  { %4527 = vmatprep.subr.bf16.mxu0 %v5378_v3 }
 0x12b   :  { %1591 = vmatmul.mubr.f32.gmra.mrb[52].mxu1 %v595_v53  ;;  %v4546_v53 = vpack.c.bf16 %v998_v46, %v997_v45  ;;  %v322_v46 = vld [vmem:[%s9038_s0 + $0x968] sm:$0xff] }
 0x12c   :  { %2821 = vmatmul.mubr.f32.gmra.mrb[4].mxu0 %v79_v54  ;;  %1595 = vmatprep.mubr.f32.mxu1 %v618_v55  ;;  %v234_v54 = vld [vmem:[%s9038_s0 + $0x6a8] sm:$0xff]  ;;  %v999_v55 = vld [vmem:[%s9039_s1 + $0x890] sm:$0xff] }
 0x12d   :  { %2825 = vmatprep.mubr.f32.mxu0 %v102_v58  ;;  %4529 = vmatpush1.bf16.msra.mxu0 %v4528_v57  ;;  %v1000_v57 = vld [vmem:[%s9039_s1 + $0x898] sm:$0xff]  ;;  %v4282_v58 = vpack.c.bf16 %v822_v48, %v821_v47  ;;  %v1007_v47 = vld [vmem:[%s9039_s1 + $0x8d0] sm:$0xff] }
 0x12e   :  { %4530 = vmatprep.subr.bf16.mxu0 %v5378_v3  ;;  %v1008_v48 = vld [vmem:[%s9039_s1 + $0x8d8] sm:$0xff] }
 0x12f   :  { %1596 = vmatmul.mubr.f32.gmra.mrb[54].mxu1 %v617_v61  ;;  %v47_v61 = vld [vmem:[%s9038_s0 + $0xd0] sm:$0xff] }
 0x130   :  { %2826 = vmatmul.mubr.f32.gmra.mrb[6].mxu0 %v101_v63  ;;  %1600 = vmatprep.mubr.f32.mxu1 %v640_v0  ;;  %v233_v63 = vld [vmem:[%s9038_s0 + $0x6a0] sm:$0xff]  ;;  %v70_v0 = vld [vmem:[%s9038_s0 + $0x188] sm:$0xff] }
 0x131   :  { %2830 = vmatprep.mubr.f32.mxu0 %v124_v2  ;;  %4532 = vmatpush1.bf16.msra.mxu0 %v4531_v1  ;;  %v4549_v1 = vpack.c.bf16 %v1000_v57, %v999_v55  ;;  %v256_v2 = vld [vmem:[%s9038_s0 + $0x758] sm:$0xff]  ;;  %v158_v55 = vld [vmem:[%s9038_s0 + $0x448] sm:$0xff]  ;;  %v4561_v57 = vpack.c.bf16 %v1008_v48, %v1007_v47  ;;  %v245_v47 = vld [vmem:[%s9038_s0 + $0x700] sm:$0xff] }
 0x132   :  { %4533 = vmatprep.subr.bf16.mxu0 %v5378_v3  ;;  %v431_v48 = vld [vmem:[%s9038_s0 + $0xcd0] sm:$0xff] }
 0x133   :  { %1601 = vmatmul.mubr.f32.gmra.mrb[56].mxu1 %v639_v7  ;;  %v4285_v7 = vpack.c.bf16 %v824_v60, %v823_v59  ;;  %v1009_v59 = vld [vmem:[%s9039_s1 + $0x8e0] sm:$0xff]  ;;  %v1010_v60 = vld [vmem:[%s9039_s1 + $0x8e8] sm:$0xff] }
 0x134   :  { %2831 = vmatmul.mubr.f32.gmra.mrb[8].mxu0 %v123_v9  ;;  %1605 = vmatprep.mubr.f32.mxu1 %v662_v10  ;;  %v825_v9 = vld [vmem:[%s9039_s1 + $0x320] sm:$0xff]  ;;  %v826_v10 = vld [vmem:[%s9039_s1 + $0x328] sm:$0xff]  ;;  %v4564_v6 = vpack.c.bf16 %v1010_v60, %v1009_v59  ;;  %v476_v59 = vld [vmem:[%s9038_s0 + $0xe38] sm:$0xff] }
 0x135   :  { %2835 = vmatprep.mubr.f32.mxu0 %v146_v14  ;;  %4535 = vmatpush1.bf16.msra.mxu0 %v4534_v11  ;;  %v69_v11 = vld [vmem:[%s9038_s0 + $0x180] sm:$0xff]  ;;  %v255_v14 = vld [vmem:[%s9038_s0 + $0x750] sm:$0xff] }
 0x136   :  { %4536 = vmatprep.subr.bf16.mxu0 %v5378_v3 }
 0x137   :  { %1606 = vmatmul.mubr.f32.gmra.mrb[58].mxu1 %v661_v17  ;;  %v278_v17 = vld [vmem:[%s9038_s0 + $0x808] sm:$0xff] }
 0x138   :  { %2836 = vmatmul.mubr.f32.gmra.mrb[10].mxu0 %v145_v19  ;;  %1610 = vmatprep.mubr.f32.mxu1 %v684_v21  ;;  %v1003_v19 = vld [vmem:[%s9039_s1 + $0x8b0] sm:$0xff]  ;;  %v1004_v21 = vld [vmem:[%s9039_s1 + $0x8b8] sm:$0xff] }
 0x139   :  { %2840 = vmatprep.mubr.f32.mxu0 %v168_v23  ;;  %4538 = vmatpush1.bf16.msra.mxu0 %v4537_v22  ;;  %v4288_v22 = vpack.c.bf16 %v826_v10, %v825_v9  ;;  %v827_v23 = vld [vmem:[%s9039_s1 + $0x330] sm:$0xff] }
 0x13a   :  { %4539 = vmatprep.subr.bf16.mxu0 %v5378_v3  ;;  %v4291_v37 = vpack.c.bf16 %v828_v25, %v827_v23  ;;  %v1011_v10 = vld [vmem:[%s9039_s1 + $0x8f0] sm:$0xff]  ;;  %v837_v25 = vld [vmem:[%s9039_s1 + $0x380] sm:$0xff] }
 0x13b   :  { %1611 = vmatmul.mubr.f32.gmra.mrb[60].mxu1 %v683_v28  ;;  %v277_v28 = vld [vmem:[%s9038_s0 + $0x800] sm:$0xff] }
 0x13c   :  { %2841 = vmatmul.mubr.f32.gmra.mrb[12].mxu0 %v167_v29  ;;  %1615 = vmatprep.mubr.f32.mxu1 %v706_v31  ;;  %v114_v29 = vld [vmem:[%s9038_s0 + $0x2e8] sm:$0xff]  ;;  %v4555_v31 = vpack.c.bf16 %v1004_v21, %v1003_v19 }
 0x13d   :  { %2845 = vmatprep.mubr.f32.mxu0 %v190_v33  ;;  %4541 = vmatpush1.bf16.msra.mxu0 %v4540_v32  ;;  %v300_v32 = vld [vmem:[%s9038_s0 + $0x8b8] sm:$0xff]  ;;  %v1005_v33 = vld [vmem:[%s9039_s1 + $0x8c0] sm:$0xff]  ;;  %v202_v19 = vld [vmem:[%s9038_s0 + $0x5a8] sm:$0xff] }
 0x13e   :  { %4542 = vmatprep.subr.bf16.mxu0 %v5378_v3  ;;  %v4558_v45 = vpack.c.bf16 %v1006_v35, %v1005_v33  ;;  %v839_v35 = vld [vmem:[%s9039_s1 + $0x390] sm:$0xff] }
 0x13f   :  { %1616 = vmatmul.mubr.f32.gmra.mrb[62].mxu1 %v705_v38  ;;  %v829_v38 = vld [vmem:[%s9039_s1 + $0x340] sm:$0xff] }
 0x140   :  { %2846 = vmatmul.mubr.f32.gmra.mrb[14].mxu0 %v189_v39  ;;  %1685 = vmatprep.mubr.f32.mxu1 %v26_v40  ;;  %v830_v39 = vld [vmem:[%s9039_s1 + $0x348] sm:$0xff]  ;;  %v113_v40 = vld [vmem:[%s9038_s0 + $0x2e0] sm:$0xff] }
 0x141   :  { %2850 = vmatprep.mubr.f32.mxu0 %v212_v43  ;;  %4544 = vmatpush1.bf16.msra.mxu0 %v4543_v42  ;;  %v299_v42 = vld [vmem:[%s9038_s0 + $0x8b0] sm:$0xff]  ;;  %v136_v43 = vld [vmem:[%s9038_s0 + $0x398] sm:$0xff] }
 0x142   :  { %4545 = vmatprep.subr.bf16.mxu0 %v5378_v3 }
 0x143   :  { %1686 = vmatmul.mubr.f32.vlgmr.msra.gmra.mrb[0].mxu1 %v25_v49  ;;  %v4294_v49 = vpack.c.bf16 %v830_v39, %v829_v38  ;;  %v223_v38 = vld [vmem:[%s9038_s0 + $0x650] sm:$0xff]  ;;  %v409_v39 = vld [vmem:[%s9038_s0 + $0xc20] sm:$0xff] }
 0x144   :  { %2851 = vmatmul.mubr.f32.gmra.mrb[16].mxu0 %v211_v51  ;;  %1690 = vmatprep.mubr.f32.mxu1 %v48_v52  ;;  %v831_v51 = vld [vmem:[%s9039_s1 + $0x350] sm:$0xff]  ;;  %v832_v52 = vld [vmem:[%s9039_s1 + $0x358] sm:$0xff] }
 0x145   :  { %2855 = vmatprep.mubr.f32.mxu0 %v234_v54  ;;  %4547 = vmatpush1.bf16.msra.mxu0 %v4546_v53  ;;  %v135_v53 = vld [vmem:[%s9038_s0 + $0x390] sm:$0xff]  ;;  %v321_v54 = vld [vmem:[%s9038_s0 + $0x960] sm:$0xff] }
 0x146   :  { %4548 = vmatprep.subr.bf16.mxu0 %v5378_v3  ;;  %4283 = vmatpush1.bf16.msra.mxu1 %v4282_v58  ;;  %v344_v58 = vld [vmem:[%s9038_s0 + $0xa18] sm:$0xff] }
 0x147   :  { %1691 = vmatmul.mubr.f32.gmra.mrb[2].mxu1 %v47_v61  ;;  %4284 = vmatprep.subr.bf16.mxu1 %v5378_v3  ;;  %v4297_v61 = vpack.c.bf16 %v832_v52, %v831_v51  ;;  %v454_v51 = vld [vmem:[%s9038_s0 + $0xd88] sm:$0xff] }
 0x148   :  { %2856 = vmatmul.mubr.f32.gmra.mrb[18].mxu0 %v233_v63  ;;  %1695 = vmatprep.mubr.f32.mxu1 %v70_v0  ;;  %v833_v63 = vld [vmem:[%s9039_s1 + $0x360] sm:$0xff]  ;;  %v834_v0 = vld [vmem:[%s9039_s1 + $0x368] sm:$0xff] }
 0x149   :  { %2860 = vmatprep.mubr.f32.mxu0 %v256_v2  ;;  %4550 = vmatpush1.bf16.msra.mxu0 %v4549_v1  ;;  %v157_v1 = vld [vmem:[%s9038_s0 + $0x440] sm:$0xff]  ;;  %v343_v2 = vld [vmem:[%s9038_s0 + $0xa10] sm:$0xff]  ;;  %v4300_v9 = vpack.c.bf16 %v834_v0, %v833_v63  ;;  %v846_v63 = vld [vmem:[%s9039_s1 + $0x3c8] sm:$0xff] }
 0x14a   :  { %4551 = vmatprep.subr.bf16.mxu0 %v5378_v3  ;;  %4286 = vmatpush1.bf16.msra.mxu1 %v4285_v7  ;;  %v366_v7 = vld [vmem:[%s9038_s0 + $0xac8] sm:$0xff]  ;;  %v289_v0 = vld [vmem:[%s9038_s0 + $0x860] sm:$0xff] }
 0x14b   :  { %1696 = vmatmul.mubr.f32.gmra.mrb[4].mxu1 %v69_v11  ;;  %4287 = vmatprep.subr.bf16.mxu1 %v5378_v3  ;;  %v1012_v11 = vld [vmem:[%s9039_s1 + $0x8f8] sm:$0xff] }
 0x14c   :  { %2861 = vmatmul.mubr.f32.gmra.mrb[20].mxu0 %v255_v14  ;;  %1700 = vmatprep.mubr.f32.mxu1 %v92_v15  ;;  %v835_v14 = vld [vmem:[%s9039_s1 + $0x370] sm:$0xff]  ;;  %v836_v15 = vld [vmem:[%s9039_s1 + $0x378] sm:$0xff]  ;;  %v4567_v21 = vpack.c.bf16 %v1012_v11, %v1011_v10  ;;  %v497_v11 = vld [vmem:[%s9038_s0 + $0xee0] sm:$0xff] }
 0x14d   :  { %2865 = vmatprep.mubr.f32.mxu0 %v278_v17  ;;  %4553 = vmatpush1.bf16.msra.mxu0 %v4552_v16  ;;  %v179_v16 = vld [vmem:[%s9038_s0 + $0x4f0] sm:$0xff]  ;;  %v365_v17 = vld [vmem:[%s9038_s0 + $0xac0] sm:$0xff]  ;;  %v4303_v23 = vpack.c.bf16 %v836_v15, %v835_v14  ;;  %v334_v14 = vld [vmem:[%s9038_s0 + $0x9c8] sm:$0xff] }
 0x14e   :  { %4554 = vmatprep.subr.bf16.mxu0 %v5378_v3  ;;  %4289 = vmatpush1.bf16.msra.mxu1 %v4288_v22  ;;  %v388_v22 = vld [vmem:[%s9038_s0 + $0xb78] sm:$0xff]  ;;  %v311_v10 = vld [vmem:[%s9038_s0 + $0x910] sm:$0xff] }
 0x14f   :  { %1701 = vmatmul.mubr.f32.gmra.mrb[6].mxu1 %v91_v26  ;;  %4290 = vmatprep.subr.bf16.mxu1 %v5378_v3  ;;  %v838_v26 = vld [vmem:[%s9039_s1 + $0x388] sm:$0xff]  ;;  %v520_v15 = vld [vmem:[%s9038_s0 + $0xf98] sm:$0xff] }
 0x150   :  { %2866 = vmatmul.mubr.f32.gmra.mrb[22].mxu0 %v277_v28  ;;  %1705 = vmatprep.mubr.f32.mxu1 %v114_v29  ;;  %v201_v28 = vld [vmem:[%s9038_s0 + $0x5a0] sm:$0xff]  ;;  %v387_v29 = vld [vmem:[%s9038_s0 + $0xb70] sm:$0xff]  ;;  %v4306_v33 = vpack.c.bf16 %v838_v26, %v837_v25  ;;  %v542_v25 = vld [vmem:[%s9038_s0 + $0x1048] sm:$0xff] }
 0x151   :  { %2870 = vmatprep.mubr.f32.mxu0 %v300_v32  ;;  %4556 = vmatpush1.bf16.msra.mxu0 %v4555_v31  ;;  %v224_v31 = vld [vmem:[%s9038_s0 + $0x658] sm:$0xff]  ;;  %v410_v32 = vld [vmem:[%s9038_s0 + $0xc28] sm:$0xff] }
 0x152   :  { %4557 = vmatprep.subr.bf16.mxu0 %v5378_v3  ;;  %4292 = vmatpush1.bf16.msra.mxu1 %v4291_v37  ;;  %v840_v37 = vld [vmem:[%s9039_s1 + $0x398] sm:$0xff] }
 0x153   :  { %1706 = vmatmul.mubr.f32.gmra.mrb[8].mxu1 %v113_v40  ;;  %4293 = vmatprep.subr.bf16.mxu1 %v5378_v3  ;;  %v246_v40 = vld [vmem:[%s9038_s0 + $0x708] sm:$0xff] }
 0x154   :  { %2871 = vmatmul.mubr.f32.gmra.mrb[24].mxu0 %v299_v42  ;;  %1710 = vmatprep.mubr.f32.mxu1 %v136_v43  ;;  %v432_v42 = vld [vmem:[%s9038_s0 + $0xcd8] sm:$0xff]  ;;  %v4309_v43 = vpack.c.bf16 %v840_v37, %v839_v35 }
 0x155   :  { %2875 = vmatprep.mubr.f32.mxu0 %v322_v46  ;;  %4559 = vmatpush1.bf16.msra.mxu0 %v4558_v45  ;;  %v841_v45 = vld [vmem:[%s9039_s1 + $0x3a0] sm:$0xff]  ;;  %v842_v46 = vld [vmem:[%s9039_s1 + $0x3a8] sm:$0xff]  ;;  %v564_v35 = vld [vmem:[%s9038_s0 + $0x10f8] sm:$0xff] }
 0x156   :  { %4560 = vmatprep.subr.bf16.mxu0 %v5378_v3  ;;  %4295 = vmatpush1.bf16.msra.mxu1 %v4294_v49  ;;  %v268_v49 = vld [vmem:[%s9038_s0 + $0x7b8] sm:$0xff]  ;;  %v4312_v52 = vpack.c.bf16 %v842_v46, %v841_v45  ;;  %v585_v45 = vld [vmem:[%s9038_s0 + $0x11a0] sm:$0xff]  ;;  %v422_v46 = vld [vmem:[%s9038_s0 + $0xc88] sm:$0xff] }
 0x157   :  { %1711 = vmatmul.mubr.f32.gmra.mrb[10].mxu1 %v135_v53  ;;  %4296 = vmatprep.subr.bf16.mxu1 %v5378_v3  ;;  %v843_v53 = vld [vmem:[%s9039_s1 + $0x3b0] sm:$0xff] }
 0x158   :  { %2876 = vmatmul.mubr.f32.gmra.mrb[26].mxu0 %v321_v54  ;;  %1715 = vmatprep.mubr.f32.mxu1 %v158_v55  ;;  %v844_v54 = vld [vmem:[%s9039_s1 + $0x3b8] sm:$0xff]  ;;  %v267_v55 = vld [vmem:[%s9038_s0 + $0x7b0] sm:$0xff] }
 0x159   :  { %2880 = vmatprep.mubr.f32.mxu0 %v344_v58  ;;  %4562 = vmatpush1.bf16.msra.mxu0 %v4561_v57  ;;  %v453_v57 = vld [vmem:[%s9038_s0 + $0xd80] sm:$0xff]  ;;  %v290_v58 = vld [vmem:[%s9038_s0 + $0x868] sm:$0xff]  ;;  %v4315_v60 = vpack.c.bf16 %v844_v54, %v843_v53  ;;  %v443_v53 = vld [vmem:[%s9038_s0 + $0xd30] sm:$0xff] }
 0x15a   :  { %4563 = vmatprep.subr.bf16.mxu0 %v5378_v3  ;;  %4298 = vmatpush1.bf16.msra.mxu1 %v4297_v61  ;;  %v845_v61 = vld [vmem:[%s9039_s1 + $0x3c0] sm:$0xff] }
 0x15b   :  { %1716 = vmatmul.mubr.f32.gmra.mrb[12].mxu1 %v157_v1  ;;  %4299 = vmatprep.subr.bf16.mxu1 %v5378_v3  ;;  %v475_v1 = vld [vmem:[%s9038_s0 + $0xe30] sm:$0xff]  ;;  %v629_v54 = vld [vmem:[%s9038_s0 + $0x1300] sm:$0xff] }
 0x15c   :  { %2881 = vmatmul.mubr.f32.gmra.mrb[28].mxu0 %v343_v2  ;;  %1720 = vmatprep.mubr.f32.mxu1 %v180_v4  ;;  %v312_v2 = vld [vmem:[%s9038_s0 + $0x918] sm:$0xff]  ;;  %v498_v4 = vld [vmem:[%s9038_s0 + $0xee8] sm:$0xff] }
 0x15d   :  { %2885 = vmatprep.mubr.f32.mxu0 %v366_v7  ;;  %4565 = vmatpush1.bf16.msra.mxu0 %v4564_v6  ;;  %v4318_v6 = vpack.c.bf16 %v846_v63, %v845_v61  ;;  %v847_v7 = vld [vmem:[%s9039_s1 + $0x3d0] sm:$0xff]  ;;  %v674_v61 = vld [vmem:[%s9038_s0 + $0x1468] sm:$0xff] }
 0x15e   :  { %4566 = vmatprep.subr.bf16.mxu0 %v5378_v3  ;;  %4301 = vmatpush1.bf16.msra.mxu1 %v4300_v9  ;;  %v848_v9 = vld [vmem:[%s9039_s1 + $0x3d8] sm:$0xff]  ;;  %v487_v63 = vld [vmem:[%s9038_s0 + $0xe90] sm:$0xff] }
 0x15f   :  { %1721 = vmatmul.mubr.f32.gmra.mrb[14].mxu1 %v179_v16  ;;  %4302 = vmatprep.subr.bf16.mxu1 %v5378_v3  ;;  %v4321_v16 = vpack.c.bf16 %v848_v9, %v847_v7  ;;  %v532_v7 = vld [vmem:[%s9038_s0 + $0xff8] sm:$0xff]  ;;  %v718_v9 = vld [vmem:[%s9038_s0 + $0x15c8] sm:$0xff] }
 0x160   :  { %2886 = vmatmul.mubr.f32.gmra.mrb[30].mxu0 %v365_v17  ;;  %1725 = vmatprep.mubr.f32.mxu1 %v202_v19  ;;  %v849_v17 = vld [vmem:[%s9039_s1 + $0x3e0] sm:$0xff]  ;;  %v850_v19 = vld [vmem:[%s9039_s1 + $0x3e8] sm:$0xff] }
 0x161   :  { %2890 = vmatprep.mubr.f32.mxu0 %v388_v22  ;;  %4568 = vmatpush1.bf16.msra.mxu0 %v4567_v21  ;;  %v333_v21 = vld [vmem:[%s9038_s0 + $0x9c0] sm:$0xff]  ;;  %v519_v22 = vld [vmem:[%s9038_s0 + $0xf90] sm:$0xff]  ;;  %v4324_v26 = vpack.c.bf16 %v850_v19, %v849_v17  ;;  %v1014_v17 = vld [vmem:[%s9039_s1 + $0x908] sm:$0xff] }
 0x162   :  { %4304 = vmatpush1.bf16.msra.mxu1 %v4303_v23  ;;  %4569 = vmatprep.subr.bf16.mxu0 %v5378_v3  ;;  %v356_v23 = vld [vmem:[%s9038_s0 + $0xa78] sm:$0xff]  ;;  %v553_v19 = vld [vmem:[%s9038_s0 + $0x10a0] sm:$0xff] }
 0x163   :  { %1726 = vmatmul.mubr.f32.gmra.mrb[16].mxu1 %v201_v28  ;;  %4305 = vmatprep.subr.bf16.mxu1 %v5378_v3  ;;  %v851_v28 = vld [vmem:[%s9039_s1 + $0x3f0] sm:$0xff] }
 0x164   :  { %2891 = vmatmul.mubr.f32.gmra.mrb[32].mxu0 %v387_v29  ;;  %1730 = vmatprep.mubr.f32.mxu1 %v224_v31  ;;  %v852_v29 = vld [vmem:[%s9039_s1 + $0x3f8] sm:$0xff]  ;;  %v355_v31 = vld [vmem:[%s9038_s0 + $0xa70] sm:$0xff] }
 0x165   :  { %2895 = vmatprep.mubr.f32.mxu0 %v410_v32  ;;  %v541_v32 = vld [vmem:[%s9038_s0 + $0x1040] sm:$0xff]  ;;  %v4327_v37 = vpack.c.bf16 %v852_v29, %v851_v28  ;;  %v1016_v28 = vld [vmem:[%s9039_s1 + $0x918] sm:$0xff]  ;;  %v575_v29 = vld [vmem:[%s9038_s0 + $0x1150] sm:$0xff] }
 0x166   :  { %4307 = vmatpush1.bf16.msra.mxu1 %v4306_v33  ;;  %v378_v33 = vld [vmem:[%s9038_s0 + $0xb28] sm:$0xff] }
 0x167   :  { %1731 = vmatmul.mubr.f32.gmra.mrb[18].mxu1 %v223_v38  ;;  %4308 = vmatprep.subr.bf16.mxu1 %v5378_v3  ;;  %v377_v38 = vld [vmem:[%s9038_s0 + $0xb20] sm:$0xff] }
 0x168   :  { %2896 = vmatmul.mubr.f32.gmra.mrb[34].mxu0 %v409_v39  ;;  %1735 = vmatprep.mubr.f32.mxu1 %v246_v40  ;;  %v563_v39 = vld [vmem:[%s9038_s0 + $0x10f0] sm:$0xff]  ;;  %v400_v40 = vld [vmem:[%s9038_s0 + $0xbd8] sm:$0xff] }
 0x169   :  { %2900 = vmatprep.mubr.f32.mxu0 %v432_v42  ;;  %v586_v42 = vld [vmem:[%s9038_s0 + $0x11a8] sm:$0xff] }
 0x16a   :  { %4310 = vmatpush1.bf16.msra.mxu1 %v4309_v43  ;;  %v399_v43 = vld [vmem:[%s9038_s0 + $0xbd0] sm:$0xff] }
 0x16b   :  { %1736 = vmatmul.mubr.f32.gmra.mrb[20].mxu1 %v245_v47  ;;  %4311 = vmatprep.subr.bf16.mxu1 %v5378_v3  ;;  %v608_v47 = vld [vmem:[%s9038_s0 + $0x1258] sm:$0xff] }
 0x16c   :  { %2901 = vmatmul.mubr.f32.gmra.mrb[36].mxu0 %v431_v48  ;;  %1740 = vmatprep.mubr.f32.mxu1 %v268_v49  ;;  %v421_v48 = vld [vmem:[%s9038_s0 + $0xc80] sm:$0xff]  ;;  %v607_v49 = vld [vmem:[%s9038_s0 + $0x1250] sm:$0xff] }
 0x16d   :  { %2905 = vmatprep.mubr.f32.mxu0 %v454_v51  ;;  %v444_v51 = vld [vmem:[%s9038_s0 + $0xd38] sm:$0xff] }
 0x16e   :  { %4313 = vmatpush1.bf16.msra.mxu1 %v4312_v52  ;;  %v630_v52 = vld [vmem:[%s9038_s0 + $0x1308] sm:$0xff] }
 0x16f   :  { %1741 = vmatmul.mubr.f32.gmra.mrb[22].mxu1 %v267_v55  ;;  %4314 = vmatprep.subr.bf16.mxu1 %v5378_v3  ;;  %v466_v55 = vld [vmem:[%s9038_s0 + $0xde8] sm:$0xff] }
 0x170   :  { %2906 = vmatmul.mubr.f32.gmra.mrb[38].mxu0 %v453_v57  ;;  %1745 = vmatprep.mubr.f32.mxu1 %v290_v58  ;;  %v652_v57 = vld [vmem:[%s9038_s0 + $0x13b8] sm:$0xff]  ;;  %v465_v58 = vld [vmem:[%s9038_s0 + $0xde0] sm:$0xff] }
 0x171   :  { %2910 = vmatprep.mubr.f32.mxu0 %v476_v59  ;;  %v651_v59 = vld [vmem:[%s9038_s0 + $0x13b0] sm:$0xff] }
 0x172   :  { %4316 = vmatpush1.bf16.msra.mxu1 %v4315_v60  ;;  %v488_v60 = vld [vmem:[%s9038_s0 + $0xe98] sm:$0xff] }
 0x173   :  { %1746 = vmatmul.mubr.f32.gmra.mrb[24].mxu1 %v289_v0  ;;  %4317 = vmatprep.subr.bf16.mxu1 %v5378_v3  ;;  %v673_v0 = vld [vmem:[%s9038_s0 + $0x1460] sm:$0xff] }
 0x174   :  { %2911 = vmatmul.mubr.f32.gmra.mrb[40].mxu0 %v475_v1  ;;  %1750 = vmatprep.mubr.f32.mxu1 %v312_v2  ;;  %v510_v1 = vld [vmem:[%s9038_s0 + $0xf48] sm:$0xff]  ;;  %v696_v2 = vld [vmem:[%s9038_s0 + $0x1518] sm:$0xff] }
 0x175   :  { %2915 = vmatprep.mubr.f32.mxu0 %v498_v4  ;;  %v509_v4 = vld [vmem:[%s9038_s0 + $0xf40] sm:$0xff] }
 0x176   :  { %4319 = vmatpush1.bf16.msra.mxu1 %v4318_v6  ;;  %v695_v6 = vld [vmem:[%s9038_s0 + $0x1510] sm:$0xff] }
 0x177   :  { %1751 = vmatmul.mubr.f32.gmra.mrb[26].mxu1 %v311_v10  ;;  %4320 = vmatprep.subr.bf16.mxu1 %v5378_v3  ;;  %v531_v10 = vld [vmem:[%s9038_s0 + $0xff0] sm:$0xff] }
 0x178   :  { %2916 = vmatmul.mubr.f32.gmra.mrb[42].mxu0 %v497_v11  ;;  %1755 = vmatprep.mubr.f32.mxu1 %v334_v14  ;;  %v717_v11 = vld [vmem:[%s9038_s0 + $0x15c0] sm:$0xff]  ;;  %v554_v14 = vld [vmem:[%s9038_s0 + $0x10a8] sm:$0xff] }
 0x179   :  { %2920 = vmatprep.mubr.f32.mxu0 %v520_v15  ;;  %v38_v15 = vld [vmem:[%s9038_s0 + $0x88] sm:$0xff] }
 0x17a   :  { %4322 = vmatpush1.bf16.msra.mxu1 %v4321_v16  ;;  %v1013_v16 = vld [vmem:[%s9039_s1 + $0x900] sm:$0xff] }
 0x17b   :  { %1756 = vmatmul.mubr.f32.gmra.mrb[28].mxu1 %v333_v21  ;;  %4323 = vmatprep.subr.bf16.mxu1 %v5378_v3  ;;  %v37_v21 = vld [vmem:[%s9038_s0 + $0x80] sm:$0xff] }
 0x17c   :  { %2921 = vmatmul.mubr.f32.gmra.mrb[44].mxu0 %v519_v22  ;;  %1760 = vmatprep.mubr.f32.mxu1 %v356_v23  ;;  %v4570_v22 = vpack.c.bf16 %v1014_v17, %v1013_v16  ;;  %v576_v23 = vld [vmem:[%s9038_s0 + $0x1158] sm:$0xff] }
 0x17d   :  { %2925 = vmatprep.mubr.f32.mxu0 %v542_v25  ;;  %v60_v25 = vld [vmem:[%s9038_s0 + $0x138] sm:$0xff] }
 0x17e   :  { %4325 = vmatpush1.bf16.msra.mxu1 %v4324_v26  ;;  %v1015_v26 = vld [vmem:[%s9039_s1 + $0x910] sm:$0xff]  ;;  %v192_v17 = vld [vmem:[%s9038_s0 + $0x558] sm:$0xff] }
 0x17f   :  { %1761 = vmatmul.mubr.f32.gmra.mrb[30].mxu1 %v355_v31  ;;  %4326 = vmatprep.subr.bf16.mxu1 %v5378_v3  ;;  %v59_v31 = vld [vmem:[%s9038_s0 + $0x130] sm:$0xff] }
 0x180   :  { %2926 = vmatmul.mubr.f32.gmra.mrb[46].mxu0 %v541_v32  ;;  %1765 = vmatprep.mubr.f32.mxu1 %v378_v33  ;;  %v598_v32 = vld [vmem:[%s9038_s0 + $0x1208] sm:$0xff]  ;;  %v4573_v33 = vpack.c.bf16 %v1016_v28, %v1015_v26 }
 0x181   :  { %2930 = vmatprep.mubr.f32.mxu0 %v564_v35  ;;  %v82_v35 = vld [vmem:[%s9038_s0 + $0x1e8] sm:$0xff] }
 0x182   :  { %4328 = vmatpush1.bf16.msra.mxu1 %v4327_v37  ;;  %v1017_v37 = vld [vmem:[%s9039_s1 + $0x920] sm:$0xff]  ;;  %v214_v28 = vld [vmem:[%s9038_s0 + $0x608] sm:$0xff] }
 0x183   :  { %1766 = vmatmul.mubr.f32.gmra.mrb[32].mxu1 %v377_v38  ;;  %4329 = vmatprep.subr.bf16.mxu1 %v5378_v3  ;;  %v1018_v38 = vld [vmem:[%s9039_s1 + $0x928] sm:$0xff] }
 0x184   :  { %2931 = vmatmul.mubr.f32.gmra.mrb[48].mxu0 %v563_v39  ;;  %1770 = vmatprep.mubr.f32.mxu1 %v400_v40  ;;  %v597_v39 = vld [vmem:[%s9038_s0 + $0x1200] sm:$0xff] }
 0x185   :  { %2935 = vmatprep.mubr.f32.mxu0 %v586_v42  ;;  %v81_v40 = vld [vmem:[%s9038_s0 + $0x1e0] sm:$0xff]  ;;  %v620_v42 = vld [vmem:[%s9038_s0 + $0x12b8] sm:$0xff] }
 0x187   :  { %1771 = vmatmul.mubr.f32.gmra.mrb[34].mxu1 %v399_v43  ;;  %v4576_v43 = vpack.c.bf16 %v1018_v38, %v1017_v37  ;;  %v213_v37 = vld [vmem:[%s9038_s0 + $0x600] sm:$0xff]  ;;  %v50_v38 = vld [vmem:[%s9038_s0 + $0xe8] sm:$0xff] }
 0x188   :  { %2936 = vmatmul.mubr.f32.gmra.mrb[50].mxu0 %v585_v45  ;;  %1775 = vmatprep.mubr.f32.mxu1 %v422_v46  ;;  %v104_v45 = vld [vmem:[%s9038_s0 + $0x298] sm:$0xff]  ;;  %v1019_v46 = vld [vmem:[%s9039_s1 + $0x930] sm:$0xff] }
 0x189   :  { %2940 = vmatprep.mubr.f32.mxu0 %v608_v47  ;;  %v1020_v47 = vld [vmem:[%s9039_s1 + $0x938] sm:$0xff] }
 0x18b   :  { %1776 = vmatmul.mubr.f32.gmra.mrb[36].mxu1 %v421_v48  ;;  %v619_v48 = vld [vmem:[%s9038_s0 + $0x12b0] sm:$0xff] }
 0x18c   :  { %2941 = vmatmul.mubr.f32.gmra.mrb[52].mxu0 %v607_v49  ;;  %1780 = vmatprep.mubr.f32.mxu1 %v444_v51  ;;  %v103_v49 = vld [vmem:[%s9038_s0 + $0x290] sm:$0xff]  ;;  %v642_v51 = vld [vmem:[%s9038_s0 + $0x1368] sm:$0xff] }
 0x18d   :  { %2945 = vmatprep.mubr.f32.mxu0 %v630_v52  ;;  %v4579_v52 = vpack.c.bf16 %v1020_v47, %v1019_v46  ;;  %v855_v46 = vld [vmem:[%s9039_s1 + $0x410] sm:$0xff]  ;;  %v856_v47 = vld [vmem:[%s9039_s1 + $0x418] sm:$0xff] }
 0x18f   :  { %1781 = vmatmul.mubr.f32.gmra.mrb[38].mxu1 %v443_v53  ;;  %v126_v53 = vld [vmem:[%s9038_s0 + $0x348] sm:$0xff] }
 0x190   :  { %2946 = vmatmul.mubr.f32.gmra.mrb[54].mxu0 %v629_v54  ;;  %1785 = vmatprep.mubr.f32.mxu1 %v466_v55  ;;  %v1021_v54 = vld [vmem:[%s9039_s1 + $0x940] sm:$0xff]  ;;  %v1022_v55 = vld [vmem:[%s9039_s1 + $0x948] sm:$0xff] }
 0x191   :  { %2950 = vmatprep.mubr.f32.mxu0 %v652_v57  ;;  %v641_v57 = vld [vmem:[%s9038_s0 + $0x1360] sm:$0xff] }
 0x193   :  { %1786 = vmatmul.mubr.f32.gmra.mrb[40].mxu1 %v465_v58  ;;  %v125_v58 = vld [vmem:[%s9038_s0 + $0x340] sm:$0xff] }
 0x194   :  { %2951 = vmatmul.mubr.f32.gmra.mrb[56].mxu0 %v651_v59  ;;  %1790 = vmatprep.mubr.f32.mxu1 %v488_v60  ;;  %v664_v59 = vld [vmem:[%s9038_s0 + $0x1418] sm:$0xff]  ;;  %v4582_v60 = vpack.c.bf16 %v1022_v55, %v1021_v54  ;;  %v1033_v54 = vld [vmem:[%s9039_s1 + $0x9a0] sm:$0xff]  ;;  %v1034_v55 = vld [vmem:[%s9039_s1 + $0x9a8] sm:$0xff] }
 0x195   :  { %2955 = vmatprep.mubr.f32.mxu0 %v674_v61  ;;  %v148_v61 = vld [vmem:[%s9038_s0 + $0x3f8] sm:$0xff] }
 0x197   :  { %1791 = vmatmul.mubr.f32.gmra.mrb[42].mxu1 %v487_v63  ;;  %v1023_v63 = vld [vmem:[%s9039_s1 + $0x950] sm:$0xff] }
 0x198   :  { %2956 = vmatmul.mubr.f32.gmra.mrb[58].mxu0 %v673_v0  ;;  %1795 = vmatprep.mubr.f32.mxu1 %v510_v1  ;;  %v1024_v0 = vld [vmem:[%s9039_s1 + $0x958] sm:$0xff]  ;;  %v663_v1 = vld [vmem:[%s9038_s0 + $0x1410] sm:$0xff] }
 0x199   :  { %2960 = vmatprep.mubr.f32.mxu0 %v696_v2  ;;  %v147_v2 = vld [vmem:[%s9038_s0 + $0x3f0] sm:$0xff] }
 0x19b   :  { %1796 = vmatmul.mubr.f32.gmra.mrb[44].mxu1 %v509_v4  ;;  %v686_v4 = vld [vmem:[%s9038_s0 + $0x14c8] sm:$0xff] }
 0x19c   :  { %2961 = vmatmul.mubr.f32.gmra.mrb[60].mxu0 %v695_v6  ;;  %1800 = vmatprep.mubr.f32.mxu1 %v532_v7  ;;  %v4585_v6 = vpack.c.bf16 %v1024_v0, %v1023_v63  ;;  %v170_v7 = vld [vmem:[%s9038_s0 + $0x4a8] sm:$0xff]  ;;  %v4600_v0 = vpack.c.bf16 %v1034_v55, %v1033_v54 }
 0x19d   :  { %2965 = vmatprep.mubr.f32.mxu0 %v718_v9  ;;  %v1025_v9 = vld [vmem:[%s9039_s1 + $0x960] sm:$0xff]  ;;  %v94_v63 = vld [vmem:[%s9038_s0 + $0x248] sm:$0xff] }
 0x19e   :  { %v182_v54 = vld [vmem:[%s9038_s0 + $0x508] sm:$0xff] }
 0x19f   :  { %1801 = vmatmul.mubr.f32.gmra.mrb[46].mxu1 %v531_v10  ;;  %v1026_v10 = vld [vmem:[%s9039_s1 + $0x968] sm:$0xff] }
 0x1a0   :  { %2966 = vmatmul.mubr.f32.gmra.mrb[62].mxu0 %v717_v11  ;;  %1805 = vmatprep.mubr.f32.mxu1 %v554_v14  ;;  %v685_v11 = vld [vmem:[%s9038_s0 + $0x14c0] sm:$0xff]  ;;  %v4588_v16 = vpack.c.bf16 %v1026_v10, %v1025_v9  ;;  %v860_v9 = vld [vmem:[%s9039_s1 + $0x438] sm:$0xff] }
 0x1a1   :  { %3035 = vmatprep.mubr.f32.mxu0 %v38_v15  ;;  %v169_v14 = vld [vmem:[%s9038_s0 + $0x4a0] sm:$0xff]  ;;  %v708_v15 = vld [vmem:[%s9038_s0 + $0x1578] sm:$0xff] }
 0x1a2   :  { %v93_v10 = vld [vmem:[%s9038_s0 + $0x240] sm:$0xff] }
 0x1a3   :  { %1806 = vmatmul.mubr.f32.gmra.mrb[48].mxu1 %v553_v19  ;;  %v1027_v19 = vld [vmem:[%s9039_s1 + $0x970] sm:$0xff] }
 0x1a4   :  { %3036 = vmatmul.mubr.f32.vlgmr.msra.gmra.mrb[0].mxu0 %v37_v21  ;;  %1810 = vmatprep.mubr.f32.mxu1 %v576_v23  ;;  %v1028_v21 = vld [vmem:[%s9039_s1 + $0x978] sm:$0xff]  ;;  %v191_v23 = vld [vmem:[%s9038_s0 + $0x550] sm:$0xff] }
 0x1a5   :  { %4571 = vmatpush1.bf16.msra.mxu0 %v4570_v22  ;;  %3040 = vmatprep.mubr.f32.mxu0 %v60_v25  ;;  %v707_v22 = vld [vmem:[%s9038_s0 + $0x1570] sm:$0xff]  ;;  %v28_v25 = vld [vmem:[%s9038_s0 + $0x38] sm:$0xff]  ;;  %v4591_v26 = vpack.c.bf16 %v1028_v21, %v1027_v19  ;;  %v1038_v19 = vld [vmem:[%s9039_s1 + $0x9c8] sm:$0xff] }
 0x1a6   :  { %4572 = vmatprep.subr.bf16.mxu0 %v5378_v3 }
 0x1a7   :  { %1811 = vmatmul.mubr.f32.gmra.mrb[50].mxu1 %v575_v29  ;;  %v1029_v29 = vld [vmem:[%s9039_s1 + $0x980] sm:$0xff] }
 0x1a8   :  { %3041 = vmatmul.mubr.f32.gmra.mrb[2].mxu0 %v59_v31  ;;  %1815 = vmatprep.mubr.f32.mxu1 %v598_v32  ;;  %v1030_v31 = vld [vmem:[%s9039_s1 + $0x988] sm:$0xff]  ;;  %v853_v32 = vld [vmem:[%s9039_s1 + $0x400] sm:$0xff] }
 0x1a9   :  { %3045 = vmatprep.mubr.f32.mxu0 %v82_v35  ;;  %4574 = vmatpush1.bf16.msra.mxu0 %v4573_v33  ;;  %v854_v33 = vld [vmem:[%s9039_s1 + $0x408] sm:$0xff]  ;;  %v27_v35 = vld [vmem:[%s9038_s0 + $0x30] sm:$0xff] }
 0x1aa   :  { %4575 = vmatprep.subr.bf16.mxu0 %v5378_v3 }
 0x1ab   :  { %1816 = vmatmul.mubr.f32.gmra.mrb[52].mxu1 %v597_v39  ;;  %v4594_v39 = vpack.c.bf16 %v1030_v31, %v1029_v29  ;;  %v324_v31 = vld [vmem:[%s9038_s0 + $0x978] sm:$0xff] }
 0x1ac   :  { %3046 = vmatmul.mubr.f32.gmra.mrb[4].mxu0 %v81_v40  ;;  %1820 = vmatprep.mubr.f32.mxu1 %v620_v42  ;;  %v236_v40 = vld [vmem:[%s9038_s0 + $0x6b8] sm:$0xff]  ;;  %v1031_v42 = vld [vmem:[%s9039_s1 + $0x990] sm:$0xff] }
 0x1ad   :  { %3050 = vmatprep.mubr.f32.mxu0 %v104_v45  ;;  %4577 = vmatpush1.bf16.msra.mxu0 %v4576_v43  ;;  %v1032_v43 = vld [vmem:[%s9039_s1 + $0x998] sm:$0xff]  ;;  %v4330_v45 = vpack.c.bf16 %v854_v33, %v853_v32  ;;  %v1039_v32 = vld [vmem:[%s9039_s1 + $0x9d0] sm:$0xff] }
 0x1ae   :  { %4578 = vmatprep.subr.bf16.mxu0 %v5378_v3  ;;  %v1040_v33 = vld [vmem:[%s9039_s1 + $0x9d8] sm:$0xff] }
 0x1af   :  { %1821 = vmatmul.mubr.f32.gmra.mrb[54].mxu1 %v619_v48  ;;  %v49_v48 = vld [vmem:[%s9038_s0 + $0xe0] sm:$0xff] }
 0x1b0   :  { %3051 = vmatmul.mubr.f32.gmra.mrb[6].mxu0 %v103_v49  ;;  %1825 = vmatprep.mubr.f32.mxu1 %v642_v51  ;;  %v235_v49 = vld [vmem:[%s9038_s0 + $0x6b0] sm:$0xff]  ;;  %v72_v51 = vld [vmem:[%s9038_s0 + $0x198] sm:$0xff] }
 0x1b1   :  { %3055 = vmatprep.mubr.f32.mxu0 %v126_v53  ;;  %4580 = vmatpush1.bf16.msra.mxu0 %v4579_v52  ;;  %v4597_v52 = vpack.c.bf16 %v1032_v43, %v1031_v42  ;;  %v258_v53 = vld [vmem:[%s9038_s0 + $0x768] sm:$0xff]  ;;  %v160_v42 = vld [vmem:[%s9038_s0 + $0x458] sm:$0xff]  ;;  %v4609_v43 = vpack.c.bf16 %v1040_v33, %v1039_v32  ;;  %v247_v32 = vld [vmem:[%s9038_s0 + $0x710] sm:$0xff] }
 0x1b2   :  { %4581 = vmatprep.subr.bf16.mxu0 %v5378_v3  ;;  %v433_v33 = vld [vmem:[%s9038_s0 + $0xce0] sm:$0xff] }
 0x1b3   :  { %1826 = vmatmul.mubr.f32.gmra.mrb[56].mxu1 %v641_v57  ;;  %v4333_v57 = vpack.c.bf16 %v856_v47, %v855_v46  ;;  %v1041_v46 = vld [vmem:[%s9039_s1 + $0x9e0] sm:$0xff]  ;;  %v1042_v47 = vld [vmem:[%s9039_s1 + $0x9e8] sm:$0xff] }
 0x1b4   :  { %3056 = vmatmul.mubr.f32.gmra.mrb[8].mxu0 %v125_v58  ;;  %1830 = vmatprep.mubr.f32.mxu1 %v664_v59  ;;  %v857_v58 = vld [vmem:[%s9039_s1 + $0x420] sm:$0xff]  ;;  %v858_v59 = vld [vmem:[%s9039_s1 + $0x428] sm:$0xff]  ;;  %v4612_v55 = vpack.c.bf16 %v1042_v47, %v1041_v46 }
 0x1b5   :  { %3060 = vmatprep.mubr.f32.mxu0 %v148_v61  ;;  %4583 = vmatpush1.bf16.msra.mxu0 %v4582_v60  ;;  %v71_v60 = vld [vmem:[%s9038_s0 + $0x190] sm:$0xff]  ;;  %v257_v61 = vld [vmem:[%s9038_s0 + $0x760] sm:$0xff]  ;;  %v478_v46 = vld [vmem:[%s9038_s0 + $0xe48] sm:$0xff] }
 0x1b6   :  { %4584 = vmatprep.subr.bf16.mxu0 %v5378_v3 }
 0x1b7   :  { %1831 = vmatmul.mubr.f32.gmra.mrb[58].mxu1 %v663_v1  ;;  %v280_v1 = vld [vmem:[%s9038_s0 + $0x818] sm:$0xff] }
 0x1b8   :  { %3061 = vmatmul.mubr.f32.gmra.mrb[10].mxu0 %v147_v2  ;;  %1835 = vmatprep.mubr.f32.mxu1 %v686_v4  ;;  %v1035_v2 = vld [vmem:[%s9039_s1 + $0x9b0] sm:$0xff]  ;;  %v1036_v4 = vld [vmem:[%s9039_s1 + $0x9b8] sm:$0xff] }
 0x1b9   :  { %3065 = vmatprep.mubr.f32.mxu0 %v170_v7  ;;  %4586 = vmatpush1.bf16.msra.mxu0 %v4585_v6  ;;  %v4336_v6 = vpack.c.bf16 %v858_v59, %v857_v58  ;;  %v859_v7 = vld [vmem:[%s9039_s1 + $0x430] sm:$0xff] }
 0x1ba   :  { %4587 = vmatprep.subr.bf16.mxu0 %v5378_v3  ;;  %v4339_v21 = vpack.c.bf16 %v860_v9, %v859_v7  ;;  %v1043_v59 = vld [vmem:[%s9039_s1 + $0x9f0] sm:$0xff]  ;;  %v869_v9 = vld [vmem:[%s9039_s1 + $0x480] sm:$0xff] }
 0x1bb   :  { %1836 = vmatmul.mubr.f32.gmra.mrb[60].mxu1 %v685_v11  ;;  %v279_v11 = vld [vmem:[%s9038_s0 + $0x810] sm:$0xff] }
 0x1bc   :  { %3066 = vmatmul.mubr.f32.gmra.mrb[12].mxu0 %v169_v14  ;;  %1840 = vmatprep.mubr.f32.mxu1 %v708_v15  ;;  %v116_v14 = vld [vmem:[%s9038_s0 + $0x2f8] sm:$0xff]  ;;  %v4603_v15 = vpack.c.bf16 %v1036_v4, %v1035_v2 }
 0x1bd   :  { %3070 = vmatprep.mubr.f32.mxu0 %v192_v17  ;;  %4589 = vmatpush1.bf16.msra.mxu0 %v4588_v16  ;;  %v302_v16 = vld [vmem:[%s9038_s0 + $0x8c8] sm:$0xff]  ;;  %v1037_v17 = vld [vmem:[%s9039_s1 + $0x9c0] sm:$0xff]  ;;  %v204_v2 = vld [vmem:[%s9038_s0 + $0x5b8] sm:$0xff] }
 0x1be   :  { %4590 = vmatprep.subr.bf16.mxu0 %v5378_v3  ;;  %v4606_v29 = vpack.c.bf16 %v1038_v19, %v1037_v17  ;;  %v871_v19 = vld [vmem:[%s9039_s1 + $0x490] sm:$0xff] }
 0x1bf   :  { %1841 = vmatmul.mubr.f32.gmra.mrb[62].mxu1 %v707_v22  ;;  %v861_v22 = vld [vmem:[%s9039_s1 + $0x440] sm:$0xff] }
 0x1c0   :  { %3071 = vmatmul.mubr.f32.gmra.mrb[14].mxu0 %v191_v23  ;;  %1910 = vmatprep.mubr.f32.mxu1 %v28_v25  ;;  %v862_v23 = vld [vmem:[%s9039_s1 + $0x448] sm:$0xff]  ;;  %v115_v25 = vld [vmem:[%s9038_s0 + $0x2f0] sm:$0xff] }
 0x1c1   :  { %3075 = vmatprep.mubr.f32.mxu0 %v214_v28  ;;  %4592 = vmatpush1.bf16.msra.mxu0 %v4591_v26  ;;  %v301_v26 = vld [vmem:[%s9038_s0 + $0x8c0] sm:$0xff]  ;;  %v138_v28 = vld [vmem:[%s9038_s0 + $0x3a8] sm:$0xff] }
 0x1c2   :  { %4593 = vmatprep.subr.bf16.mxu0 %v5378_v3 }
 0x1c3   :  { %1911 = vmatmul.mubr.f32.vlgmr.msra.gmra.mrb[0].mxu1 %v27_v35  ;;  %v4342_v35 = vpack.c.bf16 %v862_v23, %v861_v22  ;;  %v225_v22 = vld [vmem:[%s9038_s0 + $0x660] sm:$0xff]  ;;  %v411_v23 = vld [vmem:[%s9038_s0 + $0xc30] sm:$0xff] }
 0x1c4   :  { %3076 = vmatmul.mubr.f32.gmra.mrb[16].mxu0 %v213_v37  ;;  %1915 = vmatprep.mubr.f32.mxu1 %v50_v38  ;;  %v863_v37 = vld [vmem:[%s9039_s1 + $0x450] sm:$0xff]  ;;  %v864_v38 = vld [vmem:[%s9039_s1 + $0x458] sm:$0xff] }
 0x1c5   :  { %3080 = vmatprep.mubr.f32.mxu0 %v236_v40  ;;  %4595 = vmatpush1.bf16.msra.mxu0 %v4594_v39  ;;  %v137_v39 = vld [vmem:[%s9038_s0 + $0x3a0] sm:$0xff]  ;;  %v323_v40 = vld [vmem:[%s9038_s0 + $0x970] sm:$0xff] }
 0x1c6   :  { %4596 = vmatprep.subr.bf16.mxu0 %v5378_v3  ;;  %4331 = vmatpush1.bf16.msra.mxu1 %v4330_v45  ;;  %v346_v45 = vld [vmem:[%s9038_s0 + $0xa28] sm:$0xff] }
 0x1c7   :  { %1916 = vmatmul.mubr.f32.gmra.mrb[2].mxu1 %v49_v48  ;;  %4332 = vmatprep.subr.bf16.mxu1 %v5378_v3  ;;  %v4345_v48 = vpack.c.bf16 %v864_v38, %v863_v37  ;;  %v456_v37 = vld [vmem:[%s9038_s0 + $0xd98] sm:$0xff] }
 0x1c8   :  { %3081 = vmatmul.mubr.f32.gmra.mrb[18].mxu0 %v235_v49  ;;  %1920 = vmatprep.mubr.f32.mxu1 %v72_v51  ;;  %v865_v49 = vld [vmem:[%s9039_s1 + $0x460] sm:$0xff]  ;;  %v866_v51 = vld [vmem:[%s9039_s1 + $0x468] sm:$0xff] }
 0x1c9   :  { %3085 = vmatprep.mubr.f32.mxu0 %v258_v53  ;;  %4598 = vmatpush1.bf16.msra.mxu0 %v4597_v52  ;;  %v159_v52 = vld [vmem:[%s9038_s0 + $0x450] sm:$0xff]  ;;  %v345_v53 = vld [vmem:[%s9038_s0 + $0xa20] sm:$0xff]  ;;  %v4348_v58 = vpack.c.bf16 %v866_v51, %v865_v49  ;;  %v878_v49 = vld [vmem:[%s9039_s1 + $0x4c8] sm:$0xff] }
 0x1ca   :  { %4599 = vmatprep.subr.bf16.mxu0 %v5378_v3  ;;  %4334 = vmatpush1.bf16.msra.mxu1 %v4333_v57  ;;  %v368_v57 = vld [vmem:[%s9038_s0 + $0xad8] sm:$0xff]  ;;  %v291_v51 = vld [vmem:[%s9038_s0 + $0x870] sm:$0xff] }
 0x1cb   :  { %1921 = vmatmul.mubr.f32.gmra.mrb[4].mxu1 %v71_v60  ;;  %4335 = vmatprep.subr.bf16.mxu1 %v5378_v3  ;;  %v1044_v60 = vld [vmem:[%s9039_s1 + $0x9f8] sm:$0xff] }
 0x1cc   :  { %3086 = vmatmul.mubr.f32.gmra.mrb[20].mxu0 %v257_v61  ;;  %1925 = vmatprep.mubr.f32.mxu1 %v94_v63  ;;  %v867_v61 = vld [vmem:[%s9039_s1 + $0x470] sm:$0xff]  ;;  %v868_v63 = vld [vmem:[%s9039_s1 + $0x478] sm:$0xff]  ;;  %v4615_v4 = vpack.c.bf16 %v1044_v60, %v1043_v59  ;;  %v313_v59 = vld [vmem:[%s9038_s0 + $0x920] sm:$0xff] }
 0x1cd   :  { %3090 = vmatprep.mubr.f32.mxu0 %v280_v1  ;;  %4601 = vmatpush1.bf16.msra.mxu0 %v4600_v0  ;;  %v181_v0 = vld [vmem:[%s9038_s0 + $0x500] sm:$0xff]  ;;  %v367_v1 = vld [vmem:[%s9038_s0 + $0xad0] sm:$0xff]  ;;  %v4351_v7 = vpack.c.bf16 %v868_v63, %v867_v61  ;;  %v336_v61 = vld [vmem:[%s9038_s0 + $0x9d8] sm:$0xff] }
 0x1ce   :  { %4602 = vmatprep.subr.bf16.mxu0 %v5378_v3  ;;  %4337 = vmatpush1.bf16.msra.mxu1 %v4336_v6  ;;  %v390_v6 = vld [vmem:[%s9038_s0 + $0xb88] sm:$0xff]  ;;  %v499_v60 = vld [vmem:[%s9038_s0 + $0xef0] sm:$0xff] }
 0x1cf   :  { %1926 = vmatmul.mubr.f32.gmra.mrb[6].mxu1 %v93_v10  ;;  %4338 = vmatprep.subr.bf16.mxu1 %v5378_v3  ;;  %v870_v10 = vld [vmem:[%s9039_s1 + $0x488] sm:$0xff] }
 0x1d0   :  { %3091 = vmatmul.mubr.f32.gmra.mrb[22].mxu0 %v279_v11  ;;  %1930 = vmatprep.mubr.f32.mxu1 %v116_v14  ;;  %v203_v11 = vld [vmem:[%s9038_s0 + $0x5b0] sm:$0xff]  ;;  %v389_v14 = vld [vmem:[%s9038_s0 + $0xb80] sm:$0xff]  ;;  %v4354_v17 = vpack.c.bf16 %v870_v10, %v869_v9  ;;  %v522_v63 = vld [vmem:[%s9038_s0 + $0xfa8] sm:$0xff] }
 0x1d1   :  { %3095 = vmatprep.mubr.f32.mxu0 %v302_v16  ;;  %4604 = vmatpush1.bf16.msra.mxu0 %v4603_v15  ;;  %v226_v15 = vld [vmem:[%s9038_s0 + $0x668] sm:$0xff]  ;;  %v412_v16 = vld [vmem:[%s9038_s0 + $0xc38] sm:$0xff] }
 0x1d2   :  { %4605 = vmatprep.subr.bf16.mxu0 %v5378_v3  ;;  %4340 = vmatpush1.bf16.msra.mxu1 %v4339_v21  ;;  %v872_v21 = vld [vmem:[%s9039_s1 + $0x498] sm:$0xff] }
 0x1d3   :  { %1931 = vmatmul.mubr.f32.gmra.mrb[8].mxu1 %v115_v25  ;;  %4341 = vmatprep.subr.bf16.mxu1 %v5378_v3  ;;  %v248_v25 = vld [vmem:[%s9038_s0 + $0x718] sm:$0xff] }
 0x1d4   :  { %3096 = vmatmul.mubr.f32.gmra.mrb[24].mxu0 %v301_v26  ;;  %1935 = vmatprep.mubr.f32.mxu1 %v138_v28  ;;  %v434_v26 = vld [vmem:[%s9038_s0 + $0xce8] sm:$0xff]  ;;  %v4357_v28 = vpack.c.bf16 %v872_v21, %v871_v19  ;;  %v544_v9 = vld [vmem:[%s9038_s0 + $0x1058] sm:$0xff] }
 0x1d5   :  { %3100 = vmatprep.mubr.f32.mxu0 %v324_v31  ;;  %4607 = vmatpush1.bf16.msra.mxu0 %v4606_v29  ;;  %v873_v29 = vld [vmem:[%s9039_s1 + $0x4a0] sm:$0xff]  ;;  %v874_v31 = vld [vmem:[%s9039_s1 + $0x4a8] sm:$0xff] }
 0x1d6   :  { %4608 = vmatprep.subr.bf16.mxu0 %v5378_v3  ;;  %4343 = vmatpush1.bf16.msra.mxu1 %v4342_v35  ;;  %v270_v35 = vld [vmem:[%s9038_s0 + $0x7c8] sm:$0xff]  ;;  %v4360_v38 = vpack.c.bf16 %v874_v31, %v873_v29  ;;  %v587_v29 = vld [vmem:[%s9038_s0 + $0x11b0] sm:$0xff]  ;;  %v424_v31 = vld [vmem:[%s9038_s0 + $0xc98] sm:$0xff] }
 0x1d7   :  { %1936 = vmatmul.mubr.f32.gmra.mrb[10].mxu1 %v137_v39  ;;  %4344 = vmatprep.subr.bf16.mxu1 %v5378_v3  ;;  %v875_v39 = vld [vmem:[%s9039_s1 + $0x4b0] sm:$0xff]  ;;  %v566_v19 = vld [vmem:[%s9038_s0 + $0x1108] sm:$0xff] }
 0x1d8   :  { %3101 = vmatmul.mubr.f32.gmra.mrb[26].mxu0 %v323_v40  ;;  %1940 = vmatprep.mubr.f32.mxu1 %v160_v42  ;;  %v876_v40 = vld [vmem:[%s9039_s1 + $0x4b8] sm:$0xff]  ;;  %v269_v42 = vld [vmem:[%s9038_s0 + $0x7c0] sm:$0xff] }
 0x1d9   :  { %3105 = vmatprep.mubr.f32.mxu0 %v346_v45  ;;  %4610 = vmatpush1.bf16.msra.mxu0 %v4609_v43  ;;  %v455_v43 = vld [vmem:[%s9038_s0 + $0xd90] sm:$0xff]  ;;  %v292_v45 = vld [vmem:[%s9038_s0 + $0x878] sm:$0xff]  ;;  %v4363_v47 = vpack.c.bf16 %v876_v40, %v875_v39  ;;  %v445_v39 = vld [vmem:[%s9038_s0 + $0xd40] sm:$0xff] }
 0x1da   :  { %4611 = vmatprep.subr.bf16.mxu0 %v5378_v3  ;;  %4346 = vmatpush1.bf16.msra.mxu1 %v4345_v48  ;;  %v877_v48 = vld [vmem:[%s9039_s1 + $0x4c0] sm:$0xff]  ;;  %v631_v40 = vld [vmem:[%s9038_s0 + $0x1310] sm:$0xff] }
 0x1db   :  { %1941 = vmatmul.mubr.f32.gmra.mrb[12].mxu1 %v159_v52  ;;  %4347 = vmatprep.subr.bf16.mxu1 %v5378_v3  ;;  %v477_v52 = vld [vmem:[%s9038_s0 + $0xe40] sm:$0xff] }
 0x1dc   :  { %3106 = vmatmul.mubr.f32.gmra.mrb[28].mxu0 %v345_v53  ;;  %1945 = vmatprep.mubr.f32.mxu1 %v182_v54  ;;  %v314_v53 = vld [vmem:[%s9038_s0 + $0x928] sm:$0xff]  ;;  %v500_v54 = vld [vmem:[%s9038_s0 + $0xef8] sm:$0xff] }
 0x1dd   :  { %3110 = vmatprep.mubr.f32.mxu0 %v368_v57  ;;  %4613 = vmatpush1.bf16.msra.mxu0 %v4612_v55  ;;  %v4366_v55 = vpack.c.bf16 %v878_v49, %v877_v48  ;;  %v879_v57 = vld [vmem:[%s9039_s1 + $0x4d0] sm:$0xff]  ;;  %v676_v48 = vld [vmem:[%s9038_s0 + $0x1478] sm:$0xff]  ;;  %v489_v49 = vld [vmem:[%s9038_s0 + $0xea0] sm:$0xff] }
 0x1de   :  { %4614 = vmatprep.subr.bf16.mxu0 %v5378_v3  ;;  %4349 = vmatpush1.bf16.msra.mxu1 %v4348_v58  ;;  %v880_v58 = vld [vmem:[%s9039_s1 + $0x4d8] sm:$0xff] }
 0x1df   :  { %1946 = vmatmul.mubr.f32.gmra.mrb[14].mxu1 %v181_v0  ;;  %4350 = vmatprep.subr.bf16.mxu1 %v5378_v3  ;;  %v4369_v0 = vpack.c.bf16 %v880_v58, %v879_v57  ;;  %v534_v57 = vld [vmem:[%s9038_s0 + $0x1008] sm:$0xff]  ;;  %v720_v58 = vld [vmem:[%s9038_s0 + $0x15d8] sm:$0xff] }
 0x1e0   :  { %3111 = vmatmul.mubr.f32.gmra.mrb[30].mxu0 %v367_v1  ;;  %1950 = vmatprep.mubr.f32.mxu1 %v204_v2  ;;  %v881_v1 = vld [vmem:[%s9039_s1 + $0x4e0] sm:$0xff]  ;;  %v882_v2 = vld [vmem:[%s9039_s1 + $0x4e8] sm:$0xff] }
 0x1e1   :  { %3115 = vmatprep.mubr.f32.mxu0 %v390_v6  ;;  %4616 = vmatpush1.bf16.msra.mxu0 %v4615_v4  ;;  %v335_v4 = vld [vmem:[%s9038_s0 + $0x9d0] sm:$0xff]  ;;  %v521_v6 = vld [vmem:[%s9038_s0 + $0xfa0] sm:$0xff]  ;;  %v4372_v10 = vpack.c.bf16 %v882_v2, %v881_v1  ;;  %v1046_v1 = vld [vmem:[%s9039_s1 + $0xa08] sm:$0xff] }
 0x1e2   :  { %4352 = vmatpush1.bf16.msra.mxu1 %v4351_v7  ;;  %4617 = vmatprep.subr.bf16.mxu0 %v5378_v3  ;;  %v358_v7 = vld [vmem:[%s9038_s0 + $0xa88] sm:$0xff]  ;;  %v555_v2 = vld [vmem:[%s9038_s0 + $0x10b0] sm:$0xff] }
 0x1e3   :  { %1951 = vmatmul.mubr.f32.gmra.mrb[16].mxu1 %v203_v11  ;;  %4353 = vmatprep.subr.bf16.mxu1 %v5378_v3  ;;  %v883_v11 = vld [vmem:[%s9039_s1 + $0x4f0] sm:$0xff] }
 0x1e4   :  { %3116 = vmatmul.mubr.f32.gmra.mrb[32].mxu0 %v389_v14  ;;  %1955 = vmatprep.mubr.f32.mxu1 %v226_v15  ;;  %v884_v14 = vld [vmem:[%s9039_s1 + $0x4f8] sm:$0xff]  ;;  %v357_v15 = vld [vmem:[%s9038_s0 + $0xa80] sm:$0xff] }
 0x1e5   :  { %3120 = vmatprep.mubr.f32.mxu0 %v412_v16  ;;  %v543_v16 = vld [vmem:[%s9038_s0 + $0x1050] sm:$0xff]  ;;  %v4375_v21 = vpack.c.bf16 %v884_v14, %v883_v11  ;;  %v1048_v11 = vld [vmem:[%s9039_s1 + $0xa18] sm:$0xff]  ;;  %v577_v14 = vld [vmem:[%s9038_s0 + $0x1160] sm:$0xff] }
 0x1e6   :  { %4355 = vmatpush1.bf16.msra.mxu1 %v4354_v17  ;;  %v380_v17 = vld [vmem:[%s9038_s0 + $0xb38] sm:$0xff] }
 0x1e7   :  { %1956 = vmatmul.mubr.f32.gmra.mrb[18].mxu1 %v225_v22  ;;  %4356 = vmatprep.subr.bf16.mxu1 %v5378_v3  ;;  %v379_v22 = vld [vmem:[%s9038_s0 + $0xb30] sm:$0xff] }
 0x1e8   :  { %3121 = vmatmul.mubr.f32.gmra.mrb[34].mxu0 %v411_v23  ;;  %1960 = vmatprep.mubr.f32.mxu1 %v248_v25  ;;  %v565_v23 = vld [vmem:[%s9038_s0 + $0x1100] sm:$0xff]  ;;  %v402_v25 = vld [vmem:[%s9038_s0 + $0xbe8] sm:$0xff] }
 0x1e9   :  { %3125 = vmatprep.mubr.f32.mxu0 %v434_v26  ;;  %v588_v26 = vld [vmem:[%s9038_s0 + $0x11b8] sm:$0xff] }
 0x1ea   :  { %4358 = vmatpush1.bf16.msra.mxu1 %v4357_v28  ;;  %v401_v28 = vld [vmem:[%s9038_s0 + $0xbe0] sm:$0xff] }
 0x1eb   :  { %1961 = vmatmul.mubr.f32.gmra.mrb[20].mxu1 %v247_v32  ;;  %4359 = vmatprep.subr.bf16.mxu1 %v5378_v3  ;;  %v610_v32 = vld [vmem:[%s9038_s0 + $0x1268] sm:$0xff] }
 0x1ec   :  { %3126 = vmatmul.mubr.f32.gmra.mrb[36].mxu0 %v433_v33  ;;  %1965 = vmatprep.mubr.f32.mxu1 %v270_v35  ;;  %v423_v33 = vld [vmem:[%s9038_s0 + $0xc90] sm:$0xff]  ;;  %v609_v35 = vld [vmem:[%s9038_s0 + $0x1260] sm:$0xff] }
 0x1ed   :  { %3130 = vmatprep.mubr.f32.mxu0 %v456_v37  ;;  %v446_v37 = vld [vmem:[%s9038_s0 + $0xd48] sm:$0xff] }
 0x1ee   :  { %4361 = vmatpush1.bf16.msra.mxu1 %v4360_v38  ;;  %v632_v38 = vld [vmem:[%s9038_s0 + $0x1318] sm:$0xff] }
 0x1ef   :  { %1966 = vmatmul.mubr.f32.gmra.mrb[22].mxu1 %v269_v42  ;;  %4362 = vmatprep.subr.bf16.mxu1 %v5378_v3  ;;  %v468_v42 = vld [vmem:[%s9038_s0 + $0xdf8] sm:$0xff] }
 0x1f0   :  { %3131 = vmatmul.mubr.f32.gmra.mrb[38].mxu0 %v455_v43  ;;  %1970 = vmatprep.mubr.f32.mxu1 %v292_v45  ;;  %v654_v43 = vld [vmem:[%s9038_s0 + $0x13c8] sm:$0xff]  ;;  %v467_v45 = vld [vmem:[%s9038_s0 + $0xdf0] sm:$0xff] }
 0x1f1   :  { %3135 = vmatprep.mubr.f32.mxu0 %v478_v46  ;;  %v653_v46 = vld [vmem:[%s9038_s0 + $0x13c0] sm:$0xff] }
 0x1f2   :  { %4364 = vmatpush1.bf16.msra.mxu1 %v4363_v47  ;;  %v490_v47 = vld [vmem:[%s9038_s0 + $0xea8] sm:$0xff] }
 0x1f3   :  { %1971 = vmatmul.mubr.f32.gmra.mrb[24].mxu1 %v291_v51  ;;  %4365 = vmatprep.subr.bf16.mxu1 %v5378_v3  ;;  %v675_v51 = vld [vmem:[%s9038_s0 + $0x1470] sm:$0xff] }
 0x1f4   :  { %3136 = vmatmul.mubr.f32.gmra.mrb[40].mxu0 %v477_v52  ;;  %1975 = vmatprep.mubr.f32.mxu1 %v314_v53  ;;  %v512_v52 = vld [vmem:[%s9038_s0 + $0xf58] sm:$0xff]  ;;  %v698_v53 = vld [vmem:[%s9038_s0 + $0x1528] sm:$0xff] }
 0x1f5   :  { %3140 = vmatprep.mubr.f32.mxu0 %v500_v54  ;;  %v511_v54 = vld [vmem:[%s9038_s0 + $0xf50] sm:$0xff] }
 0x1f6   :  { %4367 = vmatpush1.bf16.msra.mxu1 %v4366_v55  ;;  %v697_v55 = vld [vmem:[%s9038_s0 + $0x1520] sm:$0xff] }
 0x1f7   :  { %1976 = vmatmul.mubr.f32.gmra.mrb[26].mxu1 %v313_v59  ;;  %4368 = vmatprep.subr.bf16.mxu1 %v5378_v3  ;;  %v533_v59 = vld [vmem:[%s9038_s0 + $0x1000] sm:$0xff] }
 0x1f8   :  { %3141 = vmatmul.mubr.f32.gmra.mrb[42].mxu0 %v499_v60  ;;  %1980 = vmatprep.mubr.f32.mxu1 %v336_v61  ;;  %v719_v60 = vld [vmem:[%s9038_s0 + $0x15d0] sm:$0xff]  ;;  %v556_v61 = vld [vmem:[%s9038_s0 + $0x10b8] sm:$0xff] }
 0x1f9   :  { %3145 = vmatprep.mubr.f32.mxu0 %v522_v63  ;;  %v40_v63 = vld [vmem:[%s9038_s0 + $0x98] sm:$0xff] }
 0x1fa   :  { %4370 = vmatpush1.bf16.msra.mxu1 %v4369_v0  ;;  %v1045_v0 = vld [vmem:[%s9039_s1 + $0xa00] sm:$0xff] }
 0x1fb   :  { %1981 = vmatmul.mubr.f32.gmra.mrb[28].mxu1 %v335_v4  ;;  %4371 = vmatprep.subr.bf16.mxu1 %v5378_v3  ;;  %v39_v4 = vld [vmem:[%s9038_s0 + $0x90] sm:$0xff] }
 0x1fc   :  { %3146 = vmatmul.mubr.f32.gmra.mrb[44].mxu0 %v521_v6  ;;  %1985 = vmatprep.mubr.f32.mxu1 %v358_v7  ;;  %v4618_v6 = vpack.c.bf16 %v1046_v1, %v1045_v0  ;;  %v578_v7 = vld [vmem:[%s9038_s0 + $0x1168] sm:$0xff] }
 0x1fd   :  { %3150 = vmatprep.mubr.f32.mxu0 %v544_v9  ;;  %v62_v9 = vld [vmem:[%s9038_s0 + $0x148] sm:$0xff] }
 0x1fe   :  { %4373 = vmatpush1.bf16.msra.mxu1 %v4372_v10  ;;  %v1047_v10 = vld [vmem:[%s9039_s1 + $0xa10] sm:$0xff]  ;;  %v194_v1 = vld [vmem:[%s9038_s0 + $0x568] sm:$0xff] }
 0x1ff   :  { %1986 = vmatmul.mubr.f32.gmra.mrb[30].mxu1 %v357_v15  ;;  %4374 = vmatprep.subr.bf16.mxu1 %v5378_v3  ;;  %v61_v15 = vld [vmem:[%s9038_s0 + $0x140] sm:$0xff] }
 0x200   :  { %3151 = vmatmul.mubr.f32.gmra.mrb[46].mxu0 %v543_v16  ;;  %1990 = vmatprep.mubr.f32.mxu1 %v380_v17  ;;  %v600_v16 = vld [vmem:[%s9038_s0 + $0x1218] sm:$0xff]  ;;  %v4621_v17 = vpack.c.bf16 %v1048_v11, %v1047_v10 }
 0x201   :  { %3155 = vmatprep.mubr.f32.mxu0 %v566_v19  ;;  %v84_v19 = vld [vmem:[%s9038_s0 + $0x1f8] sm:$0xff] }
 0x202   :  { %4376 = vmatpush1.bf16.msra.mxu1 %v4375_v21  ;;  %v1049_v21 = vld [vmem:[%s9039_s1 + $0xa20] sm:$0xff]  ;;  %v216_v11 = vld [vmem:[%s9038_s0 + $0x618] sm:$0xff] }
 0x203   :  { %1991 = vmatmul.mubr.f32.gmra.mrb[32].mxu1 %v379_v22  ;;  %4677 = vmatprep.subr.bf16.mxu1 %v5378_v3  ;;  %v1050_v22 = vld [vmem:[%s9039_s1 + $0xa28] sm:$0xff] }
 0x204   :  { %3156 = vmatmul.mubr.f32.gmra.mrb[48].mxu0 %v565_v23  ;;  %1995 = vmatprep.mubr.f32.mxu1 %v402_v25  ;;  %v599_v23 = vld [vmem:[%s9038_s0 + $0x1210] sm:$0xff] }
 0x205   :  { %3160 = vmatprep.mubr.f32.mxu0 %v588_v26  ;;  %v83_v25 = vld [vmem:[%s9038_s0 + $0x1f0] sm:$0xff]  ;;  %v622_v26 = vld [vmem:[%s9038_s0 + $0x12c8] sm:$0xff] }
 0x207   :  { %1996 = vmatmul.mubr.f32.gmra.mrb[34].mxu1 %v401_v28  ;;  %v4624_v28 = vpack.c.bf16 %v1050_v22, %v1049_v21  ;;  %v238_v21 = vld [vmem:[%s9038_s0 + $0x6c8] sm:$0xff] }
 0x208   :  { %3161 = vmatmul.mubr.f32.gmra.mrb[50].mxu0 %v587_v29  ;;  %2000 = vmatprep.mubr.f32.mxu1 %v424_v31  ;;  %v106_v29 = vld [vmem:[%s9038_s0 + $0x2a8] sm:$0xff]  ;;  %v1051_v31 = vld [vmem:[%s9039_s1 + $0xa30] sm:$0xff] }
 0x209   :  { %3165 = vmatprep.mubr.f32.mxu0 %v610_v32  ;;  %v1052_v32 = vld [vmem:[%s9039_s1 + $0xa38] sm:$0xff] }
 0x20b   :  { %2001 = vmatmul.mubr.f32.gmra.mrb[36].mxu1 %v423_v33  ;;  %v621_v33 = vld [vmem:[%s9038_s0 + $0x12c0] sm:$0xff] }
 0x20c   :  { %3166 = vmatmul.mubr.f32.gmra.mrb[52].mxu0 %v609_v35  ;;  %2005 = vmatprep.mubr.f32.mxu1 %v446_v37  ;;  %v105_v35 = vld [vmem:[%s9038_s0 + $0x2a0] sm:$0xff]  ;;  %v644_v37 = vld [vmem:[%s9038_s0 + $0x1378] sm:$0xff] }
 0x20d   :  { %3170 = vmatprep.mubr.f32.mxu0 %v632_v38  ;;  %v4627_v38 = vpack.c.bf16 %v1052_v32, %v1051_v31  ;;  %v259_v31 = vld [vmem:[%s9038_s0 + $0x770] sm:$0xff]  ;;  %v282_v32 = vld [vmem:[%s9038_s0 + $0x828] sm:$0xff] }
 0x20f   :  { %2006 = vmatmul.mubr.f32.gmra.mrb[38].mxu1 %v445_v39  ;;  %v128_v39 = vld [vmem:[%s9038_s0 + $0x358] sm:$0xff] }
 0x210   :  { %3171 = vmatmul.mubr.f32.gmra.mrb[54].mxu0 %v631_v40  ;;  %2010 = vmatprep.mubr.f32.mxu1 %v468_v42  ;;  %v1053_v40 = vld [vmem:[%s9039_s1 + $0xa40] sm:$0xff]  ;;  %v1054_v42 = vld [vmem:[%s9039_s1 + $0xa48] sm:$0xff] }
 0x211   :  { %3175 = vmatprep.mubr.f32.mxu0 %v654_v43  ;;  %v643_v43 = vld [vmem:[%s9038_s0 + $0x1370] sm:$0xff] }
 0x213   :  { %2011 = vmatmul.mubr.f32.gmra.mrb[40].mxu1 %v467_v45  ;;  %v127_v45 = vld [vmem:[%s9038_s0 + $0x350] sm:$0xff] }
 0x214   :  { %3176 = vmatmul.mubr.f32.gmra.mrb[56].mxu0 %v653_v46  ;;  %2015 = vmatprep.mubr.f32.mxu1 %v490_v47  ;;  %v666_v46 = vld [vmem:[%s9038_s0 + $0x1428] sm:$0xff]  ;;  %v4630_v47 = vpack.c.bf16 %v1054_v42, %v1053_v40  ;;  %v139_v42 = vld [vmem:[%s9038_s0 + $0x3b0] sm:$0xff] }
 0x215   :  { %3180 = vmatprep.mubr.f32.mxu0 %v676_v48  ;;  %v150_v48 = vld [vmem:[%s9038_s0 + $0x408] sm:$0xff] }
 0x216   :  { %v326_v40 = vld [vmem:[%s9038_s0 + $0x988] sm:$0xff] }
 0x217   :  { %2016 = vmatmul.mubr.f32.gmra.mrb[42].mxu1 %v489_v49  ;;  %v1055_v49 = vld [vmem:[%s9039_s1 + $0xa50] sm:$0xff] }
 0x218   :  { %3181 = vmatmul.mubr.f32.gmra.mrb[58].mxu0 %v675_v51  ;;  %2020 = vmatprep.mubr.f32.mxu1 %v512_v52  ;;  %v1056_v51 = vld [vmem:[%s9039_s1 + $0xa58] sm:$0xff]  ;;  %v665_v52 = vld [vmem:[%s9038_s0 + $0x1420] sm:$0xff] }
 0x219   :  { %3185 = vmatprep.mubr.f32.mxu0 %v698_v53  ;;  %v149_v53 = vld [vmem:[%s9038_s0 + $0x400] sm:$0xff] }
 0x21b   :  { %2021 = vmatmul.mubr.f32.gmra.mrb[44].mxu1 %v511_v54  ;;  %v688_v54 = vld [vmem:[%s9038_s0 + $0x14d8] sm:$0xff] }
 0x21c   :  { %3186 = vmatmul.mubr.f32.gmra.mrb[60].mxu0 %v697_v55  ;;  %2025 = vmatprep.mubr.f32.mxu1 %v534_v57  ;;  %v4633_v55 = vpack.c.bf16 %v1056_v51, %v1055_v49  ;;  %v172_v57 = vld [vmem:[%s9038_s0 + $0x4b8] sm:$0xff]  ;;  %v183_v49 = vld [vmem:[%s9038_s0 + $0x510] sm:$0xff]  ;;  %v369_v51 = vld [vmem:[%s9038_s0 + $0xae0] sm:$0xff] }
 0x21d   :  { %3190 = vmatprep.mubr.f32.mxu0 %v720_v58  ;;  %v1057_v58 = vld [vmem:[%s9039_s1 + $0xa60] sm:$0xff] }
 0x21f   :  { %2026 = vmatmul.mubr.f32.gmra.mrb[46].mxu1 %v533_v59  ;;  %v1058_v59 = vld [vmem:[%s9039_s1 + $0xa68] sm:$0xff] }
 0x220   :  { %3191 = vmatmul.mubr.f32.gmra.mrb[62].mxu0 %v719_v60  ;;  %2030 = vmatprep.mubr.f32.mxu1 %v556_v61  ;;  %v687_v60 = vld [vmem:[%s9038_s0 + $0x14d0] sm:$0xff]  ;;  %v4636_v0 = vpack.c.bf16 %v1058_v59, %v1057_v58  ;;  %v413_v58 = vld [vmem:[%s9038_s0 + $0xc40] sm:$0xff]  ;;  %v436_v59 = vld [vmem:[%s9038_s0 + $0xcf8] sm:$0xff] }
 0x221   :  { %3260 = vmatprep.mubr.f32.mxu0 %v40_v63  ;;  %v171_v61 = vld [vmem:[%s9038_s0 + $0x4b0] sm:$0xff]  ;;  %v710_v63 = vld [vmem:[%s9038_s0 + $0x1588] sm:$0xff] }
 0x223   :  { %2031 = vmatmul.mubr.f32.gmra.mrb[48].mxu1 %v555_v2  ;;  %v1059_v2 = vld [vmem:[%s9039_s1 + $0xa70] sm:$0xff] }
 0x224   :  { %3261 = vmatmul.mubr.f32.vlgmr.msra.gmra.mrb[0].mxu0 %v39_v4  ;;  %2035 = vmatprep.mubr.f32.mxu1 %v578_v7  ;;  %v1060_v4 = vld [vmem:[%s9039_s1 + $0xa78] sm:$0xff]  ;;  %v193_v7 = vld [vmem:[%s9038_s0 + $0x560] sm:$0xff] }
 0x225   :  { %4619 = vmatpush1.bf16.msra.mxu0 %v4618_v6  ;;  %3265 = vmatprep.mubr.f32.mxu0 %v62_v9  ;;  %v709_v6 = vld [vmem:[%s9038_s0 + $0x1580] sm:$0xff]  ;;  %v30_v9 = vld [vmem:[%s9038_s0 + $0x48] sm:$0xff]  ;;  %v4639_v10 = vpack.c.bf16 %v1060_v4, %v1059_v2  ;;  %v480_v2 = vld [vmem:[%s9038_s0 + $0xe58] sm:$0xff] }
 0x226   :  { %4620 = vmatprep.subr.bf16.mxu0 %v5378_v3  ;;  %v293_v4 = vld [vmem:[%s9038_s0 + $0x880] sm:$0xff] }
 0x227   :  { %2036 = vmatmul.mubr.f32.gmra.mrb[50].mxu1 %v577_v14  ;;  %v1061_v14 = vld [vmem:[%s9039_s1 + $0xa80] sm:$0xff] }
 0x228   :  { %3266 = vmatmul.mubr.f32.gmra.mrb[2].mxu0 %v61_v15  ;;  %2040 = vmatprep.mubr.f32.mxu1 %v600_v16  ;;  %v1062_v15 = vld [vmem:[%s9039_s1 + $0xa88] sm:$0xf]  ;;  %v29_v16 = vld [vmem:[%s9038_s0 + $0x40] sm:$0xff] }
 0x229   :  { %3270 = vmatprep.mubr.f32.mxu0 %v84_v19  ;;  %4622 = vmatpush1.bf16.msra.mxu0 %v4621_v17  ;;  %v215_v17 = vld [vmem:[%s9038_s0 + $0x610] sm:$0xff]  ;;  %v52_v19 = vld [vmem:[%s9038_s0 + $0xf8] sm:$0xff]  ;;  %v4642_v22 = vpack.c.bf16 %v1062_v15, %v1061_v14  ;;  %v337_v14 = vld [vmem:[%s9038_s0 + $0x9e0] sm:$0xff] }
 0x22a   :  { %4623 = vmatprep.subr.bf16.mxu0 %v5378_v3  ;;  %v523_v15 = vld [vmem:[%s9038_s0 + $0xfb0] sm:$0xff] }
 0x22b   :  { %2041 = vmatmul.mubr.f32.gmra.mrb[52].mxu1 %v599_v23  ;;  %v51_v23 = vld [vmem:[%s9038_s0 + $0xf0] sm:$0xff] }
 0x22c   :  { %3271 = vmatmul.mubr.f32.gmra.mrb[4].mxu0 %v83_v25  ;;  %2045 = vmatprep.mubr.f32.mxu1 %v622_v26  ;;  %v237_v25 = vld [vmem:[%s9038_s0 + $0x6c0] sm:$0xff]  ;;  %v74_v26 = vld [vmem:[%s9038_s0 + $0x1a8] sm:$0xff] }
 0x22d   :  { %3275 = vmatprep.mubr.f32.mxu0 %v106_v29  ;;  %4625 = vmatpush1.bf16.msra.mxu0 %v4624_v28  ;;  %v260_v28 = vld [vmem:[%s9038_s0 + $0x778] sm:$0xff]  ;;  %v73_v29 = vld [vmem:[%s9038_s0 + $0x1a0] sm:$0xff] }
 0x22e   :  { %4626 = vmatprep.subr.bf16.mxu0 %v5378_v3 }
 0x22f   :  { %2046 = vmatmul.mubr.f32.gmra.mrb[54].mxu1 %v621_v33  ;;  %v95_v33 = vld [vmem:[%s9038_s0 + $0x250] sm:$0xff] }
 0x230   :  { %3276 = vmatmul.mubr.f32.gmra.mrb[6].mxu0 %v105_v35  ;;  %2050 = vmatprep.mubr.f32.mxu1 %v644_v37  ;;  %v281_v35 = vld [vmem:[%s9038_s0 + $0x820] sm:$0xff]  ;;  %v304_v37 = vld [vmem:[%s9038_s0 + $0x8d8] sm:$0xff] }
 0x231   :  { %3280 = vmatprep.mubr.f32.mxu0 %v128_v39  ;;  %4628 = vmatpush1.bf16.msra.mxu0 %v4627_v38  ;;  %v117_v38 = vld [vmem:[%s9038_s0 + $0x300] sm:$0xff]  ;;  %v303_v39 = vld [vmem:[%s9038_s0 + $0x8d0] sm:$0xff] }
 0x232   :  { %4629 = vmatprep.subr.bf16.mxu0 %v5378_v3 }
 0x233   :  { %2051 = vmatmul.mubr.f32.gmra.mrb[56].mxu1 %v643_v43  ;;  %v325_v43 = vld [vmem:[%s9038_s0 + $0x980] sm:$0xff] }
 0x234   :  { %3281 = vmatmul.mubr.f32.gmra.mrb[8].mxu0 %v127_v45  ;;  %2055 = vmatprep.mubr.f32.mxu1 %v666_v46  ;;  %v348_v45 = vld [vmem:[%s9038_s0 + $0xa38] sm:$0xff]  ;;  %v161_v46 = vld [vmem:[%s9038_s0 + $0x460] sm:$0xff] }
 0x235   :  { %3285 = vmatprep.mubr.f32.mxu0 %v150_v48  ;;  %4631 = vmatpush1.bf16.msra.mxu0 %v4630_v47  ;;  %v347_v47 = vld [vmem:[%s9038_s0 + $0xa30] sm:$0xff]  ;;  %v370_v48 = vld [vmem:[%s9038_s0 + $0xae8] sm:$0xff] }
 0x236   :  { %4632 = vmatprep.subr.bf16.mxu0 %v5378_v3 }
 0x237   :  { %2056 = vmatmul.mubr.f32.gmra.mrb[58].mxu1 %v665_v52  ;;  %v392_v52 = vld [vmem:[%s9038_s0 + $0xb98] sm:$0xff] }
 0x238   :  { %3286 = vmatmul.mubr.f32.gmra.mrb[10].mxu0 %v149_v53  ;;  %2060 = vmatprep.mubr.f32.mxu1 %v688_v54  ;;  %v205_v53 = vld [vmem:[%s9038_s0 + $0x5c0] sm:$0xff]  ;;  %v391_v54 = vld [vmem:[%s9038_s0 + $0xb90] sm:$0xff] }
 0x239   :  { %3290 = vmatprep.mubr.f32.mxu0 %v172_v57  ;;  %4634 = vmatpush1.bf16.msra.mxu0 %v4633_v55  ;;  %v414_v55 = vld [vmem:[%s9038_s0 + $0xc48] sm:$0xff]  ;;  %v227_v57 = vld [vmem:[%s9038_s0 + $0x670] sm:$0xff] }
 0x23a   :  { %4635 = vmatprep.subr.bf16.mxu0 %v5378_v3 }
 0x23b   :  { %2061 = vmatmul.mubr.f32.gmra.mrb[60].mxu1 %v687_v60  ;;  %v249_v60 = vld [vmem:[%s9038_s0 + $0x720] sm:$0xff] }
 0x23c   :  { %3291 = vmatmul.mubr.f32.gmra.mrb[12].mxu0 %v171_v61  ;;  %2065 = vmatprep.mubr.f32.mxu1 %v710_v63  ;;  %v435_v61 = vld [vmem:[%s9038_s0 + $0xcf0] sm:$0xff]  ;;  %v458_v63 = vld [vmem:[%s9038_s0 + $0xda8] sm:$0xff] }
 0x23d   :  { %3295 = vmatprep.mubr.f32.mxu0 %v194_v1  ;;  %4637 = vmatpush1.bf16.msra.mxu0 %v4636_v0  ;;  %v271_v0 = vld [vmem:[%s9038_s0 + $0x7d0] sm:$0xff]  ;;  %v457_v1 = vld [vmem:[%s9038_s0 + $0xda0] sm:$0xff] }
 0x23e   :  { %4638 = vmatprep.subr.bf16.mxu0 %v5378_v3 }
 0x23f   :  { %2066 = vmatmul.mubr.f32.gmra.mrb[62].mxu1 %v709_v6  ;;  %v479_v6 = vld [vmem:[%s9038_s0 + $0xe50] sm:$0xff] }
 0x240   :  { %3296 = vmatmul.mubr.f32.gmra.mrb[14].mxu0 %v193_v7  ;;  %2135 = vmatprep.mubr.f32.mxu1 %v30_v9  ;;  %v502_v7 = vld [vmem:[%s9038_s0 + $0xf08] sm:$0xff]  ;;  %v315_v9 = vld [vmem:[%s9038_s0 + $0x930] sm:$0xff] }
 0x241   :  { %3300 = vmatprep.mubr.f32.mxu0 %v216_v11  ;;  %4640 = vmatpush1.bf16.msra.mxu0 %v4639_v10  ;;  %v501_v10 = vld [vmem:[%s9038_s0 + $0xf00] sm:$0xff]  ;;  %v524_v11 = vld [vmem:[%s9038_s0 + $0xfb8] sm:$0xff] }
 0x242   :  { %4641 = vmatprep.subr.bf16.mxu0 %v5378_v3 }
 0x243   :  { %2136 = vmatmul.mubr.f32.vlgmr.msra.gmra.mrb[0].mxu1 %v29_v16  ;;  %v546_v16 = vld [vmem:[%s9038_s0 + $0x1068] sm:$0xff] }
 0x244   :  { %3301 = vmatmul.mubr.f32.gmra.mrb[16].mxu0 %v215_v17  ;;  %2140 = vmatprep.mubr.f32.mxu1 %v52_v19  ;;  %v359_v17 = vld [vmem:[%s9038_s0 + $0xa90] sm:$0xff]  ;;  %v545_v19 = vld [vmem:[%s9038_s0 + $0x1060] sm:$0xff] }
 0x245   :  { %3305 = vmatprep.mubr.f32.mxu0 %v238_v21  ;;  %4693 = vmatpush1.bf16.msra.mxu1 %v5433_v8  ;;  %v96_v8 = vld [vmem:[%s9038_s0 + $0x258] sm:$0xff] }
 0x246   :  { %4678 = vmatprep.subr.bf16.mxu1 %v5378_v3  ;;  %4644 = vmatpush1.bf16.msk.msra.mxu0 %vm4643_vm2, %v4642_v22  ;;  %v568_v21 = vld [vmem:[%s9038_s0 + $0x1118] sm:$0xff]  ;;  %v381_v22 = vld [vmem:[%s9038_s0 + $0xb40] sm:$0xff] }
 0x247   :  { %2141 = vmatmul.mubr.f32.gmra.mrb[2].mxu1 %v51_v23  ;;  %v567_v23 = vld [vmem:[%s9038_s0 + $0x1110] sm:$0xff] }
 0x248   :  { %3306 = vmatmul.mubr.f32.gmra.mrb[18].mxu0 %v237_v25  ;;  %2145 = vmatprep.mubr.f32.mxu1 %v74_v26  ;;  %v403_v25 = vld [vmem:[%s9038_s0 + $0xbf0] sm:$0xff]  ;;  %v589_v26 = vld [vmem:[%s9038_s0 + $0x11c0] sm:$0xff] }
 0x249   :  { %3310 = vmatprep.mubr.f32.mxu0 %v260_v28  ;;  %4694 = vmatpush1.bf16.msra.mxu1 %v5443_v12  ;;  %v118_v12 = vld [vmem:[%s9038_s0 + $0x308] sm:$0xff]  ;;  %v612_v28 = vld [vmem:[%s9038_s0 + $0x1278] sm:$0xff] }
 0x24a   :  { %4679 = vmatprep.subr.bf16.mxu1 %v5378_v3 }
 0x24b   :  { %2146 = vmatmul.mubr.f32.gmra.mrb[4].mxu1 %v73_v29  ;;  %v425_v29 = vld [vmem:[%s9038_s0 + $0xca0] sm:$0xff] }
 0x24c   :  { %3311 = vmatmul.mubr.f32.gmra.mrb[20].mxu0 %v259_v31  ;;  %2150 = vmatprep.mubr.f32.mxu1 %v96_v8  ;;  %v611_v31 = vld [vmem:[%s9038_s0 + $0x1270] sm:$0xff]  ;;  %v448_v8 = vld [vmem:[%s9038_s0 + $0xd58] sm:$0xff] }
 0x24d   :  { %3315 = vmatprep.mubr.f32.mxu0 %v282_v32  ;;  %4695 = vmatpush1.bf16.msra.mxu1 %v5460_v18  ;;  %v140_v18 = vld [vmem:[%s9038_s0 + $0x3b8] sm:$0xff]  ;;  %v634_v32 = vld [vmem:[%s9038_s0 + $0x1328] sm:$0xff] }
 0x24e   :  { %4680 = vmatprep.subr.bf16.mxu1 %v5378_v3 }
 0x24f   :  { %2151 = vmatmul.mubr.f32.gmra.mrb[6].mxu1 %v95_v33  ;;  %v447_v33 = vld [vmem:[%s9038_s0 + $0xd50] sm:$0xff] }
 0x250   :  { %3316 = vmatmul.mubr.f32.gmra.mrb[22].mxu0 %v281_v35  ;;  %2155 = vmatprep.mubr.f32.mxu1 %v118_v12  ;;  %v633_v35 = vld [vmem:[%s9038_s0 + $0x1320] sm:$0xff]  ;;  %v470_v12 = vld [vmem:[%s9038_s0 + $0xe08] sm:$0xff] }
 0x251   :  { %3320 = vmatprep.mubr.f32.mxu0 %v304_v37  ;;  %4696 = vmatpush1.bf16.msra.mxu1 %v5477_v24  ;;  %v162_v24 = vld [vmem:[%s9038_s0 + $0x468] sm:$0xff]  ;;  %v656_v37 = vld [vmem:[%s9038_s0 + $0x13d8] sm:$0xff] }
 0x252   :  { %4681 = vmatprep.subr.bf16.mxu1 %v5378_v3 }
 0x253   :  { %2156 = vmatmul.mubr.f32.gmra.mrb[8].mxu1 %v117_v38  ;;  %v469_v38 = vld [vmem:[%s9038_s0 + $0xe00] sm:$0xff] }
 0x254   :  { %3321 = vmatmul.mubr.f32.gmra.mrb[24].mxu0 %v303_v39  ;;  %2160 = vmatprep.mubr.f32.mxu1 %v140_v18  ;;  %v655_v39 = vld [vmem:[%s9038_s0 + $0x13d0] sm:$0xff]  ;;  %v492_v18 = vld [vmem:[%s9038_s0 + $0xeb8] sm:$0xff] }
 0x255   :  { %3325 = vmatprep.mubr.f32.mxu0 %v326_v40  ;;  %4697 = vmatpush1.bf16.msra.mxu1 %v5494_v30  ;;  %v184_v30 = vld [vmem:[%s9038_s0 + $0x518] sm:$0xff]  ;;  %v678_v40 = vld [vmem:[%s9038_s0 + $0x1488] sm:$0xff] }
 0x256   :  { %4682 = vmatprep.subr.bf16.mxu1 %v5378_v3 }
 0x257   :  { %2161 = vmatmul.mubr.f32.gmra.mrb[10].mxu1 %v139_v42  ;;  %v491_v42 = vld [vmem:[%s9038_s0 + $0xeb0] sm:$0xff] }
 0x258   :  { %3326 = vmatmul.mubr.f32.gmra.mrb[26].mxu0 %v325_v43  ;;  %2165 = vmatprep.mubr.f32.mxu1 %v162_v24  ;;  %v677_v43 = vld [vmem:[%s9038_s0 + $0x1480] sm:$0xff]  ;;  %v514_v24 = vld [vmem:[%s9038_s0 + $0xf68] sm:$0xff] }
 0x259   :  { %3330 = vmatprep.mubr.f32.mxu0 %v348_v45  ;;  %4698 = vmatpush1.bf16.msra.mxu1 %v5511_v36  ;;  %v206_v36 = vld [vmem:[%s9038_s0 + $0x5c8] sm:$0xff]  ;;  %v700_v45 = vld [vmem:[%s9038_s0 + $0x1538] sm:$0xff] }
 0x25a   :  { %4683 = vmatprep.subr.bf16.mxu1 %v5378_v3 }
 0x25b   :  { %2166 = vmatmul.mubr.f32.gmra.mrb[12].mxu1 %v161_v46  ;;  %v513_v46 = vld [vmem:[%s9038_s0 + $0xf60] sm:$0xff] }
 0x25c   :  { %3331 = vmatmul.mubr.f32.gmra.mrb[28].mxu0 %v347_v47  ;;  %2170 = vmatprep.mubr.f32.mxu1 %v184_v30  ;;  %v699_v47 = vld [vmem:[%s9038_s0 + $0x1530] sm:$0xff]  ;;  %v536_v30 = vld [vmem:[%s9038_s0 + $0x1018] sm:$0xff] }
 0x25d   :  { %3335 = vmatprep.mubr.f32.mxu0 %v370_v48  ;;  %4699 = vmatpush1.bf16.msra.mxu1 %v5534_v44  ;;  %v228_v44 = vld [vmem:[%s9038_s0 + $0x678] sm:$0xff]  ;;  %v722_v48 = vld [vmem:[%s9038_s0 + $0x15e8] sm:$0xff] }
 0x25e   :  { %4684 = vmatprep.subr.bf16.mxu1 %v5378_v3 }
 0x25f   :  { %2171 = vmatmul.mubr.f32.gmra.mrb[14].mxu1 %v183_v49  ;;  %v535_v49 = vld [vmem:[%s9038_s0 + $0x1010] sm:$0xff] }
 0x260   :  { %3336 = vmatmul.mubr.f32.gmra.mrb[30].mxu0 %v369_v51  ;;  %2175 = vmatprep.mubr.f32.mxu1 %v206_v36  ;;  %v721_v51 = vld [vmem:[%s9038_s0 + $0x15e0] sm:$0xff]  ;;  %v558_v36 = vld [vmem:[%s9038_s0 + $0x10c8] sm:$0xff] }
 0x261   :  { %3340 = vmatprep.mubr.f32.mxu0 %v392_v52  ;;  %4700 = vmatpush1.bf16.msra.mxu1 %v5551_v50  ;;  %v250_v50 = vld [vmem:[%s9038_s0 + $0x728] sm:$0xff] }
 0x262   :  { %4685 = vmatprep.subr.bf16.mxu1 %v5378_v3  ;;  %v42_v52 = vld [vmem:[%s9038_s0 + $0xa8] sm:$0xff] }
 0x263   :  { %2176 = vmatmul.mubr.f32.gmra.mrb[16].mxu1 %v205_v53  ;;  %v557_v53 = vld [vmem:[%s9038_s0 + $0x10c0] sm:$0xff] }
 0x264   :  { %3341 = vmatmul.mubr.f32.gmra.mrb[32].mxu0 %v391_v54  ;;  %2180 = vmatprep.mubr.f32.mxu1 %v228_v44  ;;  %v41_v54 = vld [vmem:[%s9038_s0 + $0xa0] sm:$0xff]  ;;  %v580_v44 = vld [vmem:[%s9038_s0 + $0x1178] sm:$0xff] }
 0x265   :  { %3345 = vmatprep.mubr.f32.mxu0 %v414_v55  ;;  %4701 = vmatpush1.bf16.msra.mxu1 %v5568_v56  ;;  %v272_v56 = vld [vmem:[%s9038_s0 + $0x7d8] sm:$0xff] }
 0x266   :  { %4686 = vmatprep.subr.bf16.mxu1 %v5378_v3  ;;  %v64_v55 = vld [vmem:[%s9038_s0 + $0x158] sm:$0xff] }
 0x267   :  { %2181 = vmatmul.mubr.f32.gmra.mrb[18].mxu1 %v227_v57  ;;  %v579_v57 = vld [vmem:[%s9038_s0 + $0x1170] sm:$0xff] }
 0x268   :  { %3346 = vmatmul.mubr.f32.gmra.mrb[34].mxu0 %v413_v58  ;;  %2185 = vmatprep.mubr.f32.mxu1 %v250_v50  ;;  %v63_v58 = vld [vmem:[%s9038_s0 + $0x150] sm:$0xff]  ;;  %v602_v50 = vld [vmem:[%s9038_s0 + $0x1228] sm:$0xff] }
 0x269   :  { %3350 = vmatprep.mubr.f32.mxu0 %v436_v59  ;;  %4702 = vmatpush1.bf16.msra.mxu1 %v5585_v62  ;;  %v294_v62 = vld [vmem:[%s9038_s0 + $0x888] sm:$0xff] }
 0x26a   :  { %4687 = vmatprep.subr.bf16.mxu1 %v5378_v3  ;;  %v86_v59 = vld [vmem:[%s9038_s0 + $0x208] sm:$0xff] }
 0x26b   :  { %2186 = vmatmul.mubr.f32.gmra.mrb[20].mxu1 %v249_v60  ;;  %v601_v60 = vld [vmem:[%s9038_s0 + $0x1220] sm:$0xff] }
 0x26c   :  { %3351 = vmatmul.mubr.f32.gmra.mrb[36].mxu0 %v435_v61  ;;  %2190 = vmatprep.mubr.f32.mxu1 %v272_v56  ;;  %v85_v61 = vld [vmem:[%s9038_s0 + $0x200] sm:$0xff]  ;;  %v624_v56 = vld [vmem:[%s9038_s0 + $0x12d8] sm:$0xff] }
 0x26d   :  { %3355 = vmatprep.mubr.f32.mxu0 %v458_v63  ;;  %4703 = vmatpush1.bf16.msra.mxu1 %v5602_v5  ;;  %v316_v5 = vld [vmem:[%s9038_s0 + $0x938] sm:$0xff] }
 0x26e   :  { %4688 = vmatprep.subr.bf16.mxu1 %v5378_v3  ;;  %v108_v63 = vld [vmem:[%s9038_s0 + $0x2b8] sm:$0xff] }
 0x26f   :  { %2191 = vmatmul.mubr.f32.gmra.mrb[22].mxu1 %v271_v0  ;;  %v623_v0 = vld [vmem:[%s9038_s0 + $0x12d0] sm:$0xff] }
 0x270   :  { %3356 = vmatmul.mubr.f32.gmra.mrb[38].mxu0 %v457_v1  ;;  %2195 = vmatprep.mubr.f32.mxu1 %v294_v62  ;;  %v107_v1 = vld [vmem:[%s9038_s0 + $0x2b0] sm:$0xff]  ;;  %v646_v62 = vld [vmem:[%s9038_s0 + $0x1388] sm:$0xff] }
 0x271   :  { %3360 = vmatprep.mubr.f32.mxu0 %v480_v2  ;;  %4704 = vmatpush1.bf16.msra.mxu1 %v5619_v13  ;;  %v338_v13 = vld [vmem:[%s9038_s0 + $0x9e8] sm:$0xff] }
 0x272   :  { %4689 = vmatprep.subr.bf16.mxu1 %v5378_v3  ;;  %v130_v2 = vld [vmem:[%s9038_s0 + $0x368] sm:$0xff] }
 0x273   :  { %2196 = vmatmul.mubr.f32.gmra.mrb[24].mxu1 %v293_v4  ;;  %v645_v4 = vld [vmem:[%s9038_s0 + $0x1380] sm:$0xff] }
 0x274   :  { %3361 = vmatmul.mubr.f32.gmra.mrb[40].mxu0 %v479_v6  ;;  %2200 = vmatprep.mubr.f32.mxu1 %v316_v5  ;;  %v129_v6 = vld [vmem:[%s9038_s0 + $0x360] sm:$0xff]  ;;  %v668_v5 = vld [vmem:[%s9038_s0 + $0x1438] sm:$0xff] }
 0x275   :  { %3365 = vmatprep.mubr.f32.mxu0 %v502_v7  ;;  %4705 = vmatpush1.bf16.msra.mxu1 %v5636_v20  ;;  %v360_v20 = vld [vmem:[%s9038_s0 + $0xa98] sm:$0xff] }
 0x276   :  { %4690 = vmatprep.subr.bf16.mxu1 %v5378_v3  ;;  %v152_v7 = vld [vmem:[%s9038_s0 + $0x418] sm:$0xff] }
 0x277   :  { %2201 = vmatmul.mubr.f32.gmra.mrb[26].mxu1 %v315_v9  ;;  %v667_v9 = vld [vmem:[%s9038_s0 + $0x1430] sm:$0xff] }
 0x278   :  { %3366 = vmatmul.mubr.f32.gmra.mrb[42].mxu0 %v501_v10  ;;  %2205 = vmatprep.mubr.f32.mxu1 %v338_v13  ;;  %v151_v10 = vld [vmem:[%s9038_s0 + $0x410] sm:$0xff]  ;;  %v690_v13 = vld [vmem:[%s9038_s0 + $0x14e8] sm:$0xff] }
 0x279   :  { %3370 = vmatprep.mubr.f32.mxu0 %v524_v11  ;;  %4706 = vmatpush1.bf16.msra.mxu1 %v5653_v27  ;;  %v382_v27 = vld [vmem:[%s9038_s0 + $0xb48] sm:$0xff] }
 0x27a   :  { %4691 = vmatprep.subr.bf16.mxu1 %v5378_v3  ;;  %v174_v11 = vld [vmem:[%s9038_s0 + $0x4c8] sm:$0xff] }
 0x27b   :  { %2206 = vmatmul.mubr.f32.gmra.mrb[28].mxu1 %v337_v14  ;;  %v689_v14 = vld [vmem:[%s9038_s0 + $0x14e0] sm:$0xff] }
 0x27c   :  { %3371 = vmatmul.mubr.f32.gmra.mrb[44].mxu0 %v523_v15  ;;  %2210 = vmatprep.mubr.f32.mxu1 %v360_v20  ;;  %v173_v15 = vld [vmem:[%s9038_s0 + $0x4c0] sm:$0xff]  ;;  %v712_v20 = vld [vmem:[%s9038_s0 + $0x1598] sm:$0xff] }
 0x27d   :  { %3375 = vmatprep.mubr.f32.mxu0 %v546_v16  ;;  %4707 = vmatpush1.bf16.msra.mxu1 %v5670_v34  ;;  %v404_v34 = vld [vmem:[%s9038_s0 + $0xbf8] sm:$0xff] }
 0x27e   :  { %4692 = vmatprep.subr.bf16.mxu1 %v5378_v3  ;;  %v590_v3 = vld [vmem:[%s9038_s0 + $0x11c8] sm:$0xff]  ;;  %v196_v16 = vld [vmem:[%s9038_s0 + $0x578] sm:$0xff] }
 0x27f   :  { %2211 = vmatmul.mubr.f32.gmra.mrb[30].mxu1 %v359_v17  ;;  %v711_v17 = vld [vmem:[%s9038_s0 + $0x1590] sm:$0xff] }
 0x280   :  { %3376 = vmatmul.mubr.f32.gmra.mrb[46].mxu0 %v545_v19  ;;  %2215 = vmatprep.mubr.f32.mxu1 %v382_v27  ;;  %v195_v19 = vld [vmem:[%s9038_s0 + $0x570] sm:$0xff]  ;;  %v560_v27 = vld [vmem:[%s9038_s0 + $0x10d8] sm:$0xff] }
 0x281   :  { %3380 = vmatprep.mubr.f32.mxu0 %v568_v21  ;;  %4708 = vmatpush1.bf16.msra.mxu1 %v5687_v41  ;;  %v426_v41 = vld [vmem:[%s9038_s0 + $0xca8] sm:$0xff] }
 0x282   :  { %v218_v21 = vld [vmem:[%s9038_s0 + $0x628] sm:$0xff] }
 0x283   :  { %2216 = vmatmul.mubr.f32.gmra.mrb[32].mxu1 %v381_v22  ;;  %v559_v22 = vld [vmem:[%s9038_s0 + $0x10d0] sm:$0xff] }
 0x284   :  { %3381 = vmatmul.mubr.f32.gmra.mrb[48].mxu0 %v567_v23  ;;  %2220 = vmatprep.mubr.f32.mxu1 %v404_v34  ;;  %v217_v23 = vld [vmem:[%s9038_s0 + $0x620] sm:$0xff]  ;;  %v582_v34 = vld [vmem:[%s9038_s0 + $0x1188] sm:$0xff] }
 0x285   :  { %3385 = vmatprep.mubr.f32.mxu0 %v590_v3  ;;  %v240_v3 = vld [vmem:[%s9038_s0 + $0x6d8] sm:$0xff] }
 0x287   :  { %2221 = vmatmul.mubr.f32.gmra.mrb[34].mxu1 %v403_v25  ;;  %v581_v25 = vld [vmem:[%s9038_s0 + $0x1180] sm:$0xff] }
 0x288   :  { %3386 = vmatmul.mubr.f32.gmra.mrb[50].mxu0 %v589_v26  ;;  %2225 = vmatprep.mubr.f32.mxu1 %v426_v41  ;;  %v239_v26 = vld [vmem:[%s9038_s0 + $0x6d0] sm:$0xff]  ;;  %v604_v41 = vld [vmem:[%s9038_s0 + $0x1238] sm:$0xff] }
 0x289   :  { %3390 = vmatprep.mubr.f32.mxu0 %v612_v28  ;;  %v262_v28 = vld [vmem:[%s9038_s0 + $0x788] sm:$0xff] }
 0x28b   :  { %2226 = vmatmul.mubr.f32.gmra.mrb[36].mxu1 %v425_v29  ;;  %v603_v29 = vld [vmem:[%s9038_s0 + $0x1230] sm:$0xff] }
 0x28c   :  { %3391 = vmatmul.mubr.f32.gmra.mrb[52].mxu0 %v611_v31  ;;  %2230 = vmatprep.mubr.f32.mxu1 %v448_v8  ;;  %v261_v31 = vld [vmem:[%s9038_s0 + $0x780] sm:$0xff]  ;;  %v626_v8 = vld [vmem:[%s9038_s0 + $0x12e8] sm:$0xff] }
 0x28d   :  { %3395 = vmatprep.mubr.f32.mxu0 %v634_v32  ;;  %v284_v32 = vld [vmem:[%s9038_s0 + $0x838] sm:$0xff] }
 0x28f   :  { %2231 = vmatmul.mubr.f32.gmra.mrb[38].mxu1 %v447_v33  ;;  %v625_v33 = vld [vmem:[%s9038_s0 + $0x12e0] sm:$0xff] }
 0x290   :  { %3396 = vmatmul.mubr.f32.gmra.mrb[54].mxu0 %v633_v35  ;;  %2235 = vmatprep.mubr.f32.mxu1 %v470_v12  ;;  %v283_v35 = vld [vmem:[%s9038_s0 + $0x830] sm:$0xff]  ;;  %v648_v12 = vld [vmem:[%s9038_s0 + $0x1398] sm:$0xff] }
 0x291   :  { %3400 = vmatprep.mubr.f32.mxu0 %v656_v37  ;;  %v306_v37 = vld [vmem:[%s9038_s0 + $0x8e8] sm:$0xff] }
 0x293   :  { %2236 = vmatmul.mubr.f32.gmra.mrb[40].mxu1 %v469_v38  ;;  %v647_v38 = vld [vmem:[%s9038_s0 + $0x1390] sm:$0xff] }
 0x294   :  { %3401 = vmatmul.mubr.f32.gmra.mrb[56].mxu0 %v655_v39  ;;  %2240 = vmatprep.mubr.f32.mxu1 %v492_v18  ;;  %v305_v39 = vld [vmem:[%s9038_s0 + $0x8e0] sm:$0xff]  ;;  %v670_v18 = vld [vmem:[%s9038_s0 + $0x1448] sm:$0xff] }
 0x295   :  { %3405 = vmatprep.mubr.f32.mxu0 %v678_v40  ;;  %v328_v40 = vld [vmem:[%s9038_s0 + $0x998] sm:$0xff] }
 0x297   :  { %2241 = vmatmul.mubr.f32.gmra.mrb[42].mxu1 %v491_v42  ;;  %v669_v42 = vld [vmem:[%s9038_s0 + $0x1440] sm:$0xff] }
 0x298   :  { %3406 = vmatmul.mubr.f32.gmra.mrb[58].mxu0 %v677_v43  ;;  %2245 = vmatprep.mubr.f32.mxu1 %v514_v24  ;;  %v327_v43 = vld [vmem:[%s9038_s0 + $0x990] sm:$0xff]  ;;  %v692_v24 = vld [vmem:[%s9038_s0 + $0x14f8] sm:$0xff] }
 0x299   :  { %3410 = vmatprep.mubr.f32.mxu0 %v700_v45  ;;  %v350_v45 = vld [vmem:[%s9038_s0 + $0xa48] sm:$0xff] }
 0x29b   :  { %2246 = vmatmul.mubr.f32.gmra.mrb[44].mxu1 %v513_v46  ;;  %v691_v46 = vld [vmem:[%s9038_s0 + $0x14f0] sm:$0xff] }
 0x29c   :  { %3411 = vmatmul.mubr.f32.gmra.mrb[60].mxu0 %v699_v47  ;;  %2250 = vmatprep.mubr.f32.mxu1 %v536_v30  ;;  %v349_v47 = vld [vmem:[%s9038_s0 + $0xa40] sm:$0xff]  ;;  %v714_v30 = vld [vmem:[%s9038_s0 + $0x15a8] sm:$0xff] }
 0x29d   :  { %3415 = vmatprep.mubr.f32.mxu0 %v722_v48  ;;  %v372_v48 = vld [vmem:[%s9038_s0 + $0xaf8] sm:$0xff] }
 0x29f   :  { %2251 = vmatmul.mubr.f32.gmra.mrb[46].mxu1 %v535_v49  ;;  %v713_v49 = vld [vmem:[%s9038_s0 + $0x15a0] sm:$0xff] }
 0x2a0   :  { %3416 = vmatmul.mubr.f32.gmra.mrb[62].mxu0 %v721_v51  ;;  %2255 = vmatprep.mubr.f32.mxu1 %v558_v36  ;;  %v371_v51 = vld [vmem:[%s9038_s0 + $0xaf0] sm:$0xff]  ;;  %v3678_v36 = vld [vmem:[%s9041_s3] sm:$0xff] }
 0x2a1   :  { %3976 = vmatprep.mubr.msk.f32.mxu0 %vm1070_vm3, %v42_v52  ;;  %v3679_v52 = vld [vmem:[%s9041_s3 + $0x8] sm:$0xff] }
 0x2a3   :  { %2256 = vmatmul.mubr.f32.gmra.mrb[48].mxu1 %v557_v53  ;;  %v394_v53 = vld [vmem:[%s9038_s0 + $0xba8] sm:$0xff] }
 0x2a4   :  { %3486 = vmatmul.mubr.f32.vlgmr.msra.gmra.mrb[0].mxu0 %v41_v54  ;;  %2260 = vmatprep.mubr.f32.mxu1 %v580_v44  ;;  %v4645_v54 = vpack.c.bf16 %v3679_v52, %v3678_v36  ;;  %v393_v44 = vld [vmem:[%s9038_s0 + $0xba0] sm:$0xff] }
 0x2a5   :  { %3977 = vmatprep.mubr.msk.f32.mxu0 %vm1070_vm3, %v64_v55  ;;  %v3680_v55 = vld [vmem:[%s9041_s3 + $0x10] sm:$0xff] }
 0x2a6   :  { %4646 = vmatprep.subr.bf16.mxu1 %v4645_v54 }
 0x2a7   :  { %2261 = vmatmul.mubr.f32.gmra.mrb[50].mxu1 %v579_v57  ;;  %v3681_v57 = vld [vmem:[%s9041_s3 + $0x18] sm:$0xff] }
 0x2a8   :  { %3491 = vmatmul.mubr.f32.gmra.mrb[2].mxu0 %v63_v58  ;;  %2265 = vmatprep.mubr.f32.mxu1 %v602_v50  ;;  %v416_v58 = vld [vmem:[%s9038_s0 + $0xc58] sm:$0xff]  ;;  %v4649_v50 = vpack.c.bf16 %v3681_v57, %v3680_v55 }
 0x2a9   :  { %3978 = vmatprep.mubr.msk.f32.mxu0 %vm1070_vm3, %v86_v59  ;;  %v415_v59 = vld [vmem:[%s9038_s0 + $0xc50] sm:$0xff] }
 0x2ab   :  { %2266 = vmatmul.mubr.f32.gmra.mrb[52].mxu1 %v601_v60  ;;  %v3682_v60 = vld [vmem:[%s9041_s3 + $0x20] sm:$0xff] }
 0x2ac   :  { %3496 = vmatmul.mubr.f32.gmra.mrb[4].mxu0 %v85_v61  ;;  %2270 = vmatprep.mubr.f32.mxu1 %v624_v56  ;;  %v3683_v61 = vld [vmem:[%s9041_s3 + $0x28] sm:$0xff] }
 0x2ad   :  { %3979 = vmatprep.mubr.msk.f32.mxu0 %vm1070_vm3, %v108_v63  ;;  %v438_v56 = vld [vmem:[%s9038_s0 + $0xd08] sm:$0xff]  ;;  %v4653_v63 = vpack.c.bf16 %v3683_v61, %v3682_v60 }
 0x2af   :  { %2271 = vmatmul.mubr.f32.gmra.mrb[54].mxu1 %v623_v0  ;;  %v437_v0 = vld [vmem:[%s9038_s0 + $0xd00] sm:$0xff] }
 0x2b0   :  { %3501 = vmatmul.mubr.f32.gmra.mrb[6].mxu0 %v107_v1  ;;  %2275 = vmatprep.mubr.f32.mxu1 %v646_v62  ;;  %v3684_v1 = vld [vmem:[%s9041_s3 + $0x30] sm:$0xff]  ;;  %v3685_v62 = vld [vmem:[%s9041_s3 + $0x38] sm:$0xff] }
 0x2b1   :  { %3980 = vmatprep.mubr.msk.f32.mxu0 %vm1070_vm3, %v130_v2  ;;  %v460_v2 = vld [vmem:[%s9038_s0 + $0xdb8] sm:$0xff] }
 0x2b3   :  { %2276 = vmatmul.mubr.f32.gmra.mrb[56].mxu1 %v645_v4  ;;  %v4657_v4 = vpack.c.bf16 %v3685_v62, %v3684_v1 }
 0x2b4   :  { %3506 = vmatmul.mubr.f32.gmra.mrb[8].mxu0 %v129_v6  ;;  %2280 = vmatprep.mubr.f32.mxu1 %v668_v5  ;;  %v459_v6 = vld [vmem:[%s9038_s0 + $0xdb0] sm:$0xff]  ;;  %v3686_v5 = vld [vmem:[%s9041_s3 + $0x40] sm:$0xff] }
 0x2b5   :  { %3981 = vmatprep.mubr.msk.f32.mxu0 %vm1070_vm3, %v152_v7  ;;  %v3687_v7 = vld [vmem:[%s9041_s3 + $0x48] sm:$0xff] }
 0x2b7   :  { %2281 = vmatmul.mubr.f32.gmra.mrb[58].mxu1 %v667_v9  ;;  %v482_v9 = vld [vmem:[%s9038_s0 + $0xe68] sm:$0xff] }
 0x2b8   :  { %3511 = vmatmul.mubr.f32.gmra.mrb[10].mxu0 %v151_v10  ;;  %2285 = vmatprep.mubr.f32.mxu1 %v690_v13  ;;  %v4661_v10 = vpack.c.bf16 %v3687_v7, %v3686_v5  ;;  %v481_v13 = vld [vmem:[%s9038_s0 + $0xe60] sm:$0xff] }
 0x2b9   :  { %3982 = vmatprep.mubr.msk.f32.mxu0 %vm1070_vm3, %v174_v11  ;;  %v3688_v11 = vld [vmem:[%s9041_s3 + $0x50] sm:$0xff] }
 0x2bb   :  { %2286 = vmatmul.mubr.f32.gmra.mrb[60].mxu1 %v689_v14  ;;  %v3689_v14 = vld [vmem:[%s9041_s3 + $0x58] sm:$0xff] }
 0x2bc   :  { %3516 = vmatmul.mubr.f32.gmra.mrb[12].mxu0 %v173_v15  ;;  %2290 = vmatprep.mubr.f32.mxu1 %v712_v20  ;;  %v504_v15 = vld [vmem:[%s9038_s0 + $0xf18] sm:$0xff]  ;;  %v4665_v20 = vpack.c.bf16 %v3689_v14, %v3688_v11 }
 0x2bd   :  { %3983 = vmatprep.mubr.msk.f32.mxu0 %vm1070_vm3, %v196_v16  ;;  %v503_v16 = vld [vmem:[%s9038_s0 + $0xf10] sm:$0xff] }
 0x2bf   :  { %2291 = vmatmul.mubr.f32.gmra.mrb[62].mxu1 %v711_v17  ;;  %v3690_v17 = vld [vmem:[%s9041_s3 + $0x60] sm:$0xff] }
 0x2c0   :  { %3521 = vmatmul.mubr.f32.gmra.mrb[14].mxu0 %v195_v19  ;;  %2480 = vmatprep.mubr.f32.mxu1 %v560_v27  ;;  %v3691_v19 = vld [vmem:[%s9041_s3 + $0x68] sm:$0xff] }
 0x2c1   :  { %3984 = vmatprep.mubr.msk.f32.mxu0 %vm1070_vm3, %v218_v21  ;;  %v526_v27 = vld [vmem:[%s9038_s0 + $0xfc8] sm:$0xff]  ;;  %v4669_v21 = vpack.c.bf16 %v3691_v19, %v3690_v17 }
 0x2c3   :  { %2481 = vmatmul.mubr.f32.vlgmr.msra.gmra.mrb[48].mxu1 %v559_v22  ;;  %v525_v22 = vld [vmem:[%s9038_s0 + $0xfc0] sm:$0xff] }
 0x2c4   :  { %3526 = vmatmul.mubr.f32.gmra.mrb[16].mxu0 %v217_v23  ;;  %2485 = vmatprep.mubr.f32.mxu1 %v582_v34  ;;  %v3692_v23 = vld [vmem:[%s9041_s3 + $0x70] sm:$0xff]  ;;  %v3693_v34 = vld [vmem:[%s9041_s3 + $0x78] sm:$0xff] }
 0x2c5   :  { %3985 = vmatprep.mubr.msk.f32.mxu0 %vm1070_vm3, %v240_v3  ;;  %4648 = vmatpush3.bf16.msra.mxu1 %v4645_v54  ;;  %v548_v3 = vld [vmem:[%s9038_s0 + $0x1078] sm:$0xff] }
 0x2c6   :  { %4650 = vmatprep.subr.bf16.mxu1 %v4649_v50 }
 0x2c7   :  { %2486 = vmatmul.mubr.f32.gmra.mrb[50].mxu1 %v581_v25  ;;  %v4673_v25 = vpack.c.bf16 %v3693_v34, %v3692_v23 }
 0x2c8   :  { %3531 = vmatmul.mubr.f32.gmra.mrb[18].mxu0 %v239_v26  ;;  %2490 = vmatprep.mubr.f32.mxu1 %v604_v41  ;;  %v547_v26 = vld [vmem:[%s9038_s0 + $0x1070] sm:$0xff]  ;;  %v570_v41 = vld [vmem:[%s9038_s0 + $0x1128] sm:$0xff] }
 0x2c9   :  { %3986 = vmatprep.mubr.msk.f32.mxu0 %vm1070_vm3, %v262_v28  ;;  %4652 = vmatpush3.bf16.msra.mxu1 %v4649_v50  ;;  %v569_v28 = vld [vmem:[%s9038_s0 + $0x1120] sm:$0xff] }
 0x2ca   :  { %4654 = vmatprep.subr.bf16.mxu1 %v4653_v63 }
 0x2cb   :  { %2491 = vmatmul.mubr.f32.gmra.mrb[52].mxu1 %v603_v29  ;;  %v592_v29 = vld [vmem:[%s9038_s0 + $0x11d8] sm:$0xff] }
 0x2cc   :  { %3536 = vmatmul.mubr.f32.gmra.mrb[20].mxu0 %v261_v31  ;;  %2495 = vmatprep.mubr.f32.mxu1 %v626_v8  ;;  %v591_v31 = vld [vmem:[%s9038_s0 + $0x11d0] sm:$0xff]  ;;  %v614_v8 = vld [vmem:[%s9038_s0 + $0x1288] sm:$0xff] }
 0x2cd   :  { %3987 = vmatprep.mubr.msk.f32.mxu0 %vm1070_vm3, %v284_v32  ;;  %4656 = vmatpush3.bf16.msra.mxu1 %v4653_v63  ;;  %v613_v32 = vld [vmem:[%s9038_s0 + $0x1280] sm:$0xff] }
 0x2ce   :  { %4658 = vmatprep.subr.bf16.mxu1 %v4657_v4 }
 0x2cf   :  { %2496 = vmatmul.mubr.f32.gmra.mrb[54].mxu1 %v625_v33  ;;  %v636_v33 = vld [vmem:[%s9038_s0 + $0x1338] sm:$0xff] }
 0x2d0   :  { %3541 = vmatmul.mubr.f32.gmra.mrb[22].mxu0 %v283_v35  ;;  %2500 = vmatprep.mubr.f32.mxu1 %v648_v12  ;;  %v635_v35 = vld [vmem:[%s9038_s0 + $0x1330] sm:$0xff]  ;;  %v658_v12 = vld [vmem:[%s9038_s0 + $0x13e8] sm:$0xff] }
 0x2d1   :  { %3988 = vmatprep.mubr.msk.f32.mxu0 %vm1070_vm3, %v306_v37  ;;  %4660 = vmatpush3.bf16.msra.mxu1 %v4657_v4  ;;  %v657_v37 = vld [vmem:[%s9038_s0 + $0x13e0] sm:$0xff] }
 0x2d2   :  { %4662 = vmatprep.subr.bf16.mxu1 %v4661_v10 }
 0x2d3   :  { %2501 = vmatmul.mubr.f32.gmra.mrb[56].mxu1 %v647_v38  ;;  %v680_v38 = vld [vmem:[%s9038_s0 + $0x1498] sm:$0xff] }
 0x2d4   :  { %3546 = vmatmul.mubr.f32.gmra.mrb[24].mxu0 %v305_v39  ;;  %2505 = vmatprep.mubr.f32.mxu1 %v670_v18  ;;  %v679_v39 = vld [vmem:[%s9038_s0 + $0x1490] sm:$0xff] }
 0x2d5   :  { %3989 = vmatprep.mubr.msk.f32.mxu0 %vm1070_vm3, %v328_v40  ;;  %4664 = vmatpush3.bf16.msra.mxu1 %v4661_v10  ;;  %v702_v40 = vld [vmem:[%s9038_s0 + $0x1548] sm:$0xff] }
 0x2d6   :  { %4666 = vmatprep.subr.bf16.mxu1 %v4665_v20 }
 0x2d7   :  { %2506 = vmatmul.mubr.f32.gmra.mrb[58].mxu1 %v669_v42 }
 0x2d8   :  { %3551 = vmatmul.mubr.f32.gmra.mrb[26].mxu0 %v327_v43  ;;  %2510 = vmatprep.mubr.f32.mxu1 %v692_v24  ;;  %v701_v43 = vld [vmem:[%s9038_s0 + $0x1540] sm:$0xff] }
 0x2d9   :  { %3990 = vmatprep.mubr.msk.f32.mxu0 %vm1070_vm3, %v350_v45  ;;  %4668 = vmatpush3.bf16.msra.mxu1 %v4665_v20  ;;  %v724_v45 = vld [vmem:[%s9038_s0 + $0x15f8] sm:$0xff] }
 0x2da   :  { %4670 = vmatprep.subr.bf16.mxu1 %v4669_v21 }
 0x2db   :  { %2511 = vmatmul.mubr.f32.gmra.mrb[60].mxu1 %v691_v46 }
 0x2dc   :  { %3556 = vmatmul.mubr.f32.gmra.mrb[28].mxu0 %v349_v47  ;;  %2515 = vmatprep.mubr.f32.mxu1 %v714_v30  ;;  %v723_v47 = vld [vmem:[%s9038_s0 + $0x15f0] sm:$0xff] }
 0x2dd   :  { %3991 = vmatprep.mubr.msk.f32.mxu0 %vm1070_vm3, %v372_v48  ;;  %4672 = vmatpush3.bf16.msra.mxu1 %v4669_v21 }
 0x2de   :  { %4674 = vmatprep.subr.bf16.mxu1 %v4673_v25 }
 0x2df   :  { %2516 = vmatmul.mubr.f32.gmra.mrb[62].mxu1 %v713_v49 }
 0x2e0   :  { %3561 = vmatmul.mubr.f32.gmra.mrb[30].mxu0 %v371_v51 }
 0x2e1   :  { %3992 = vmatprep.mubr.msk.f32.mxu0 %vm1070_vm3, %v394_v53  ;;  %4676 = vmatpush3.bf16.msra.mxu1 %v4673_v25 }
 0x2e4   :  { %3566 = vmatmul.mubr.f32.gmra.mrb[32].mxu0 %v393_v44 }
 0x2e5   :  { %3993 = vmatprep.mubr.msk.f32.mxu0 %vm1070_vm3, %v416_v58 }
 0x2e8   :  { %3571 = vmatmul.mubr.f32.gmra.mrb[34].mxu0 %v415_v59 }
 0x2e9   :  { %3994 = vmatprep.mubr.msk.f32.mxu0 %vm1070_vm3, %v438_v56 }
 0x2ec   :  { %3576 = vmatmul.mubr.f32.gmra.mrb[36].mxu0 %v437_v0 }
 0x2ed   :  { %3995 = vmatprep.mubr.msk.f32.mxu0 %vm1070_vm3, %v460_v2 }
 0x2f0   :  { %3581 = vmatmul.mubr.f32.gmra.mrb[38].mxu0 %v459_v6 }
 0x2f1   :  { %3996 = vmatprep.mubr.msk.f32.mxu0 %vm1070_vm3, %v482_v9 }
 0x2f4   :  { %3586 = vmatmul.mubr.f32.gmra.mrb[40].mxu0 %v481_v13 }
 0x2f5   :  { %3997 = vmatprep.mubr.msk.f32.mxu0 %vm1070_vm3, %v504_v15 }
 0x2f8   :  { %3591 = vmatmul.mubr.f32.gmra.mrb[42].mxu0 %v503_v16 }
 0x2f9   :  { %3998 = vmatprep.mubr.msk.f32.mxu0 %vm1070_vm3, %v526_v27 }
 0x2fc   :  { %3596 = vmatmul.mubr.f32.gmra.mrb[44].mxu0 %v525_v22 }
 0x2fd   :  { %3999 = vmatprep.mubr.msk.f32.mxu0 %vm1070_vm3, %v548_v3 }
 0x300   :  { %3601 = vmatmul.mubr.f32.gmra.mrb[46].mxu0 %v547_v26  ;;  %v8911_v26 = vld [vmem:[%s9040_s2] ss:$0 sm:$0xff] }
 0x301   :  { %4000 = vmatprep.mubr.msk.f32.mxu0 %vm1070_vm3, %v570_v41 }
 0x304   :  { %3606 = vmatmul.mubr.f32.gmra.mrb[48].mxu0 %v569_v28 }
 0x305   :  { %4001 = vmatprep.mubr.msk.f32.mxu0 %vm1070_vm3, %v592_v29 }
 0x308   :  { %3611 = vmatmul.mubr.f32.gmra.mrb[50].mxu0 %v591_v31 }
 0x309   :  { %4002 = vmatprep.mubr.msk.f32.mxu0 %vm1070_vm3, %v614_v8 }
 0x30c   :  { %3616 = vmatmul.mubr.f32.gmra.mrb[52].mxu0 %v613_v32 }
 0x30d   :  { %4003 = vmatprep.mubr.msk.f32.mxu0 %vm1070_vm3, %v636_v33 }
 0x310   :  { %3621 = vmatmul.mubr.f32.gmra.mrb[54].mxu0 %v635_v35 }
 0x311   :  { %4004 = vmatprep.mubr.msk.f32.mxu0 %vm1070_vm3, %v658_v12 }
 0x314   :  { %3626 = vmatmul.mubr.f32.gmra.mrb[56].mxu0 %v657_v37 }
 0x315   :  { %4005 = vmatprep.mubr.msk.f32.mxu0 %vm1070_vm3, %v680_v38 }
 0x316   :  { %v2137_v18 = vpop.f32.mrb[0].mxu1 }
 0x317   :  { %v2139_v42 = vpop.f32.mrb[1].mxu1  ;;  %v4709_v28 = vadd.f32 %v8911_v26, %v2137_v18 }
 0x318   :  { %3631 = vmatmul.mubr.f32.gmra.mrb[58].mxu0 %v679_v39 }
 0x319   :  { %4006 = vmatprep.mubr.msk.f32.mxu0 %vm1070_vm3, %v702_v40 }
 0x31a   :  { %v2142_v24 = vpop.f32.mrb[2].mxu1 }
 0x31b   :  { %v2144_v46 = vpop.f32.mrb[3].mxu1  ;;  %v4711_v32 = vadd.f32 %v8911_v26, %v2142_v24 }
 0x31c   :  { %3636 = vmatmul.mubr.f32.gmra.mrb[60].mxu0 %v701_v43 }
 0x31d   :  { %4007 = vmatprep.mubr.msk.f32.mxu0 %vm1070_vm3, %v724_v45 }
 0x31e   :  { %v2147_v30 = vpop.f32.mrb[4].mxu1 }
 0x31f   :  { %v2149_v48 = vpop.f32.mrb[5].mxu1  ;;  %v4713_v38 = vadd.f32 %v8911_v26, %v2147_v30 }
 0x320   :  { %3641 = vmatmul.mubr.f32.gmra.mrb[62].mxu0 %v723_v47 }
 0x322   :  { %v2152_v49 = vpop.f32.mrb[6].mxu1 }
 0x323   :  { %v2154_v51 = vpop.f32.mrb[7].mxu1  ;;  %v4715_v45 = vadd.f32 %v8911_v26, %v2152_v49 }
 0x326   :  { %v8868_v36 = vpop.f32.mrb[8].mxu1 }
 0x327   :  { %v2159_v52 = vpop.f32.mrb[9].mxu1  ;;  %v4717_v24 = vadd.f32 %v8911_v26, %v8868_v36 }
 0x32a   :  { %v8870_v53 = vpop.f32.mrb[10].mxu1 }
 0x32b   :  { %v2164_v54 = vpop.f32.mrb[11].mxu1  ;;  %v4719_v30 = vadd.f32 %v8911_v26, %v8870_v53 }
 0x32e   :  { %v8872_v44 = vpop.f32.mrb[12].mxu1 }
 0x32f   :  { %v2169_v55 = vpop.f32.mrb[13].mxu1 }
 0x332   :  { %v8874_v57 = vpop.f32.mrb[14].mxu1 }
 0x333   :  { %v2174_v58 = vpop.f32.mrb[15].mxu1 }
 0x336   :  { %v8876_v50 = vpop.f32.mrb[16].mxu1 }
 0x337   :  { %v2179_v59 = vpop.f32.mrb[17].mxu1 }
 0x33a   :  { %v8878_v60 = vpop.f32.mrb[18].mxu1 }
 0x33b   :  { %v2184_v61 = vpop.f32.mrb[19].mxu1 }
 0x33e   :  { %v8880_v56 = vpop.f32.mrb[20].mxu1 }
 0x33f   :  { %v2189_v63 = vpop.f32.mrb[21].mxu1 }
 0x340   :  { %v4721_v63 = vadd.f32 %v8911_v26, %v8872_v44 }
 0x342   :  { %v8882_v0 = vpop.f32.mrb[22].mxu1 }
 0x343   :  { %v2194_v1 = vpop.f32.mrb[23].mxu1 }
 0x346   :  { %v8884_v62 = vpop.f32.mrb[24].mxu1 }
 0x347   :  { %v2199_v2 = vpop.f32.mrb[25].mxu1 }
 0x34a   :  { %v8886_v4 = vpop.f32.mrb[26].mxu1 }
 0x34b   :  { %v2204_v6 = vpop.f32.mrb[27].mxu1 }
 0x34e   :  { %v8888_v5 = vpop.f32.mrb[28].mxu1 }
 0x34f   :  { %v2209_v7 = vpop.f32.mrb[29].mxu1 }
 0x350   :  { %v4723_v7 = vadd.f32 %v8911_v26, %v8874_v57 }
 0x352   :  { %v8890_v9 = vpop.f32.mrb[30].mxu1 }
 0x353   :  { %v2214_v10 = vpop.f32.mrb[31].mxu1 }
 0x356   :  { %v8892_v13 = vpop.f32.mrb[32].mxu1 }
 0x357   :  { %v2219_v11 = vpop.f32.mrb[33].mxu1 }
 0x35a   :  { %v8894_v14 = vpop.f32.mrb[34].mxu1 }
 0x35b   :  { %v2224_v15 = vpop.f32.mrb[35].mxu1 }
 0x35e   :  { %v8896_v20 = vpop.f32.mrb[36].mxu1 }
 0x35f   :  { %v2229_v16 = vpop.f32.mrb[37].mxu1 }
 0x360   :  { %v4725_v16 = vadd.f32 %v8911_v26, %v8876_v50  ;;  %v4729_v50 = vadd.f32 %v8911_v26, %v8880_v56  ;;  %v4733_v56 = vadd.f32 %v8911_v26, %v8884_v62  ;;  %v4737_v62 = vadd.f32 %v8911_v26, %v8888_v5 }
 0x361   :  { %v4741_v5 = vadd.f32 %v8911_v26, %v8892_v13 }
 0x362   :  { %v8898_v17 = vpop.f32.mrb[38].mxu1 }
 0x363   :  { %v2234_v19 = vpop.f32.mrb[39].mxu1 }
 0x366   :  { %v8900_v27 = vpop.f32.mrb[40].mxu1 }
 0x367   :  { %v2239_v21 = vpop.f32.mrb[41].mxu1 }
 0x36a   :  { %v8902_v22 = vpop.f32.mrb[42].mxu1 }
 0x36b   :  { %v2244_v23 = vpop.f32.mrb[43].mxu1 }
 0x36e   :  { %v8904_v34 = vpop.f32.mrb[44].mxu1 }
 0x36f   :  { %v2249_v3 = vpop.f32.mrb[45].mxu1 }
 0x372   :  { %v8906_v25 = vpop.f32.mrb[46].mxu1 }
 0x373   :  { %v2254_v41 = vpop.f32.mrb[47].mxu1 }
 0x377   :  { %v3487_v29 = vpop.f32.mrb[0].mxu0 }
 0x378   :  { %v4710_v31 = vadd.f32 %v4709_v28, %v3487_v29  ;;  %v3489_v8 = vpop.f32.mrb[1].mxu0  ;;  %v4727_v28 = vadd.f32 %v8911_v26, %v8878_v60  ;;  %v4731_v60 = vadd.f32 %v8911_v26, %v8882_v0  ;;  %v4735_v0 = vadd.f32 %v8911_v26, %v8886_v4 }
 0x379   :  { %v4739_v4 = vadd.f32 %v8911_v26, %v8890_v9 }
 0x37a   :  { %v3646_v33 = vmax.f32 %v4710_v31, 0.0 }
 0x37b   :  { %v3492_v35 = vpop.f32.mrb[2].mxu0 }
 0x37c   :  { %v4712_v12 = vadd.f32 %v4711_v32, %v3492_v35  ;;  %v3494_v37 = vpop.f32.mrb[3].mxu0  ;;  %4089 = vmatprep.mubr.f32.mxu1 %v3646_v33 }
 0x37e   :  { %v3647_v39 = vmax.f32 %v4712_v12, 0.0 }
 0x37f   :  { %v3497_v40 = vpop.f32.mrb[4].mxu0 }
 0x380   :  { %v4714_v42 = vadd.f32 %v4713_v38, %v3497_v40  ;;  %v3499_v43 = vpop.f32.mrb[5].mxu0  ;;  %4090 = vmatmul.mubr.f32.vlgmr.msra.gmra.mrb[64].mxu1 %v3647_v39 }
 0x382   :  { %v3648_v18 = vmax.f32 %v4714_v42, 0.0 }
 0x383   :  { %v3502_v46 = vpop.f32.mrb[6].mxu0 }
 0x384   :  { %v4716_v47 = vadd.f32 %v4715_v45, %v3502_v46  ;;  %v3504_v48 = vpop.f32.mrb[7].mxu0  ;;  %4092 = vmatprep.mubr.f32.mxu1 %v3648_v18 }
 0x386   :  { %v3649_v51 = vmax.f32 %v4716_v47, 0.0 }
 0x387   :  { %v3507_v52 = vpop.f32.mrb[8].mxu0 }
 0x388   :  { %v4718_v54 = vadd.f32 %v4717_v24, %v3507_v52  ;;  %v3509_v55 = vpop.f32.mrb[9].mxu0  ;;  %4093 = vmatmul.mubr.f32.gmra.mrb[66].mxu1 %v3649_v51 }
 0x38a   :  { %v3650_v58 = vmax.f32 %v4718_v54, 0.0 }
 0x38b   :  { %v3512_v59 = vpop.f32.mrb[10].mxu0 }
 0x38c   :  { %v4720_v61 = vadd.f32 %v4719_v30, %v3512_v59  ;;  %v3514_v49 = vpop.f32.mrb[11].mxu0  ;;  %4095 = vmatprep.mubr.f32.mxu1 %v3650_v58 }
 0x38e   :  { %v3651_v1 = vmax.f32 %v4720_v61, 0.0 }
 0x38f   :  { %v3517_v2 = vpop.f32.mrb[12].mxu0 }
 0x390   :  { %v4722_v6 = vadd.f32 %v4721_v63, %v3517_v2  ;;  %v3519_v36 = vpop.f32.mrb[13].mxu0  ;;  %4096 = vmatmul.mubr.f32.gmra.mrb[68].mxu1 %v3651_v1 }
 0x392   :  { %v3652_v10 = vmax.f32 %v4722_v6, 0.0 }
 0x393   :  { %v3522_v11 = vpop.f32.mrb[14].mxu0 }
 0x394   :  { %v4724_v15 = vadd.f32 %v4723_v7, %v3522_v11  ;;  %v3524_v53 = vpop.f32.mrb[15].mxu0  ;;  %4098 = vmatprep.mubr.f32.mxu1 %v3652_v10 }
 0x396   :  { %v3653_v19 = vmax.f32 %v4724_v15, 0.0  ;;  %v8927_v21 = vpop.f32.mrb[48].mxu1 }
 0x397   :  { %v3527_v44 = vpop.f32.mrb[16].mxu0  ;;  %v2484_v23 = vpop.f32.mrb[49].mxu1 }
 0x398   :  { %v4726_v3 = vadd.f32 %v4725_v16, %v3527_v44  ;;  %v3529_v41 = vpop.f32.mrb[17].mxu0  ;;  %4099 = vmatmul.mubr.f32.gmra.mrb[70].mxu1 %v3653_v19 }
 0x39a   :  { %v3654_v57 = vmax.f32 %v4726_v3, 0.0  ;;  %v8931_v29 = vpop.f32.mrb[50].mxu1 }
 0x39b   :  { %v3532_v31 = vpop.f32.mrb[18].mxu0  ;;  %v2489_v8 = vpop.f32.mrb[51].mxu1 }
 0x39c   :  { %v4728_v32 = vadd.f32 %v4727_v28, %v3532_v31  ;;  %v3534_v33 = vpop.f32.mrb[19].mxu0  ;;  %4101 = vmatprep.mubr.f32.mxu1 %v3654_v57  ;;  %v4743_v57 = vadd.f32 %v8911_v26, %v8894_v14 }
 0x39d   :  { %v4745_v33 = vadd.f32 %v8911_v26, %v8896_v20 }
 0x39e   :  { %v3655_v35 = vmax.f32 %v4728_v32, 0.0  ;;  %v8935_v12 = vpop.f32.mrb[52].mxu1 }
 0x39f   :  { %v3537_v37 = vpop.f32.mrb[20].mxu0  ;;  %v2494_v38 = vpop.f32.mrb[53].mxu1 }
 0x3a0   :  { %v4730_v39 = vadd.f32 %v4729_v50, %v3537_v37  ;;  %v3539_v40 = vpop.f32.mrb[21].mxu0  ;;  %4102 = vmatmul.mubr.f32.gmra.mrb[72].mxu1 %v3655_v35  ;;  %v4747_v38 = vadd.f32 %v8911_v26, %v8898_v17 }
 0x3a2   :  { %v3656_v42 = vmax.f32 %v4730_v39, 0.0  ;;  %v8939_v43 = vpop.f32.mrb[54].mxu1 }
 0x3a3   :  { %v3542_v45 = vpop.f32.mrb[22].mxu0  ;;  %v2499_v18 = vpop.f32.mrb[55].mxu1 }
 0x3a4   :  { %v4732_v46 = vadd.f32 %v4731_v60, %v3542_v45  ;;  %v3544_v47 = vpop.f32.mrb[23].mxu0  ;;  %4104 = vmatprep.mubr.f32.mxu1 %v3656_v42  ;;  %v4749_v42 = vadd.f32 %v8911_v26, %v8900_v27 }
 0x3a5   :  { %v4751_v47 = vadd.f32 %v8911_v26, %v8902_v22 }
 0x3a6   :  { %v3657_v48 = vmax.f32 %v4732_v46, 0.0  ;;  %v8943_v24 = vpop.f32.mrb[56].mxu1 }
 0x3a7   :  { %v3547_v51 = vpop.f32.mrb[24].mxu0  ;;  %v2504_v52 = vpop.f32.mrb[57].mxu1 }
 0x3a8   :  { %v4734_v54 = vadd.f32 %v4733_v56, %v3547_v51  ;;  %v3549_v55 = vpop.f32.mrb[25].mxu0  ;;  %4105 = vmatmul.mubr.f32.gmra.mrb[74].mxu1 %v3657_v48  ;;  %v4753_v52 = vadd.f32 %v8911_v26, %v8904_v34 }
 0x3aa   :  { %v3658_v30 = vmax.f32 %v4734_v54, 0.0  ;;  %v8947_v58 = vpop.f32.mrb[58].mxu1 }
 0x3ab   :  { %v3552_v59 = vpop.f32.mrb[26].mxu0  ;;  %v2509_v61 = vpop.f32.mrb[59].mxu1 }
 0x3ac   :  { %v4736_v49 = vadd.f32 %v4735_v0, %v3552_v59  ;;  %v3554_v63 = vpop.f32.mrb[27].mxu0  ;;  %4107 = vmatprep.mubr.f32.mxu1 %v3658_v30  ;;  %v4755_v30 = vadd.f32 %v8911_v26, %v8906_v25 }
 0x3ad   :  { %v4757_v63 = vadd.f32 %v8911_v26, %v8927_v21 }
 0x3ae   :  { %v3659_v1 = vmax.f32 %v4736_v49, 0.0  ;;  %v8951_v2 = vpop.f32.mrb[60].mxu1 }
 0x3af   :  { %v3557_v6 = vpop.f32.mrb[28].mxu0  ;;  %v2514_v36 = vpop.f32.mrb[61].mxu1 }
 0x3b0   :  { %v4738_v7 = vadd.f32 %v4737_v62, %v3557_v6  ;;  %v3559_v10 = vpop.f32.mrb[29].mxu0  ;;  %4108 = vmatmul.mubr.f32.gmra.mrb[76].mxu1 %v3659_v1  ;;  %v4759_v36 = vadd.f32 %v8911_v26, %v8931_v29 }
 0x3b2   :  { %v3660_v11 = vmax.f32 %v4738_v7, 0.0  ;;  %v8955_v15 = vpop.f32.mrb[62].mxu1 }
 0x3b3   :  { %v3562_v53 = vpop.f32.mrb[30].mxu0  ;;  %v2519_v16 = vpop.f32.mrb[63].mxu1 }
 0x3b4   :  { %v4740_v19 = vadd.f32 %v4739_v4, %v3562_v53  ;;  %v3564_v44 = vpop.f32.mrb[31].mxu0  ;;  %4110 = vmatprep.mubr.f32.mxu1 %v3660_v11  ;;  %v4761_v11 = vadd.f32 %v8911_v26, %v8935_v12 }
 0x3b5   :  { %v4763_v44 = vadd.f32 %v8911_v26, %v8939_v43 }
 0x3b6   :  { %v3661_v23 = vmax.f32 %v4740_v19, 0.0 }
 0x3b7   :  { %v3567_v3 = vpop.f32.mrb[32].mxu0 }
 0x3b8   :  { %v4742_v41 = vadd.f32 %v4741_v5, %v3567_v3  ;;  %v3569_v28 = vpop.f32.mrb[33].mxu0  ;;  %4111 = vmatmul.mubr.f32.gmra.mrb[78].mxu1 %v3661_v23 }
 0x3ba   :  { %v3662_v9 = vmax.f32 %v4742_v41, 0.0  ;;  %v4765_v41 = vadd.f32 %v8911_v26, %v8943_v24 }
 0x3bb   :  { %v3572_v31 = vpop.f32.mrb[34].mxu0 }
 0x3bc   :  { %v4744_v8 = vadd.f32 %v4743_v57, %v3572_v31  ;;  %v3574_v32 = vpop.f32.mrb[35].mxu0  ;;  %4113 = vmatprep.mubr.f32.mxu1 %v3662_v9  ;;  %v4767_v31 = vadd.f32 %v8911_v26, %v8947_v58 }
 0x3be   :  { %v3663_v50 = vmax.f32 %v4744_v8, 0.0 }
 0x3bf   :  { %v3577_v35 = vpop.f32.mrb[36].mxu0 }
 0x3c0   :  { %v4746_v37 = vadd.f32 %v4745_v33, %v3577_v35  ;;  %v3579_v13 = vpop.f32.mrb[37].mxu0  ;;  %4114 = vmatmul.mubr.f32.gmra.mrb[80].mxu1 %v3663_v50  ;;  %v4769_v50 = vadd.f32 %v8911_v26, %v8951_v2 }
 0x3c2   :  { %v3664_v39 = vmax.f32 %v4746_v37, 0.0 }
 0x3c3   :  { %v3582_v40 = vpop.f32.mrb[38].mxu0 }
 0x3c4   :  { %v4748_v60 = vadd.f32 %v4747_v38, %v3582_v40  ;;  %v3584_v14 = vpop.f32.mrb[39].mxu0  ;;  %4116 = vmatprep.mubr.f32.mxu1 %v3664_v39  ;;  %v4771_v38 = vadd.f32 %v8911_v26, %v8955_v15 }
 0x3c6   :  { %v3665_v45 = vmax.f32 %v4748_v60, 0.0 }
 0x3c7   :  { %v3587_v18 = vpop.f32.mrb[40].mxu0 }
 0x3c8   :  { %v4750_v46 = vadd.f32 %v4749_v42, %v3587_v18  ;;  %v3589_v20 = vpop.f32.mrb[41].mxu0  ;;  %4117 = vmatmul.mubr.f32.gmra.mrb[82].mxu1 %v3665_v45  ;;  %v8992_v42 = vld [vmem:[%s9042_s4] ss:$0 sm:$0xff]  ;;  %s5380_s4 = smov [#allocation2]  }
 0x3c9   :  { %s3963_s18 = sshll.u32 %s5380_s4, 4  ;;  %s3964_s18 = int_to_ptr.vmem [resolvable:$true] %s3963_s18 }
 0x3ca   :  { %v3666_v56 = vmax.f32 %v4750_v46, 0.0  ;;  %s5354_s19 = scalar_lea.vmem %s3964_s18, 4096  ;;  %p5359_p1 = scmp.lt.s32.totalorder %s3964_s18, %s3964_s18 }
 0x3cb   :  { %v3592_v48 = vpop.f32.mrb[42].mxu0  ;;  %p5355_p0 = scmp.ne.s32.totalorder %s3964_s18, %s5354_s19  ;;  %p5360_p2 = scmp.lt.s32.totalorder %s5354_s19, %s5354_s19 }
 0x3cc   :  { %v4752_v51 = vadd.f32 %v4751_v47, %v3592_v48  ;;  %v3594_v17 = vpop.f32.mrb[43].mxu0  ;;  %4119 = vmatprep.mubr.f32.mxu1 %v3666_v56 }
 0x3cd   :  { %p5361_p3 = por %p5360_p2, %p5359_p1 }
 0x3ce   :  { %v3667_v54 = vmax.f32 %v4752_v51, 0.0 }
 0x3cf   :  { %v3597_v55 = vpop.f32.mrb[44].mxu0  ;;  %p5362_p4 = pnand %p5361_p3, %p5355_p0 }
 0x3d0   :  { %v4754_v0 = vadd.f32 %v4753_v52, %v3597_v55  ;;  %v3599_v27 = vpop.f32.mrb[45].mxu0  ;;  %4120 = vmatmul.mubr.f32.gmra.mrb[84].mxu1 %v3667_v54 }
 0x3d2   :  { %v3668_v59 = vmax.f32 %v4754_v0, 0.0 }
 0x3d3   :  { %v3602_v61 = vpop.f32.mrb[46].mxu0 }
 0x3d4   :  { %v4756_v49 = vadd.f32 %v4755_v30, %v3602_v61  ;;  %v3604_v22 = vpop.f32.mrb[47].mxu0  ;;  %4122 = vmatprep.mubr.f32.mxu1 %v3668_v59 }
 0x3d6   :  { %v3669_v62 = vmax.f32 %v4756_v49, 0.0 }
 0x3d7   :  { %v3607_v1 = vpop.f32.mrb[48].mxu0 }
 0x3d8   :  { %v4758_v6 = vadd.f32 %v4757_v63, %v3607_v1  ;;  %v3609_v34 = vpop.f32.mrb[49].mxu0  ;;  %4123 = vmatmul.mubr.f32.gmra.mrb[86].mxu1 %v3669_v62 }
 0x3da   :  { %v3670_v7 = vmax.f32 %v4758_v6, 0.0 }
 0x3db   :  { %v3612_v10 = vpop.f32.mrb[50].mxu0 }
 0x3dc   :  { %v4760_v4 = vadd.f32 %v4759_v36, %v3612_v10  ;;  %v3614_v25 = vpop.f32.mrb[51].mxu0  ;;  %4125 = vmatprep.mubr.f32.mxu1 %v3670_v7 }
 0x3de   :  { %v3671_v53 = vmax.f32 %v4760_v4, 0.0 }
 0x3df   :  { %v3617_v16 = vpop.f32.mrb[52].mxu0 }
 0x3e0   :  { %v4762_v19 = vadd.f32 %v4761_v11, %v3617_v16  ;;  %v3619_v21 = vpop.f32.mrb[53].mxu0  ;;  %4126 = vmatmul.mubr.f32.gmra.mrb[88].mxu1 %v3671_v53 }
 0x3e2   :  { %v3672_v5 = vmax.f32 %v4762_v19, 0.0 }
 0x3e3   :  { %v3622_v23 = vpop.f32.mrb[54].mxu0 }
 0x3e4   :  { %v4764_v3 = vadd.f32 %v4763_v44, %v3622_v23  ;;  %v3624_v29 = vpop.f32.mrb[55].mxu0  ;;  %4128 = vmatprep.mubr.f32.mxu1 %v3672_v5 }
 0x3e6   :  { %v3673_v28 = vmax.f32 %v4764_v3, 0.0 }
 0x3e7   :  { %v3627_v57 = vpop.f32.mrb[56].mxu0 }
 0x3e8   :  { %v4766_v9 = vadd.f32 %v4765_v41, %v3627_v57  ;;  %v3629_v12 = vpop.f32.mrb[57].mxu0  ;;  %4129 = vmatmul.mubr.f32.gmra.mrb[90].mxu1 %v3673_v28 }
 0x3ea   :  { %v3674_v8 = vmax.f32 %v4766_v9, 0.0 }
 0x3eb   :  { %v3632_v32 = vpop.f32.mrb[58].mxu0 }
 0x3ec   :  { %v4768_v33 = vadd.f32 %v4767_v31, %v3632_v32  ;;  %v3634_v43 = vpop.f32.mrb[59].mxu0  ;;  %4131 = vmatprep.mubr.f32.mxu1 %v3674_v8 }
 0x3ee   :  { %v3675_v35 = vmax.f32 %v4768_v33, 0.0 }
 0x3ef   :  { %v3637_v37 = vpop.f32.mrb[60].mxu0 }
 0x3f0   :  { %v4770_v13 = vadd.f32 %v4769_v50, %v3637_v37  ;;  %v3639_v24 = vpop.f32.mrb[61].mxu0  ;;  %4132 = vmatmul.mubr.f32.gmra.mrb[92].mxu1 %v3675_v35 }
 0x3f2   :  { %v3676_v39 = vmax.f32 %v4770_v13, 0.0 }
 0x3f3   :  { %v3642_v40 = vpop.f32.mrb[62].mxu0 }
 0x3f4   :  { %v4772_v60 = vadd.f32 %v4771_v38, %v3642_v40  ;;  %v3644_v58 = vpop.f32.mrb[63].mxu0  ;;  %4134 = vmatprep.mubr.f32.mxu1 %v3676_v39 }
 0x3f6   :  { %v3677_v14 = vmax.f32 %v4772_v60, 0.0 }
 0x3f8   :  { %4135 = vmatmul.mubr.f32.gmra.mrb[94].mxu1 %v3677_v14 }
 0x453   :  { %v4091_v2 = vpop.f32.mrb[64].mxu1 }
 0x454   :  { %v3773_v45 = vadd.f32 %v4091_v2, %v8992_v42  ;;  %v3767_v18 = vpop.f32.mrb[65].mxu1 }
 0x455   :  { %v3768_v46 = vadd.f32 %v8992_v42, %v3767_v18 }
 0x456   :  { %3927 = vst [vmem:[#allocation2 + $0x8] sm:$0xff] %v3773_v45 }
 0x457   :  { %3926 = vst [vmem:[#allocation2] sm:$0xff] %v3768_v46 }
 0x45b   :  { %v4094_v26 = vpop.f32.mrb[66].mxu1 }
 0x45c   :  { %v3783_v15 = vadd.f32 %v4094_v26, %v8992_v42  ;;  %v3777_v20 = vpop.f32.mrb[67].mxu1 }
 0x45d   :  { %v3778_v47 = vadd.f32 %v8992_v42, %v3777_v20 }
 0x45e   :  { %3929 = vst [vmem:[#allocation2 + $0x18] sm:$0xff] %v3783_v15 }
 0x45f   :  { %3928 = vst [vmem:[#allocation2 + $0x10] sm:$0xff] %v3778_v47 }
 0x463   :  { %v4097_v56 = vpop.f32.mrb[68].mxu1 }
 0x464   :  { %v3793_v48 = vadd.f32 %v4097_v56, %v8992_v42  ;;  %v3787_v51 = vpop.f32.mrb[69].mxu1 }
 0x465   :  { %v3788_v17 = vadd.f32 %v8992_v42, %v3787_v51 }
 0x466   :  { %3931 = vst [vmem:[#allocation2 + $0x28] sm:$0xff] %v3793_v48 }
 0x467   :  { %3930 = vst [vmem:[#allocation2 + $0x20] sm:$0xff] %v3788_v17 }
 0x46b   :  { %v4100_v52 = vpop.f32.mrb[70].mxu1 }
 0x46c   :  { %v3803_v54 = vadd.f32 %v4100_v52, %v8992_v42  ;;  %v3797_v55 = vpop.f32.mrb[71].mxu1 }
 0x46d   :  { %v3798_v0 = vadd.f32 %v8992_v42, %v3797_v55 }
 0x46e   :  { %3933 = vst [vmem:[#allocation2 + $0x38] sm:$0xff] %v3803_v54 }
 0x46f   :  { %3932 = vst [vmem:[#allocation2 + $0x30] sm:$0xff] %v3798_v0 }
 0x473   :  { %v4103_v27 = vpop.f32.mrb[72].mxu1 }
 0x474   :  { %v3813_v30 = vadd.f32 %v4103_v27, %v8992_v42  ;;  %v3807_v59 = vpop.f32.mrb[73].mxu1 }
 0x475   :  { %v3808_v61 = vadd.f32 %v8992_v42, %v3807_v59 }
 0x476   :  { %3935 = vst [vmem:[#allocation2 + $0x48] sm:$0xff] %v3813_v30 }
 0x477   :  { %3934 = vst [vmem:[#allocation2 + $0x40] sm:$0xff] %v3808_v61 }
 0x47b   :  { %v4106_v49 = vpop.f32.mrb[74].mxu1 }
 0x47c   :  { %v3823_v22 = vadd.f32 %v4106_v49, %v8992_v42  ;;  %v3817_v63 = vpop.f32.mrb[75].mxu1 }
 0x47d   :  { %v3818_v62 = vadd.f32 %v8992_v42, %v3817_v63 }
 0x47e   :  { %3937 = vst [vmem:[#allocation2 + $0x58] sm:$0xff] %v3823_v22 }
 0x47f   :  { %3936 = vst [vmem:[#allocation2 + $0x50] sm:$0xff] %v3818_v62 }
 0x483   :  { %v4109_v1 = vpop.f32.mrb[76].mxu1 }
 0x484   :  { %v3833_v6 = vadd.f32 %v4109_v1, %v8992_v42  ;;  %v3827_v34 = vpop.f32.mrb[77].mxu1 }
 0x485   :  { %v3828_v36 = vadd.f32 %v8992_v42, %v3827_v34 }
 0x486   :  { %3939 = vst [vmem:[#allocation2 + $0x68] sm:$0xff] %v3833_v6 }
 0x487   :  { %3938 = vst [vmem:[#allocation2 + $0x60] sm:$0xff] %v3828_v36 }
 0x48b   :  { %v4112_v7 = vpop.f32.mrb[78].mxu1 }
 0x48c   :  { %v3843_v10 = vadd.f32 %v4112_v7, %v8992_v42  ;;  %v3837_v4 = vpop.f32.mrb[79].mxu1 }
 0x48d   :  { %v3838_v25 = vadd.f32 %v8992_v42, %v3837_v4 }
 0x48e   :  { %3941 = vst [vmem:[#allocation2 + $0x78] sm:$0xff] %v3843_v10 }
 0x48f   :  { %3940 = vst [vmem:[#allocation2 + $0x70] sm:$0xff] %v3838_v25 }
 0x493   :  { %v4115_v11 = vpop.f32.mrb[80].mxu1 }
 0x494   :  { %v3853_v53 = vadd.f32 %v4115_v11, %v8992_v42  ;;  %v3847_v16 = vpop.f32.mrb[81].mxu1 }
 0x495   :  { %v3848_v19 = vadd.f32 %v8992_v42, %v3847_v16 }
 0x496   :  { %3943 = vst [vmem:[#allocation2 + $0x88] sm:$0xff] %v3853_v53 }
 0x497   :  { %3942 = vst [vmem:[#allocation2 + $0x80] sm:$0xff] %v3848_v19 }
 0x49b   :  { %v4118_v21 = vpop.f32.mrb[82].mxu1 }
 0x49c   :  { %v3863_v44 = vadd.f32 %v4118_v21, %v8992_v42  ;;  %v3857_v5 = vpop.f32.mrb[83].mxu1 }
 0x49d   :  { %v3858_v23 = vadd.f32 %v8992_v42, %v3857_v5 }
 0x49e   :  { %3945 = vst [vmem:[#allocation2 + $0x98] sm:$0xff] %v3863_v44 }
 0x49f   :  { %3944 = vst [vmem:[#allocation2 + $0x90] sm:$0xff] %v3858_v23 }
 0x4a3   :  { %v4121_v3 = vpop.f32.mrb[84].mxu1 }
 0x4a4   :  { %v3873_v29 = vadd.f32 %v4121_v3, %v8992_v42  ;;  %v3867_v41 = vpop.f32.mrb[85].mxu1 }
 0x4a5   :  { %v3868_v28 = vadd.f32 %v8992_v42, %v3867_v41 }
 0x4a6   :  { %3947 = vst [vmem:[#allocation2 + $0xa8] sm:$0xff] %v3873_v29 }
 0x4a7   :  { %3946 = vst [vmem:[#allocation2 + $0xa0] sm:$0xff] %v3868_v28 }
 0x4ab   :  { %v4124_v57 = vpop.f32.mrb[86].mxu1 }
 0x4ac   :  { %v3883_v9 = vadd.f32 %v4124_v57, %v8992_v42  ;;  %v3877_v12 = vpop.f32.mrb[87].mxu1 }
 0x4ad   :  { %v3878_v31 = vadd.f32 %v8992_v42, %v3877_v12 }
 0x4ae   :  { %3949 = vst [vmem:[#allocation2 + $0xb8] sm:$0xff] %v3883_v9 }
 0x4af   :  { %3948 = vst [vmem:[#allocation2 + $0xb0] sm:$0xff] %v3878_v31 }
 0x4b3   :  { %v4127_v8 = vpop.f32.mrb[88].mxu1 }
 0x4b4   :  { %v3893_v32 = vadd.f32 %v4127_v8, %v8992_v42  ;;  %v3887_v33 = vpop.f32.mrb[89].mxu1 }
 0x4b5   :  { %v3888_v43 = vadd.f32 %v8992_v42, %v3887_v33 }
 0x4b6   :  { %3951 = vst [vmem:[#allocation2 + $0xc8] sm:$0xff] %v3893_v32 }
 0x4b7   :  { %3950 = vst [vmem:[#allocation2 + $0xc0] sm:$0xff] %v3888_v43 }
 0x4bb   :  { %v4130_v50 = vpop.f32.mrb[90].mxu1 }
 0x4bc   :  { %v3903_v35 = vadd.f32 %v4130_v50, %v8992_v42  ;;  %v3897_v37 = vpop.f32.mrb[91].mxu1 }
 0x4bd   :  { %v3898_v13 = vadd.f32 %v8992_v42, %v3897_v37 }
 0x4be   :  { %3953 = vst [vmem:[#allocation2 + $0xd8] sm:$0xff] %v3903_v35 }
 0x4bf   :  { %3952 = vst [vmem:[#allocation2 + $0xd0] sm:$0xff] %v3898_v13 }
 0x4c3   :  { %v4133_v24 = vpop.f32.mrb[92].mxu1 }
 0x4c4   :  { %v3913_v38 = vadd.f32 %v4133_v24, %v8992_v42  ;;  %v3907_v39 = vpop.f32.mrb[93].mxu1 }
 0x4c5   :  { %v3908_v40 = vadd.f32 %v8992_v42, %v3907_v39 }
 0x4c6   :  { %3955 = vst [vmem:[#allocation2 + $0xe8] sm:$0xff] %v3913_v38 }
 0x4c7   :  { %3954 = vst [vmem:[#allocation2 + $0xe0] sm:$0xff] %v3908_v40 }
 0x4cb   :  { %v4136_v60 = vpop.f32.mrb[94].mxu1 }
 0x4cc   :  { %v3923_v58 = vadd.f32 %v4136_v60, %v8992_v42  ;;  %v3917_v14 = vpop.f32.mrb[95].mxu1 }
 0x4cd   :  { %v3918_v2 = vadd.f32 %v8992_v42, %v3917_v14 }
 0x4ce   :  { %3957 = vst [vmem:[#allocation2 + $0xf8] sm:$0xff] %v3923_v58 }
 0x4cf   :  { %3956 = vst [vmem:[#allocation2 + $0xf0] sm:$0xff] %v3918_v2 }
 0x4d0   :  { %5365 = shalt.err (!%p5362_p4)
}
 0x4d1   :  { %s5366_s22 = scalar_lea.hbm %s9043_s5, 4096 }
 0x4d2   :  { %p5367_p5 = scmp.ne.s32.totalorder %s9043_s5, %s5366_s22  ;;  %p5370_p6 = scmp.lt.u32.totalorder %s5366_s22, %s9043_s5 }
 0x4d4   :  { %p5372_p7 = pnand %p5370_p6, %p5367_p5 }
 0x4d6   :  { %5375 = shalt.err (!%p5372_p7)
}
 0x4d7   :  { %s5381_s27 = smov 128   ;;  %s5382_s28 = smov 8  }
 0x4d8   :  { %3969 = dma.vmem_to_hbm [thread:$0]  %s3964_s18, 4096, %s9043_s5, [#allocation3], %s5381_s27, %s5381_s27, %s5382_s28  }
 0x4d9   :  { %5376 = dma.done.wait [#allocation3], 4096  }
 0x4da   :  { %5377 = vsyncadd [#allocation3], 4294963200 }
 0x4db   :  { %3973 = vsyncpa [#allocation3], 1 }

</bundles_post_ra>
